<compile_context>
chip_gen: v7x
topology: tpu7x:2x2x1
jax: 0.10.0
libtpu: 0.0.40
codegen_flags: <defaults>
</compile_context>

<pallas_src>
import functools

import jax
import jax.numpy as jnp
from jax import lax
from jax.experimental import pallas as pl
from jax.experimental.pallas import tpu as pltpu

LEAKY_SLOPE = 0.1
BN_EPS = 1e-5


# ---------------------------------------------------------------------------
# Fused per-layer kernel: Conv3x3 + batch stats (phase 0), BN + LeakyReLU
# (+ optional fused 2x2 max-pool) (phase 1).
# ---------------------------------------------------------------------------
def _fused_layer_kernel(x_ref, w_ref, gamma_ref, beta_ref, o_ref,
                        xpad_ref, ybuf_ref, ssum_ref, ssq_ref,
                        *, pool, inv_count):
    # x_ref     : (1, H, W, Cin)        input tile for sample b (phase 0 only)
    # w_ref     : (3, 3, Cin, Cout)     HWIO weights, bf16, loaded once
    # gamma/beta: (1, Cout)             BN affine parameters
    # o_ref     : (1, H, W, Cout) or (1, H/2, W/2, Cout)   layer output
    # xpad_ref  : (H+2, W+2, Cin) VMEM  zero-halo scratch (border zeroed once)
    # ybuf_ref  : (B, H, W, Cout) VMEM  conv outputs, resident across phases
    # ssum/ssq  : (1, Cout) VMEM        batch sum / sum-of-squares accumulators
    phase = pl.program_id(0)
    b = pl.program_id(1)
    B, H, W, Cout = ybuf_ref.shape
    Cin = x_ref.shape[3]

    @pl.when(phase == 0)
    def _conv_and_stats():
        @pl.when(b == 0)
        def _init():
            xpad_ref[...] = jnp.zeros_like(xpad_ref)      # halo border = 0
            ssum_ref[...] = jnp.zeros_like(ssum_ref)
            ssq_ref[...] = jnp.zeros_like(ssq_ref)

        # Fill the interior of the padded scratch (border stays zero).
        xpad_ref[1:H + 1, 1:W + 1, :] = x_ref[0]

        # 9-tap conv as bf16 MXU matmuls with an f32 accumulator.
        acc = jnp.zeros((H * W, Cout), jnp.float32)
        for dy in range(3):
            for dx in range(3):
                patch = xpad_ref[dy:dy + H, dx:dx + W, :].reshape(H * W, Cin)
                acc = acc + jnp.dot(patch.astype(jnp.bfloat16), w_ref[dy, dx],
                                    preferred_element_type=jnp.float32)

        ybuf_ref[b] = acc.reshape(H, W, Cout)
        ssum_ref[...] += jnp.sum(acc, axis=0, keepdims=True)
        ssq_ref[...] += jnp.sum(acc * acc, axis=0, keepdims=True)

    @pl.when(phase == 1)
    def _bn_act_pool():
        # Batch statistics -> BN scale/shift (biased variance, clamped >= 0).
        mean = ssum_ref[...] * inv_count
        var = jnp.maximum(ssq_ref[...] * inv_count - mean * mean, 0.0)
        scale = gamma_ref[...] * lax.rsqrt(var + BN_EPS)      # (1, Cout)
        shift = beta_ref[...] - mean * scale                  # (1, Cout)

        def act(t):                                           # BN + LeakyReLU
            u = t * scale + shift
            return jnp.where(u > 0, u, LEAKY_SLOPE * u)

        if pool:
            # Fused MaxPool2d(2,2): strided reads along W from the VMEM-resident
            # conv output, then a row-pair max via a leading-dim reshape.
            H2, W2 = H // 2, W // 2
            c0 = act(ybuf_ref[b, :, pl.ds(0, W2, stride=2), :])   # even cols
            c1 = act(ybuf_ref[b, :, pl.ds(1, W2, stride=2), :])   # odd cols
            zc = jnp.maximum(c0, c1).reshape(H2, 2, W2, Cout)
            o_ref[0] = jnp.max(zc, axis=1)
        else:
            o_ref[0] = act(ybuf_ref[b])


def fused_conv_bn_lrelu(x, w_bf16, gamma, beta, *, pool):
    """x: (B,H,W,Cin) f32; w_bf16: (3,3,Cin,Cout) bf16; gamma/beta: (1,Cout)."""
    B, H, W, Cin = x.shape
    Cout = w_bf16.shape[-1]
    if pool:
        assert H % 2 == 0 and W % 2 == 0
    Ho, Wo = (H // 2, W // 2) if pool else (H, W)
    inv_count = 1.0 / float(B * H * W)

    kernel = functools.partial(_fused_layer_kernel, pool=pool,
                               inv_count=inv_count)

    # Input x is pinned to its last block during phase 1 (no re-DMA); the
    # output index is pinned to block 0 during phase 0 (no garbage writeback).
    x_map = lambda p, b: (b * (1 - p) + (B - 1) * p, 0, 0, 0)
    o_map = lambda p, b: (b * p, 0, 0, 0)

    return pl.pallas_call(
        kernel,
        out_shape=jax.ShapeDtypeStruct((B, Ho, Wo, Cout), jnp.float32),
        grid=(2, B),                       # (phase, batch)
        in_specs=[
            pl.BlockSpec((1, H, W, Cin), x_map),
            pl.BlockSpec((3, 3, Cin, Cout), lambda p, b: (0, 0, 0, 0)),
            pl.BlockSpec((1, Cout), lambda p, b: (0, 0)),
            pl.BlockSpec((1, Cout), lambda p, b: (0, 0)),
        ],
        out_specs=pl.BlockSpec((1, Ho, Wo, Cout), o_map),
        scratch_shapes=[
            pltpu.VMEM((H + 2, W + 2, Cin), jnp.float32),   # zero-halo input
            pltpu.VMEM((B, H, W, Cout), jnp.float32),       # conv outputs
            pltpu.VMEM((1, Cout), jnp.float32),             # batch sum
            pltpu.VMEM((1, Cout), jnp.float32),             # batch sum of sq
        ],
        # Both axes are sequential: phase 1 needs all of phase 0, and the
        # batch statistics accumulate in scratch across the batch axis.
        compiler_params=pltpu.CompilerParams(
            dimension_semantics=("arbitrary", "arbitrary")),
    )(x, w_bf16, gamma, beta)


# ---------------------------------------------------------------------------
# Parameter init + forward pass (wrapper)
# ---------------------------------------------------------------------------
def init_params(key, in_channels, out_channels, num_layers):
    params = []
    nin = in_channels
    for _ in range(num_layers):
        key, sub = jax.random.split(key)
        # PyTorch conv weight layout (Cout, Cin, 3, 3) -> HWIO (3, 3, Cin, Cout)
        w_oihw = jax.random.normal(sub, (out_channels, nin, 3, 3),
                                   jnp.float32) * 0.1
        w_hwio = jnp.transpose(w_oihw, (2, 3, 1, 0))
        gamma = jnp.ones((out_channels,), jnp.float32)   # BatchNorm2d defaults
        beta = jnp.zeros((out_channels,), jnp.float32)
        params.append((w_hwio, gamma, beta))
        nin = out_channels
    return params


def encoder_n_blocks(x_nchw, params):
    x = jnp.transpose(x_nchw, (0, 2, 3, 1)).astype(jnp.float32)   # NCHW -> NHWC
    n = len(params)
    for i, (w_hwio, gamma, beta) in enumerate(params):
        cout = w_hwio.shape[-1]
        x = fused_conv_bn_lrelu(
            x, w_hwio.astype(jnp.bfloat16),
            gamma.reshape(1, cout), beta.reshape(1, cout),
            pool=(i == n - 1))
        # (max-pool is fused into the last layer's kernel)
    return jnp.transpose(x, (0, 3, 1, 2))                         # NHWC -> NCHW


# Pure-JAX f32 reference (correctness check only).
def reference(x_nchw, params):
    x = jnp.transpose(x_nchw, (0, 2, 3, 1)).astype(jnp.float32)
    for (w_hwio, gamma, beta) in params:
        y = lax.conv_general_dilated(
            x, w_hwio, window_strides=(1, 1), padding="SAME",
            dimension_numbers=("NHWC", "HWIO", "NHWC"),
            precision=lax.Precision.HIGHEST)
        mean = jnp.mean(y, axis=(0, 1, 2))
        var = jnp.mean((y - mean) ** 2, axis=(0, 1, 2))
        z = (y - mean) / jnp.sqrt(var + BN_EPS) * gamma + beta
        x = jnp.where(z > 0, z, LEAKY_SLOPE * z)
    x = lax.reduce_window(x, -jnp.inf, lax.max,
                          (1, 2, 2, 1), (1, 2, 2, 1), "VALID")
    return jnp.transpose(x, (0, 3, 1, 2))


if __name__ == "__main__":
    key = jax.random.PRNGKey(0)
    kx, kp = jax.random.split(key)
    B, Cin, H, W = 2, 4, 16, 16
    Cout, num_layers = 32, 2

    x = jax.random.normal(kx, (B, Cin, H, W), jnp.float32)
    params = init_params(kp, Cin, Cout, num_layers)

    forward = jax.jit(encoder_n_blocks)
    out = jax.block_until_ready(forward(x, params))

    assert out.shape == (B, Cout, H // 2, W // 2), out.shape
    ref = reference(x, params)
    # bf16 MXU operands (f32 accumulation) vs. an f32 HIGHEST-precision
    # reference, compounded over two conv+BN layers -> slightly looser tol.
    assert jnp.allclose(out, ref, atol=3e-2, rtol=3e-2), \
        float(jnp.max(jnp.abs(out - ref)))
    print("KERNEL_OK")
</pallas_src>

<mosaic_0001>
module attributes {stable_mosaic.version = 11 : i64} {
  func.func @_fused_layer_kernel(%arg0: i32, %arg1: i32, %arg2: memref<1x16x16x4xf32, #tpu.memory_space<vmem>>, %arg3: memref<3x3x4x32xbf16, #tpu.memory_space<vmem>>, %arg4: memref<1x32xf32, #tpu.memory_space<vmem>>, %arg5: memref<1x32xf32, #tpu.memory_space<vmem>>, %arg6: memref<1x16x16x32xf32, #tpu.memory_space<vmem>>, %arg7: memref<18x18x4xf32, #tpu.memory_space<vmem>>, %arg8: memref<2x16x16x32xf32, #tpu.memory_space<vmem>>, %arg9: memref<1x32xf32, #tpu.memory_space<vmem>>, %arg10: memref<1x32xf32, #tpu.memory_space<vmem>>) attributes {dimension_semantics = [#tpu.dimension_semantics<arbitrary>, #tpu.dimension_semantics<arbitrary>], iteration_bounds = array<i64: 2, 2>, scalar_prefetch = 0 : i64, scratch_operands = 4 : i64, tpu.core_type = #tpu.core_type<tc>, window_params = [{transform_indices = @transform_0, window_bounds = array<i64: 1, 16, 16, 4>}, {pipeline_mode = #tpu.pipeline_mode<synchronous>, transform_indices = @transform_1, window_bounds = array<i64: 3, 3, 4, 32>}, {pipeline_mode = #tpu.pipeline_mode<synchronous>, transform_indices = @transform_2, window_bounds = array<i64: 1, 32>}, {pipeline_mode = #tpu.pipeline_mode<synchronous>, transform_indices = @transform_3, window_bounds = array<i64: 1, 32>}, {transform_indices = @transform_4, window_bounds = array<i64: 1, 16, 16, 32>}]} {
    %c0_i32 = arith.constant 0 : i32
    %0 = arith.cmpi eq, %arg0, %c0_i32 : i32
    %1 = arith.extui %0 : i1 to i32
    %c0_i32_0 = arith.constant 0 : i32
    %2 = arith.cmpi ne, %1, %c0_i32_0 : i32
    scf.if %2 {
      %c0_i32_2 = arith.constant 0 : i32
      %6 = arith.cmpi eq, %arg1, %c0_i32_2 : i32
      %7 = arith.extui %6 : i1 to i32
      %c0_i32_3 = arith.constant 0 : i32
      %8 = arith.cmpi ne, %7, %c0_i32_3 : i32
      scf.if %8 {
        %cst_93 = arith.constant 0.000000e+00 : f32
        %92 = vector.broadcast %cst_93 : f32 to vector<18x18x4xf32>
        %c0_94 = arith.constant 0 : index
        %c0_95 = arith.constant 0 : index
        %c0_96 = arith.constant 0 : index
        %93 = vector.load %arg7[%c0_94, %c0_95, %c0_96] : memref<18x18x4xf32, #tpu.memory_space<vmem>>, vector<18x18x4xf32>
        tpu.vector_store %arg7[%c0_94, %c0_95, %c0_96], %92 {strides = array<i32>} : memref<18x18x4xf32, #tpu.memory_space<vmem>>, vector<18x18x4xf32>,
        %cst_97 = arith.constant 0.000000e+00 : f32
        %94 = vector.broadcast %cst_97 : f32 to vector<1x32xf32>
        %c0_98 = arith.constant 0 : index
        %c0_99 = arith.constant 0 : index
        %95 = vector.load %arg9[%c0_98, %c0_99] : memref<1x32xf32, #tpu.memory_space<vmem>>, vector<1x32xf32>
        tpu.vector_store %arg9[%c0_98, %c0_99], %94 {strides = array<i32>} : memref<1x32xf32, #tpu.memory_space<vmem>>, vector<1x32xf32>,
        %cst_100 = arith.constant 0.000000e+00 : f32
        %96 = vector.broadcast %cst_100 : f32 to vector<1x32xf32>
        %c0_101 = arith.constant 0 : index
        %c0_102 = arith.constant 0 : index
        %97 = vector.load %arg10[%c0_101, %c0_102] : memref<1x32xf32, #tpu.memory_space<vmem>>, vector<1x32xf32>
        tpu.vector_store %arg10[%c0_101, %c0_102], %96 {strides = array<i32>} : memref<1x32xf32, #tpu.memory_space<vmem>>, vector<1x32xf32>,
      } else {
      }
      %c0 = arith.constant 0 : index
      %c0_4 = arith.constant 0 : index
      %c0_5 = arith.constant 0 : index
      %c0_6 = arith.constant 0 : index
      %9 = vector.load %arg2[%c0, %c0_4, %c0_5, %c0_6] : memref<1x16x16x4xf32, #tpu.memory_space<vmem>>, vector<1x16x16x4xf32>
      %10 = vector.shape_cast %9 : vector<1x16x16x4xf32> to vector<16x16x4xf32>
      %c1 = arith.constant 1 : index
      %c1_7 = arith.constant 1 : index
      %c0_8 = arith.constant 0 : index
      %11 = vector.load %arg7[%c1, %c1_7, %c0_8] : memref<18x18x4xf32, #tpu.memory_space<vmem>>, vector<16x16x4xf32>
      tpu.vector_store %arg7[%c1, %c1_7, %c0_8], %10 {strides = array<i32>} : memref<18x18x4xf32, #tpu.memory_space<vmem>>, vector<16x16x4xf32>,
      %cst = arith.constant 0.000000e+00 : f32
      %12 = vector.broadcast %cst : f32 to vector<256x32xf32>
      %c0_9 = arith.constant 0 : index
      %c0_10 = arith.constant 0 : index
      %c0_11 = arith.constant 0 : index
      %13 = vector.load %arg7[%c0_9, %c0_10, %c0_11] : memref<18x18x4xf32, #tpu.memory_space<vmem>>, vector<16x16x4xf32>
      %14 = vector.shape_cast %13 : vector<16x16x4xf32> to vector<256x4xf32>
      %15 = arith.truncf %14 : vector<256x4xf32> to vector<256x4xbf16>
      %c0_12 = arith.constant 0 : index
      %c0_13 = arith.constant 0 : index
      %c0_14 = arith.constant 0 : index
      %c0_15 = arith.constant 0 : index
      %16 = vector.load %arg3[%c0_12, %c0_13, %c0_14, %c0_15] : memref<3x3x4x32xbf16, #tpu.memory_space<vmem>>, vector<1x1x4x32xbf16>
      %17 = vector.shape_cast %16 : vector<1x1x4x32xbf16> to vector<4x32xbf16>
      %cst_16 = arith.constant dense<0.000000e+00> : vector<256x32xf32>
      %18 = tpu.matmul %15, %17, %cst_16 {dimension_numbers = #tpu.dot_dimension_numbers<[1], [0], [0], [1], [0, 0, 1, 1], [], []>} : vector<256x4xbf16>, vector<4x32xbf16>, vector<256x32xf32> -> vector<256x32xf32>
      %19 = arith.addf %12, %18 : vector<256x32xf32>
      %c0_17 = arith.constant 0 : index
      %c1_18 = arith.constant 1 : index
      %c0_19 = arith.constant 0 : index
      %20 = vector.load %arg7[%c0_17, %c1_18, %c0_19] : memref<18x18x4xf32, #tpu.memory_space<vmem>>, vector<16x16x4xf32>
      %21 = vector.shape_cast %20 : vector<16x16x4xf32> to vector<256x4xf32>
      %22 = arith.truncf %21 : vector<256x4xf32> to vector<256x4xbf16>
      %c0_20 = arith.constant 0 : index
      %c1_21 = arith.constant 1 : index
      %c0_22 = arith.constant 0 : index
      %c0_23 = arith.constant 0 : index
      %23 = vector.load %arg3[%c0_20, %c1_21, %c0_22, %c0_23] : memref<3x3x4x32xbf16, #tpu.memory_space<vmem>>, vector<1x1x4x32xbf16>
      %24 = vector.shape_cast %23 : vector<1x1x4x32xbf16> to vector<4x32xbf16>
      %cst_24 = arith.constant dense<0.000000e+00> : vector<256x32xf32>
      %25 = tpu.matmul %22, %24, %cst_24 {dimension_numbers = #tpu.dot_dimension_numbers<[1], [0], [0], [1], [0, 0, 1, 1], [], []>} : vector<256x4xbf16>, vector<4x32xbf16>, vector<256x32xf32> -> vector<256x32xf32>
      %26 = arith.addf %19, %25 : vector<256x32xf32>
      %c0_25 = arith.constant 0 : index
      %c2 = arith.constant 2 : index
      %c0_26 = arith.constant 0 : index
      %27 = vector.load %arg7[%c0_25, %c2, %c0_26] : memref<18x18x4xf32, #tpu.memory_space<vmem>>, vector<16x16x4xf32>
      %28 = vector.shape_cast %27 : vector<16x16x4xf32> to vector<256x4xf32>
      %29 = arith.truncf %28 : vector<256x4xf32> to vector<256x4xbf16>
      %c0_27 = arith.constant 0 : index
      %c2_28 = arith.constant 2 : index
      %c0_29 = arith.constant 0 : index
      %c0_30 = arith.constant 0 : index
      %30 = vector.load %arg3[%c0_27, %c2_28, %c0_29, %c0_30] : memref<3x3x4x32xbf16, #tpu.memory_space<vmem>>, vector<1x1x4x32xbf16>
      %31 = vector.shape_cast %30 : vector<1x1x4x32xbf16> to vector<4x32xbf16>
      %cst_31 = arith.constant dense<0.000000e+00> : vector<256x32xf32>
      %32 = tpu.matmul %29, %31, %cst_31 {dimension_numbers = #tpu.dot_dimension_numbers<[1], [0], [0], [1], [0, 0, 1, 1], [], []>} : vector<256x4xbf16>, vector<4x32xbf16>, vector<256x32xf32> -> vector<256x32xf32>
      %33 = arith.addf %26, %32 : vector<256x32xf32>
      %c1_32 = arith.constant 1 : index
      %c0_33 = arith.constant 0 : index
      %c0_34 = arith.constant 0 : index
      %34 = vector.load %arg7[%c1_32, %c0_33, %c0_34] : memref<18x18x4xf32, #tpu.memory_space<vmem>>, vector<16x16x4xf32>
      %35 = vector.shape_cast %34 : vector<16x16x4xf32> to vector<256x4xf32>
      %36 = arith.truncf %35 : vector<256x4xf32> to vector<256x4xbf16>
      %c1_35 = arith.constant 1 : index
      %c0_36 = arith.constant 0 : index
      %c0_37 = arith.constant 0 : index
      %c0_38 = arith.constant 0 : index
      %37 = vector.load %arg3[%c1_35, %c0_36, %c0_37, %c0_38] : memref<3x3x4x32xbf16, #tpu.memory_space<vmem>>, vector<1x1x4x32xbf16>
      %38 = vector.shape_cast %37 : vector<1x1x4x32xbf16> to vector<4x32xbf16>
      %cst_39 = arith.constant dense<0.000000e+00> : vector<256x32xf32>
      %39 = tpu.matmul %36, %38, %cst_39 {dimension_numbers = #tpu.dot_dimension_numbers<[1], [0], [0], [1], [0, 0, 1, 1], [], []>} : vector<256x4xbf16>, vector<4x32xbf16>, vector<256x32xf32> -> vector<256x32xf32>
      %40 = arith.addf %33, %39 : vector<256x32xf32>
      %c1_40 = arith.constant 1 : index
      %c1_41 = arith.constant 1 : index
      %c0_42 = arith.constant 0 : index
      %41 = vector.load %arg7[%c1_40, %c1_41, %c0_42] : memref<18x18x4xf32, #tpu.memory_space<vmem>>, vector<16x16x4xf32>
      %42 = vector.shape_cast %41 : vector<16x16x4xf32> to vector<256x4xf32>
      %43 = arith.truncf %42 : vector<256x4xf32> to vector<256x4xbf16>
      %c1_43 = arith.constant 1 : index
      %c1_44 = arith.constant 1 : index
      %c0_45 = arith.constant 0 : index
      %c0_46 = arith.constant 0 : index
      %44 = vector.load %arg3[%c1_43, %c1_44, %c0_45, %c0_46] : memref<3x3x4x32xbf16, #tpu.memory_space<vmem>>, vector<1x1x4x32xbf16>
      %45 = vector.shape_cast %44 : vector<1x1x4x32xbf16> to vector<4x32xbf16>
      %cst_47 = arith.constant dense<0.000000e+00> : vector<256x32xf32>
      %46 = tpu.matmul %43, %45, %cst_47 {dimension_numbers = #tpu.dot_dimension_numbers<[1], [0], [0], [1], [0, 0, 1, 1], [], []>} : vector<256x4xbf16>, vector<4x32xbf16>, vector<256x32xf32> -> vector<256x32xf32>
      %47 = arith.addf %40, %46 : vector<256x32xf32>
      %c1_48 = arith.constant 1 : index
      %c2_49 = arith.constant 2 : index
      %c0_50 = arith.constant 0 : index
      %48 = vector.load %arg7[%c1_48, %c2_49, %c0_50] : memref<18x18x4xf32, #tpu.memory_space<vmem>>, vector<16x16x4xf32>
      %49 = vector.shape_cast %48 : vector<16x16x4xf32> to vector<256x4xf32>
      %50 = arith.truncf %49 : vector<256x4xf32> to vector<256x4xbf16>
      %c1_51 = arith.constant 1 : index
      %c2_52 = arith.constant 2 : index
      %c0_53 = arith.constant 0 : index
      %c0_54 = arith.constant 0 : index
      %51 = vector.load %arg3[%c1_51, %c2_52, %c0_53, %c0_54] : memref<3x3x4x32xbf16, #tpu.memory_space<vmem>>, vector<1x1x4x32xbf16>
      %52 = vector.shape_cast %51 : vector<1x1x4x32xbf16> to vector<4x32xbf16>
      %cst_55 = arith.constant dense<0.000000e+00> : vector<256x32xf32>
      %53 = tpu.matmul %50, %52, %cst_55 {dimension_numbers = #tpu.dot_dimension_numbers<[1], [0], [0], [1], [0, 0, 1, 1], [], []>} : vector<256x4xbf16>, vector<4x32xbf16>, vector<256x32xf32> -> vector<256x32xf32>
      %54 = arith.addf %47, %53 : vector<256x32xf32>
      %c2_56 = arith.constant 2 : index
      %c0_57 = arith.constant 0 : index
      %c0_58 = arith.constant 0 : index
      %55 = vector.load %arg7[%c2_56, %c0_57, %c0_58] : memref<18x18x4xf32, #tpu.memory_space<vmem>>, vector<16x16x4xf32>
      %56 = vector.shape_cast %55 : vector<16x16x4xf32> to vector<256x4xf32>
      %57 = arith.truncf %56 : vector<256x4xf32> to vector<256x4xbf16>
      %c2_59 = arith.constant 2 : index
      %c0_60 = arith.constant 0 : index
      %c0_61 = arith.constant 0 : index
      %c0_62 = arith.constant 0 : index
      %58 = vector.load %arg3[%c2_59, %c0_60, %c0_61, %c0_62] : memref<3x3x4x32xbf16, #tpu.memory_space<vmem>>, vector<1x1x4x32xbf16>
      %59 = vector.shape_cast %58 : vector<1x1x4x32xbf16> to vector<4x32xbf16>
      %cst_63 = arith.constant dense<0.000000e+00> : vector<256x32xf32>
      %60 = tpu.matmul %57, %59, %cst_63 {dimension_numbers = #tpu.dot_dimension_numbers<[1], [0], [0], [1], [0, 0, 1, 1], [], []>} : vector<256x4xbf16>, vector<4x32xbf16>, vector<256x32xf32> -> vector<256x32xf32>
      %61 = arith.addf %54, %60 : vector<256x32xf32>
      %c2_64 = arith.constant 2 : index
      %c1_65 = arith.constant 1 : index
      %c0_66 = arith.constant 0 : index
      %62 = vector.load %arg7[%c2_64, %c1_65, %c0_66] : memref<18x18x4xf32, #tpu.memory_space<vmem>>, vector<16x16x4xf32>
      %63 = vector.shape_cast %62 : vector<16x16x4xf32> to vector<256x4xf32>
      %64 = arith.truncf %63 : vector<256x4xf32> to vector<256x4xbf16>
      %c2_67 = arith.constant 2 : index
      %c1_68 = arith.constant 1 : index
      %c0_69 = arith.constant 0 : index
      %c0_70 = arith.constant 0 : index
      %65 = vector.load %arg3[%c2_67, %c1_68, %c0_69, %c0_70] : memref<3x3x4x32xbf16, #tpu.memory_space<vmem>>, vector<1x1x4x32xbf16>
      %66 = vector.shape_cast %65 : vector<1x1x4x32xbf16> to vector<4x32xbf16>
      %cst_71 = arith.constant dense<0.000000e+00> : vector<256x32xf32>
      %67 = tpu.matmul %64, %66, %cst_71 {dimension_numbers = #tpu.dot_dimension_numbers<[1], [0], [0], [1], [0, 0, 1, 1], [], []>} : vector<256x4xbf16>, vector<4x32xbf16>, vector<256x32xf32> -> vector<256x32xf32>
      %68 = arith.addf %61, %67 : vector<256x32xf32>
      %c2_72 = arith.constant 2 : index
      %c2_73 = arith.constant 2 : index
      %c0_74 = arith.constant 0 : index
      %69 = vector.load %arg7[%c2_72, %c2_73, %c0_74] : memref<18x18x4xf32, #tpu.memory_space<vmem>>, vector<16x16x4xf32>
      %70 = vector.shape_cast %69 : vector<16x16x4xf32> to vector<256x4xf32>
      %71 = arith.truncf %70 : vector<256x4xf32> to vector<256x4xbf16>
      %c2_75 = arith.constant 2 : index
      %c2_76 = arith.constant 2 : index
      %c0_77 = arith.constant 0 : index
      %c0_78 = arith.constant 0 : index
      %72 = vector.load %arg3[%c2_75, %c2_76, %c0_77, %c0_78] : memref<3x3x4x32xbf16, #tpu.memory_space<vmem>>, vector<1x1x4x32xbf16>
      %73 = vector.shape_cast %72 : vector<1x1x4x32xbf16> to vector<4x32xbf16>
      %cst_79 = arith.constant dense<0.000000e+00> : vector<256x32xf32>
      %74 = tpu.matmul %71, %73, %cst_79 {dimension_numbers = #tpu.dot_dimension_numbers<[1], [0], [0], [1], [0, 0, 1, 1], [], []>} : vector<256x4xbf16>, vector<4x32xbf16>, vector<256x32xf32> -> vector<256x32xf32>
      %75 = arith.addf %68, %74 : vector<256x32xf32>
      %76 = vector.shape_cast %75 : vector<256x32xf32> to vector<16x16x32xf32>
      %77 = arith.index_cast %arg1 : i32 to index
      %c0_80 = arith.constant 0 : index
      %c0_81 = arith.constant 0 : index
      %c0_82 = arith.constant 0 : index
      %78 = vector.load %arg8[%77, %c0_80, %c0_81, %c0_82] : memref<2x16x16x32xf32, #tpu.memory_space<vmem>>, vector<1x16x16x32xf32>
      %79 = vector.shape_cast %78 : vector<1x16x16x32xf32> to vector<16x16x32xf32>
      %80 = vector.shape_cast %76 : vector<16x16x32xf32> to vector<1x16x16x32xf32>
      tpu.vector_store %arg8[%77, %c0_80, %c0_81, %c0_82], %80 {strides = array<i32>} : memref<2x16x16x32xf32, #tpu.memory_space<vmem>>, vector<1x16x16x32xf32>,
      %c0_83 = arith.constant 0 : index
      %c0_84 = arith.constant 0 : index
      %81 = vector.load %arg9[%c0_83, %c0_84] : memref<1x32xf32, #tpu.memory_space<vmem>>, vector<1x32xf32>
      %cst_85 = arith.constant dense<0.000000e+00> : vector<32xf32>
      %82 = vector.multi_reduction <add>, %75, %cst_85 [0] : vector<256x32xf32> to vector<32xf32>
      %83 = vector.shape_cast %82 : vector<32xf32> to vector<1x32xf32>
      %84 = arith.addf %81, %83 : vector<1x32xf32>
      %c0_86 = arith.constant 0 : index
      %c0_87 = arith.constant 0 : index
      %85 = vector.load %arg9[%c0_86, %c0_87] : memref<1x32xf32, #tpu.memory_space<vmem>>, vector<1x32xf32>
      tpu.vector_store %arg9[%c0_86, %c0_87], %84 {strides = array<i32>} : memref<1x32xf32, #tpu.memory_space<vmem>>, vector<1x32xf32>,
      %c0_88 = arith.constant 0 : index
      %c0_89 = arith.constant 0 : index
      %86 = vector.load %arg10[%c0_88, %c0_89] : memref<1x32xf32, #tpu.memory_space<vmem>>, vector<1x32xf32>
      %87 = arith.mulf %75, %75 : vector<256x32xf32>
      %cst_90 = arith.constant dense<0.000000e+00> : vector<32xf32>
      %88 = vector.multi_reduction <add>, %87, %cst_90 [0] : vector<256x32xf32> to vector<32xf32>
      %89 = vector.shape_cast %88 : vector<32xf32> to vector<1x32xf32>
      %90 = arith.addf %86, %89 : vector<1x32xf32>
      %c0_91 = arith.constant 0 : index
      %c0_92 = arith.constant 0 : index
      %91 = vector.load %arg10[%c0_91, %c0_92] : memref<1x32xf32, #tpu.memory_space<vmem>>, vector<1x32xf32>
      tpu.vector_store %arg10[%c0_91, %c0_92], %90 {strides = array<i32>} : memref<1x32xf32, #tpu.memory_space<vmem>>, vector<1x32xf32>,
    } else {
    }
    %c1_i32 = arith.constant 1 : i32
    %3 = arith.cmpi eq, %arg0, %c1_i32 : i32
    %4 = arith.extui %3 : i1 to i32
    %c0_i32_1 = arith.constant 0 : i32
    %5 = arith.cmpi ne, %4, %c0_i32_1 : i32
    scf.if %5 {
      %c0 = arith.constant 0 : index
      %c0_2 = arith.constant 0 : index
      %6 = vector.load %arg9[%c0, %c0_2] : memref<1x32xf32, #tpu.memory_space<vmem>>, vector<1x32xf32>
      %cst = arith.constant 0.001953125 : f32
      %7 = vector.broadcast %cst : f32 to vector<1x32xf32>
      %8 = arith.mulf %6, %7 : vector<1x32xf32>
      %c0_3 = arith.constant 0 : index
      %c0_4 = arith.constant 0 : index
      %9 = vector.load %arg10[%c0_3, %c0_4] : memref<1x32xf32, #tpu.memory_space<vmem>>, vector<1x32xf32>
      %cst_5 = arith.constant 0.001953125 : f32
      %10 = vector.broadcast %cst_5 : f32 to vector<1x32xf32>
      %11 = arith.mulf %9, %10 : vector<1x32xf32>
      %12 = arith.mulf %8, %8 : vector<1x32xf32>
      %13 = arith.subf %11, %12 : vector<1x32xf32>
      %cst_6 = arith.constant 0.000000e+00 : f32
      %14 = vector.broadcast %cst_6 : f32 to vector<1x32xf32>
      %15 = arith.maximumf %13, %14 : vector<1x32xf32>
      %c0_7 = arith.constant 0 : index
      %c0_8 = arith.constant 0 : index
      %16 = vector.load %arg4[%c0_7, %c0_8] : memref<1x32xf32, #tpu.memory_space<vmem>>, vector<1x32xf32>
      %cst_9 = arith.constant 9.99999974E-6 : f32
      %17 = vector.broadcast %cst_9 : f32 to vector<1x32xf32>
      %18 = arith.addf %15, %17 : vector<1x32xf32>
      %19 = math.rsqrt %18 : vector<1x32xf32>
      %20 = arith.mulf %16, %19 : vector<1x32xf32>
      %c0_10 = arith.constant 0 : index
      %c0_11 = arith.constant 0 : index
      %21 = vector.load %arg5[%c0_10, %c0_11] : memref<1x32xf32, #tpu.memory_space<vmem>>, vector<1x32xf32>
      %22 = arith.mulf %8, %20 : vector<1x32xf32>
      %23 = arith.subf %21, %22 : vector<1x32xf32>
      %24 = arith.index_cast %arg1 : i32 to index
      %c0_12 = arith.constant 0 : index
      %c0_13 = arith.constant 0 : index
      %c0_14 = arith.constant 0 : index
      %25 = vector.load %arg8[%24, %c0_12, %c0_13, %c0_14] : memref<2x16x16x32xf32, #tpu.memory_space<vmem>>, vector<1x16x16x32xf32>
      %26 = vector.shape_cast %25 : vector<1x16x16x32xf32> to vector<16x16x32xf32>
      %27 = vector.shape_cast %20 : vector<1x32xf32> to vector<1x1x32xf32>
      %28 = vector.broadcast %27 : vector<1x1x32xf32> to vector<16x16x32xf32>
      %29 = arith.mulf %26, %28 : vector<16x16x32xf32>
      %30 = vector.shape_cast %23 : vector<1x32xf32> to vector<1x1x32xf32>
      %31 = vector.broadcast %30 : vector<1x1x32xf32> to vector<16x16x32xf32>
      %32 = arith.addf %29, %31 : vector<16x16x32xf32>
      %cst_15 = arith.constant 0.000000e+00 : f32
      %33 = vector.broadcast %cst_15 : f32 to vector<16x16x32xf32>
      %34 = arith.cmpf ogt, %32, %33 : vector<16x16x32xf32>
      %cst_16 = arith.constant 1.000000e-01 : f32
      %35 = vector.broadcast %cst_16 : f32 to vector<16x16x32xf32>
      %36 = arith.mulf %35, %32 : vector<16x16x32xf32>
      %37 = arith.select %34, %32, %36 : vector<16x16x32xi1>, vector<16x16x32xf32>
      %c0_17 = arith.constant 0 : index
      %c0_18 = arith.constant 0 : index
      %c0_19 = arith.constant 0 : index
      %c0_20 = arith.constant 0 : index
      %38 = vector.load %arg6[%c0_17, %c0_18, %c0_19, %c0_20] : memref<1x16x16x32xf32, #tpu.memory_space<vmem>>, vector<1x16x16x32xf32>
      %39 = vector.shape_cast %38 : vector<1x16x16x32xf32> to vector<16x16x32xf32>
      %40 = vector.shape_cast %37 : vector<16x16x32xf32> to vector<1x16x16x32xf32>
      tpu.vector_store %arg6[%c0_17, %c0_18, %c0_19, %c0_20], %40 {strides = array<i32>} : memref<1x16x16x32xf32, #tpu.memory_space<vmem>>, vector<1x16x16x32xf32>,
    } else {
    }
    return
  }
  func.func @transform_0(%arg0: i32, %arg1: i32) -> (i32, i32, i32, i32) {
    %c1_i32 = arith.constant 1 : i32
    %0 = arith.subi %c1_i32, %arg0 : i32
    %1 = arith.muli %arg1, %0 : i32
    %c1_i32_0 = arith.constant 1 : i32
    %2 = arith.muli %c1_i32_0, %arg0 : i32
    %3 = arith.addi %1, %2 : i32
    %c0_i32 = arith.constant 0 : i32
    %c0_i32_1 = arith.constant 0 : i32
    %c0_i32_2 = arith.constant 0 : i32
    %c0_i32_3 = arith.constant 0 : i32
    return %3, %c0_i32, %c0_i32_1, %c0_i32_2 : i32, i32, i32, i32
  }
  func.func @transform_1(%arg0: i32, %arg1: i32) -> (i32, i32, i32, i32) {
    %c0_i32 = arith.constant 0 : i32
    %c0_i32_0 = arith.constant 0 : i32
    %c0_i32_1 = arith.constant 0 : i32
    %c0_i32_2 = arith.constant 0 : i32
    %c0_i32_3 = arith.constant 0 : i32
    return %c0_i32, %c0_i32_0, %c0_i32_1, %c0_i32_2 : i32, i32, i32, i32
  }
  func.func @transform_2(%arg0: i32, %arg1: i32) -> (i32, i32) {
    %c0_i32 = arith.constant 0 : i32
    %c0_i32_0 = arith.constant 0 : i32
    %c0_i32_1 = arith.constant 0 : i32
    return %c0_i32, %c0_i32_0 : i32, i32
  }
  func.func @transform_3(%arg0: i32, %arg1: i32) -> (i32, i32) {
    %c0_i32 = arith.constant 0 : i32
    %c0_i32_0 = arith.constant 0 : i32
    %c0_i32_1 = arith.constant 0 : i32
    return %c0_i32, %c0_i32_0 : i32, i32
  }
  func.func @transform_4(%arg0: i32, %arg1: i32) -> (i32, i32, i32, i32) {
    %0 = arith.muli %arg1, %arg0 : i32
    %c0_i32 = arith.constant 0 : i32
    %c0_i32_0 = arith.constant 0 : i32
    %c0_i32_1 = arith.constant 0 : i32
    %c0_i32_2 = arith.constant 0 : i32
    return %0, %c0_i32, %c0_i32_0, %c0_i32_1 : i32, i32, i32, i32
  }
}

module attributes {stable_mosaic.version = 11 : i64} {
  func.func @_fused_layer_kernel(%arg0: i32, %arg1: i32, %arg2: memref<1x16x16x32xf32, #tpu.memory_space<vmem>>, %arg3: memref<3x3x32x32xbf16, #tpu.memory_space<vmem>>, %arg4: memref<1x32xf32, #tpu.memory_space<vmem>>, %arg5: memref<1x32xf32, #tpu.memory_space<vmem>>, %arg6: memref<1x8x8x32xf32, #tpu.memory_space<vmem>>, %arg7: memref<18x18x32xf32, #tpu.memory_space<vmem>>, %arg8: memref<2x16x16x32xf32, #tpu.memory_space<vmem>>, %arg9: memref<1x32xf32, #tpu.memory_space<vmem>>, %arg10: memref<1x32xf32, #tpu.memory_space<vmem>>) attributes {dimension_semantics = [#tpu.dimension_semantics<arbitrary>, #tpu.dimension_semantics<arbitrary>], iteration_bounds = array<i64: 2, 2>, scalar_prefetch = 0 : i64, scratch_operands = 4 : i64, tpu.core_type = #tpu.core_type<tc>, window_params = [{transform_indices = @transform_0, window_bounds = array<i64: 1, 16, 16, 32>}, {pipeline_mode = #tpu.pipeline_mode<synchronous>, transform_indices = @transform_1, window_bounds = array<i64: 3, 3, 32, 32>}, {pipeline_mode = #tpu.pipeline_mode<synchronous>, transform_indices = @transform_2, window_bounds = array<i64: 1, 32>}, {pipeline_mode = #tpu.pipeline_mode<synchronous>, transform_indices = @transform_3, window_bounds = array<i64: 1, 32>}, {transform_indices = @transform_4, window_bounds = array<i64: 1, 8, 8, 32>}]} {
    %c0_i32 = arith.constant 0 : i32
    %0 = arith.cmpi eq, %arg0, %c0_i32 : i32
    %1 = arith.extui %0 : i1 to i32
    %c0_i32_0 = arith.constant 0 : i32
    %2 = arith.cmpi ne, %1, %c0_i32_0 : i32
    scf.if %2 {
      %c0_i32_2 = arith.constant 0 : i32
      %6 = arith.cmpi eq, %arg1, %c0_i32_2 : i32
      %7 = arith.extui %6 : i1 to i32
      %c0_i32_3 = arith.constant 0 : i32
      %8 = arith.cmpi ne, %7, %c0_i32_3 : i32
      scf.if %8 {
        %cst_93 = arith.constant 0.000000e+00 : f32
        %92 = vector.broadcast %cst_93 : f32 to vector<18x18x32xf32>
        %c0_94 = arith.constant 0 : index
        %c0_95 = arith.constant 0 : index
        %c0_96 = arith.constant 0 : index
        %93 = vector.load %arg7[%c0_94, %c0_95, %c0_96] : memref<18x18x32xf32, #tpu.memory_space<vmem>>, vector<18x18x32xf32>
        tpu.vector_store %arg7[%c0_94, %c0_95, %c0_96], %92 {strides = array<i32>} : memref<18x18x32xf32, #tpu.memory_space<vmem>>, vector<18x18x32xf32>,
        %cst_97 = arith.constant 0.000000e+00 : f32
        %94 = vector.broadcast %cst_97 : f32 to vector<1x32xf32>
        %c0_98 = arith.constant 0 : index
        %c0_99 = arith.constant 0 : index
        %95 = vector.load %arg9[%c0_98, %c0_99] : memref<1x32xf32, #tpu.memory_space<vmem>>, vector<1x32xf32>
        tpu.vector_store %arg9[%c0_98, %c0_99], %94 {strides = array<i32>} : memref<1x32xf32, #tpu.memory_space<vmem>>, vector<1x32xf32>,
        %cst_100 = arith.constant 0.000000e+00 : f32
        %96 = vector.broadcast %cst_100 : f32 to vector<1x32xf32>
        %c0_101 = arith.constant 0 : index
        %c0_102 = arith.constant 0 : index
        %97 = vector.load %arg10[%c0_101, %c0_102] : memref<1x32xf32, #tpu.memory_space<vmem>>, vector<1x32xf32>
        tpu.vector_store %arg10[%c0_101, %c0_102], %96 {strides = array<i32>} : memref<1x32xf32, #tpu.memory_space<vmem>>, vector<1x32xf32>,
      } else {
      }
      %c0 = arith.constant 0 : index
      %c0_4 = arith.constant 0 : index
      %c0_5 = arith.constant 0 : index
      %c0_6 = arith.constant 0 : index
      %9 = vector.load %arg2[%c0, %c0_4, %c0_5, %c0_6] : memref<1x16x16x32xf32, #tpu.memory_space<vmem>>, vector<1x16x16x32xf32>
      %10 = vector.shape_cast %9 : vector<1x16x16x32xf32> to vector<16x16x32xf32>
      %c1 = arith.constant 1 : index
      %c1_7 = arith.constant 1 : index
      %c0_8 = arith.constant 0 : index
      %11 = vector.load %arg7[%c1, %c1_7, %c0_8] : memref<18x18x32xf32, #tpu.memory_space<vmem>>, vector<16x16x32xf32>
      tpu.vector_store %arg7[%c1, %c1_7, %c0_8], %10 {strides = array<i32>} : memref<18x18x32xf32, #tpu.memory_space<vmem>>, vector<16x16x32xf32>,
      %cst = arith.constant 0.000000e+00 : f32
      %12 = vector.broadcast %cst : f32 to vector<256x32xf32>
      %c0_9 = arith.constant 0 : index
      %c0_10 = arith.constant 0 : index
      %c0_11 = arith.constant 0 : index
      %13 = vector.load %arg7[%c0_9, %c0_10, %c0_11] : memref<18x18x32xf32, #tpu.memory_space<vmem>>, vector<16x16x32xf32>
      %14 = vector.shape_cast %13 : vector<16x16x32xf32> to vector<256x32xf32>
      %15 = arith.truncf %14 : vector<256x32xf32> to vector<256x32xbf16>
      %c0_12 = arith.constant 0 : index
      %c0_13 = arith.constant 0 : index
      %c0_14 = arith.constant 0 : index
      %c0_15 = arith.constant 0 : index
      %16 = vector.load %arg3[%c0_12, %c0_13, %c0_14, %c0_15] : memref<3x3x32x32xbf16, #tpu.memory_space<vmem>>, vector<1x1x32x32xbf16>
      %17 = vector.shape_cast %16 : vector<1x1x32x32xbf16> to vector<32x32xbf16>
      %cst_16 = arith.constant dense<0.000000e+00> : vector<256x32xf32>
      %18 = tpu.matmul %15, %17, %cst_16 {dimension_numbers = #tpu.dot_dimension_numbers<[1], [0], [0], [1], [0, 0, 1, 1], [], []>} : vector<256x32xbf16>, vector<32x32xbf16>, vector<256x32xf32> -> vector<256x32xf32>
      %19 = arith.addf %12, %18 : vector<256x32xf32>
      %c0_17 = arith.constant 0 : index
      %c1_18 = arith.constant 1 : index
      %c0_19 = arith.constant 0 : index
      %20 = vector.load %arg7[%c0_17, %c1_18, %c0_19] : memref<18x18x32xf32, #tpu.memory_space<vmem>>, vector<16x16x32xf32>
      %21 = vector.shape_cast %20 : vector<16x16x32xf32> to vector<256x32xf32>
      %22 = arith.truncf %21 : vector<256x32xf32> to vector<256x32xbf16>
      %c0_20 = arith.constant 0 : index
      %c1_21 = arith.constant 1 : index
      %c0_22 = arith.constant 0 : index
      %c0_23 = arith.constant 0 : index
      %23 = vector.load %arg3[%c0_20, %c1_21, %c0_22, %c0_23] : memref<3x3x32x32xbf16, #tpu.memory_space<vmem>>, vector<1x1x32x32xbf16>
      %24 = vector.shape_cast %23 : vector<1x1x32x32xbf16> to vector<32x32xbf16>
      %cst_24 = arith.constant dense<0.000000e+00> : vector<256x32xf32>
      %25 = tpu.matmul %22, %24, %cst_24 {dimension_numbers = #tpu.dot_dimension_numbers<[1], [0], [0], [1], [0, 0, 1, 1], [], []>} : vector<256x32xbf16>, vector<32x32xbf16>, vector<256x32xf32> -> vector<256x32xf32>
      %26 = arith.addf %19, %25 : vector<256x32xf32>
      %c0_25 = arith.constant 0 : index
      %c2 = arith.constant 2 : index
      %c0_26 = arith.constant 0 : index
      %27 = vector.load %arg7[%c0_25, %c2, %c0_26] : memref<18x18x32xf32, #tpu.memory_space<vmem>>, vector<16x16x32xf32>
      %28 = vector.shape_cast %27 : vector<16x16x32xf32> to vector<256x32xf32>
      %29 = arith.truncf %28 : vector<256x32xf32> to vector<256x32xbf16>
      %c0_27 = arith.constant 0 : index
      %c2_28 = arith.constant 2 : index
      %c0_29 = arith.constant 0 : index
      %c0_30 = arith.constant 0 : index
      %30 = vector.load %arg3[%c0_27, %c2_28, %c0_29, %c0_30] : memref<3x3x32x32xbf16, #tpu.memory_space<vmem>>, vector<1x1x32x32xbf16>
      %31 = vector.shape_cast %30 : vector<1x1x32x32xbf16> to vector<32x32xbf16>
      %cst_31 = arith.constant dense<0.000000e+00> : vector<256x32xf32>
      %32 = tpu.matmul %29, %31, %cst_31 {dimension_numbers = #tpu.dot_dimension_numbers<[1], [0], [0], [1], [0, 0, 1, 1], [], []>} : vector<256x32xbf16>, vector<32x32xbf16>, vector<256x32xf32> -> vector<256x32xf32>
      %33 = arith.addf %26, %32 : vector<256x32xf32>
      %c1_32 = arith.constant 1 : index
      %c0_33 = arith.constant 0 : index
      %c0_34 = arith.constant 0 : index
      %34 = vector.load %arg7[%c1_32, %c0_33, %c0_34] : memref<18x18x32xf32, #tpu.memory_space<vmem>>, vector<16x16x32xf32>
      %35 = vector.shape_cast %34 : vector<16x16x32xf32> to vector<256x32xf32>
      %36 = arith.truncf %35 : vector<256x32xf32> to vector<256x32xbf16>
      %c1_35 = arith.constant 1 : index
      %c0_36 = arith.constant 0 : index
      %c0_37 = arith.constant 0 : index
      %c0_38 = arith.constant 0 : index
      %37 = vector.load %arg3[%c1_35, %c0_36, %c0_37, %c0_38] : memref<3x3x32x32xbf16, #tpu.memory_space<vmem>>, vector<1x1x32x32xbf16>
      %38 = vector.shape_cast %37 : vector<1x1x32x32xbf16> to vector<32x32xbf16>
      %cst_39 = arith.constant dense<0.000000e+00> : vector<256x32xf32>
      %39 = tpu.matmul %36, %38, %cst_39 {dimension_numbers = #tpu.dot_dimension_numbers<[1], [0], [0], [1], [0, 0, 1, 1], [], []>} : vector<256x32xbf16>, vector<32x32xbf16>, vector<256x32xf32> -> vector<256x32xf32>
      %40 = arith.addf %33, %39 : vector<256x32xf32>
      %c1_40 = arith.constant 1 : index
      %c1_41 = arith.constant 1 : index
      %c0_42 = arith.constant 0 : index
      %41 = vector.load %arg7[%c1_40, %c1_41, %c0_42] : memref<18x18x32xf32, #tpu.memory_space<vmem>>, vector<16x16x32xf32>
      %42 = vector.shape_cast %41 : vector<16x16x32xf32> to vector<256x32xf32>
      %43 = arith.truncf %42 : vector<256x32xf32> to vector<256x32xbf16>
      %c1_43 = arith.constant 1 : index
      %c1_44 = arith.constant 1 : index
      %c0_45 = arith.constant 0 : index
      %c0_46 = arith.constant 0 : index
      %44 = vector.load %arg3[%c1_43, %c1_44, %c0_45, %c0_46] : memref<3x3x32x32xbf16, #tpu.memory_space<vmem>>, vector<1x1x32x32xbf16>
      %45 = vector.shape_cast %44 : vector<1x1x32x32xbf16> to vector<32x32xbf16>
      %cst_47 = arith.constant dense<0.000000e+00> : vector<256x32xf32>
      %46 = tpu.matmul %43, %45, %cst_47 {dimension_numbers = #tpu.dot_dimension_numbers<[1], [0], [0], [1], [0, 0, 1, 1], [], []>} : vector<256x32xbf16>, vector<32x32xbf16>, vector<256x32xf32> -> vector<256x32xf32>
      %47 = arith.addf %40, %46 : vector<256x32xf32>
      %c1_48 = arith.constant 1 : index
      %c2_49 = arith.constant 2 : index
      %c0_50 = arith.constant 0 : index
      %48 = vector.load %arg7[%c1_48, %c2_49, %c0_50] : memref<18x18x32xf32, #tpu.memory_space<vmem>>, vector<16x16x32xf32>
      %49 = vector.shape_cast %48 : vector<16x16x32xf32> to vector<256x32xf32>
      %50 = arith.truncf %49 : vector<256x32xf32> to vector<256x32xbf16>
      %c1_51 = arith.constant 1 : index
      %c2_52 = arith.constant 2 : index
      %c0_53 = arith.constant 0 : index
      %c0_54 = arith.constant 0 : index
      %51 = vector.load %arg3[%c1_51, %c2_52, %c0_53, %c0_54] : memref<3x3x32x32xbf16, #tpu.memory_space<vmem>>, vector<1x1x32x32xbf16>
      %52 = vector.shape_cast %51 : vector<1x1x32x32xbf16> to vector<32x32xbf16>
      %cst_55 = arith.constant dense<0.000000e+00> : vector<256x32xf32>
      %53 = tpu.matmul %50, %52, %cst_55 {dimension_numbers = #tpu.dot_dimension_numbers<[1], [0], [0], [1], [0, 0, 1, 1], [], []>} : vector<256x32xbf16>, vector<32x32xbf16>, vector<256x32xf32> -> vector<256x32xf32>
      %54 = arith.addf %47, %53 : vector<256x32xf32>
      %c2_56 = arith.constant 2 : index
      %c0_57 = arith.constant 0 : index
      %c0_58 = arith.constant 0 : index
      %55 = vector.load %arg7[%c2_56, %c0_57, %c0_58] : memref<18x18x32xf32, #tpu.memory_space<vmem>>, vector<16x16x32xf32>
      %56 = vector.shape_cast %55 : vector<16x16x32xf32> to vector<256x32xf32>
      %57 = arith.truncf %56 : vector<256x32xf32> to vector<256x32xbf16>
      %c2_59 = arith.constant 2 : index
      %c0_60 = arith.constant 0 : index
      %c0_61 = arith.constant 0 : index
      %c0_62 = arith.constant 0 : index
      %58 = vector.load %arg3[%c2_59, %c0_60, %c0_61, %c0_62] : memref<3x3x32x32xbf16, #tpu.memory_space<vmem>>, vector<1x1x32x32xbf16>
      %59 = vector.shape_cast %58 : vector<1x1x32x32xbf16> to vector<32x32xbf16>
      %cst_63 = arith.constant dense<0.000000e+00> : vector<256x32xf32>
      %60 = tpu.matmul %57, %59, %cst_63 {dimension_numbers = #tpu.dot_dimension_numbers<[1], [0], [0], [1], [0, 0, 1, 1], [], []>} : vector<256x32xbf16>, vector<32x32xbf16>, vector<256x32xf32> -> vector<256x32xf32>
      %61 = arith.addf %54, %60 : vector<256x32xf32>
      %c2_64 = arith.constant 2 : index
      %c1_65 = arith.constant 1 : index
      %c0_66 = arith.constant 0 : index
      %62 = vector.load %arg7[%c2_64, %c1_65, %c0_66] : memref<18x18x32xf32, #tpu.memory_space<vmem>>, vector<16x16x32xf32>
      %63 = vector.shape_cast %62 : vector<16x16x32xf32> to vector<256x32xf32>
      %64 = arith.truncf %63 : vector<256x32xf32> to vector<256x32xbf16>
      %c2_67 = arith.constant 2 : index
      %c1_68 = arith.constant 1 : index
      %c0_69 = arith.constant 0 : index
      %c0_70 = arith.constant 0 : index
      %65 = vector.load %arg3[%c2_67, %c1_68, %c0_69, %c0_70] : memref<3x3x32x32xbf16, #tpu.memory_space<vmem>>, vector<1x1x32x32xbf16>
      %66 = vector.shape_cast %65 : vector<1x1x32x32xbf16> to vector<32x32xbf16>
      %cst_71 = arith.constant dense<0.000000e+00> : vector<256x32xf32>
      %67 = tpu.matmul %64, %66, %cst_71 {dimension_numbers = #tpu.dot_dimension_numbers<[1], [0], [0], [1], [0, 0, 1, 1], [], []>} : vector<256x32xbf16>, vector<32x32xbf16>, vector<256x32xf32> -> vector<256x32xf32>
      %68 = arith.addf %61, %67 : vector<256x32xf32>
      %c2_72 = arith.constant 2 : index
      %c2_73 = arith.constant 2 : index
      %c0_74 = arith.constant 0 : index
      %69 = vector.load %arg7[%c2_72, %c2_73, %c0_74] : memref<18x18x32xf32, #tpu.memory_space<vmem>>, vector<16x16x32xf32>
      %70 = vector.shape_cast %69 : vector<16x16x32xf32> to vector<256x32xf32>
      %71 = arith.truncf %70 : vector<256x32xf32> to vector<256x32xbf16>
      %c2_75 = arith.constant 2 : index
      %c2_76 = arith.constant 2 : index
      %c0_77 = arith.constant 0 : index
      %c0_78 = arith.constant 0 : index
      %72 = vector.load %arg3[%c2_75, %c2_76, %c0_77, %c0_78] : memref<3x3x32x32xbf16, #tpu.memory_space<vmem>>, vector<1x1x32x32xbf16>
      %73 = vector.shape_cast %72 : vector<1x1x32x32xbf16> to vector<32x32xbf16>
      %cst_79 = arith.constant dense<0.000000e+00> : vector<256x32xf32>
      %74 = tpu.matmul %71, %73, %cst_79 {dimension_numbers = #tpu.dot_dimension_numbers<[1], [0], [0], [1], [0, 0, 1, 1], [], []>} : vector<256x32xbf16>, vector<32x32xbf16>, vector<256x32xf32> -> vector<256x32xf32>
      %75 = arith.addf %68, %74 : vector<256x32xf32>
      %76 = vector.shape_cast %75 : vector<256x32xf32> to vector<16x16x32xf32>
      %77 = arith.index_cast %arg1 : i32 to index
      %c0_80 = arith.constant 0 : index
      %c0_81 = arith.constant 0 : index
      %c0_82 = arith.constant 0 : index
      %78 = vector.load %arg8[%77, %c0_80, %c0_81, %c0_82] : memref<2x16x16x32xf32, #tpu.memory_space<vmem>>, vector<1x16x16x32xf32>
      %79 = vector.shape_cast %78 : vector<1x16x16x32xf32> to vector<16x16x32xf32>
      %80 = vector.shape_cast %76 : vector<16x16x32xf32> to vector<1x16x16x32xf32>
      tpu.vector_store %arg8[%77, %c0_80, %c0_81, %c0_82], %80 {strides = array<i32>} : memref<2x16x16x32xf32, #tpu.memory_space<vmem>>, vector<1x16x16x32xf32>,
      %c0_83 = arith.constant 0 : index
      %c0_84 = arith.constant 0 : index
      %81 = vector.load %arg9[%c0_83, %c0_84] : memref<1x32xf32, #tpu.memory_space<vmem>>, vector<1x32xf32>
      %cst_85 = arith.constant dense<0.000000e+00> : vector<32xf32>
      %82 = vector.multi_reduction <add>, %75, %cst_85 [0] : vector<256x32xf32> to vector<32xf32>
      %83 = vector.shape_cast %82 : vector<32xf32> to vector<1x32xf32>
      %84 = arith.addf %81, %83 : vector<1x32xf32>
      %c0_86 = arith.constant 0 : index
      %c0_87 = arith.constant 0 : index
      %85 = vector.load %arg9[%c0_86, %c0_87] : memref<1x32xf32, #tpu.memory_space<vmem>>, vector<1x32xf32>
      tpu.vector_store %arg9[%c0_86, %c0_87], %84 {strides = array<i32>} : memref<1x32xf32, #tpu.memory_space<vmem>>, vector<1x32xf32>,
      %c0_88 = arith.constant 0 : index
      %c0_89 = arith.constant 0 : index
      %86 = vector.load %arg10[%c0_88, %c0_89] : memref<1x32xf32, #tpu.memory_space<vmem>>, vector<1x32xf32>
      %87 = arith.mulf %75, %75 : vector<256x32xf32>
      %cst_90 = arith.constant dense<0.000000e+00> : vector<32xf32>
      %88 = vector.multi_reduction <add>, %87, %cst_90 [0] : vector<256x32xf32> to vector<32xf32>
      %89 = vector.shape_cast %88 : vector<32xf32> to vector<1x32xf32>
      %90 = arith.addf %86, %89 : vector<1x32xf32>
      %c0_91 = arith.constant 0 : index
      %c0_92 = arith.constant 0 : index
      %91 = vector.load %arg10[%c0_91, %c0_92] : memref<1x32xf32, #tpu.memory_space<vmem>>, vector<1x32xf32>
      tpu.vector_store %arg10[%c0_91, %c0_92], %90 {strides = array<i32>} : memref<1x32xf32, #tpu.memory_space<vmem>>, vector<1x32xf32>,
    } else {
    }
    %c1_i32 = arith.constant 1 : i32
    %3 = arith.cmpi eq, %arg0, %c1_i32 : i32
    %4 = arith.extui %3 : i1 to i32
    %c0_i32_1 = arith.constant 0 : i32
    %5 = arith.cmpi ne, %4, %c0_i32_1 : i32
    scf.if %5 {
      %c0 = arith.constant 0 : index
      %c0_2 = arith.constant 0 : index
      %6 = vector.load %arg9[%c0, %c0_2] : memref<1x32xf32, #tpu.memory_space<vmem>>, vector<1x32xf32>
      %cst = arith.constant 0.001953125 : f32
      %7 = vector.broadcast %cst : f32 to vector<1x32xf32>
      %8 = arith.mulf %6, %7 : vector<1x32xf32>
      %c0_3 = arith.constant 0 : index
      %c0_4 = arith.constant 0 : index
      %9 = vector.load %arg10[%c0_3, %c0_4] : memref<1x32xf32, #tpu.memory_space<vmem>>, vector<1x32xf32>
      %cst_5 = arith.constant 0.001953125 : f32
      %10 = vector.broadcast %cst_5 : f32 to vector<1x32xf32>
      %11 = arith.mulf %9, %10 : vector<1x32xf32>
      %12 = arith.mulf %8, %8 : vector<1x32xf32>
      %13 = arith.subf %11, %12 : vector<1x32xf32>
      %cst_6 = arith.constant 0.000000e+00 : f32
      %14 = vector.broadcast %cst_6 : f32 to vector<1x32xf32>
      %15 = arith.maximumf %13, %14 : vector<1x32xf32>
      %c0_7 = arith.constant 0 : index
      %c0_8 = arith.constant 0 : index
      %16 = vector.load %arg4[%c0_7, %c0_8] : memref<1x32xf32, #tpu.memory_space<vmem>>, vector<1x32xf32>
      %cst_9 = arith.constant 9.99999974E-6 : f32
      %17 = vector.broadcast %cst_9 : f32 to vector<1x32xf32>
      %18 = arith.addf %15, %17 : vector<1x32xf32>
      %19 = math.rsqrt %18 : vector<1x32xf32>
      %20 = arith.mulf %16, %19 : vector<1x32xf32>
      %c0_10 = arith.constant 0 : index
      %c0_11 = arith.constant 0 : index
      %21 = vector.load %arg5[%c0_10, %c0_11] : memref<1x32xf32, #tpu.memory_space<vmem>>, vector<1x32xf32>
      %22 = arith.mulf %8, %20 : vector<1x32xf32>
      %23 = arith.subf %21, %22 : vector<1x32xf32>
      %24 = arith.index_cast %arg1 : i32 to index
      %c0_12 = arith.constant 0 : index
      %c0_13 = arith.constant 0 : index
      %c0_14 = arith.constant 0 : index
      %25 = tpu.strided_load %arg8[%24, %c0_12, %c0_13, %c0_14] {strides = array<i32: 1, 1, 2, 1>} : memref<2x16x16x32xf32, #tpu.memory_space<vmem>>, vector<1x16x8x32xf32>
      %26 = vector.shape_cast %25 : vector<1x16x8x32xf32> to vector<16x8x32xf32>
      %27 = vector.shape_cast %20 : vector<1x32xf32> to vector<1x1x32xf32>
      %28 = vector.broadcast %27 : vector<1x1x32xf32> to vector<16x8x32xf32>
      %29 = arith.mulf %26, %28 : vector<16x8x32xf32>
      %30 = vector.shape_cast %23 : vector<1x32xf32> to vector<1x1x32xf32>
      %31 = vector.broadcast %30 : vector<1x1x32xf32> to vector<16x8x32xf32>
      %32 = arith.addf %29, %31 : vector<16x8x32xf32>
      %cst_15 = arith.constant 0.000000e+00 : f32
      %33 = vector.broadcast %cst_15 : f32 to vector<16x8x32xf32>
      %34 = arith.cmpf ogt, %32, %33 : vector<16x8x32xf32>
      %cst_16 = arith.constant 1.000000e-01 : f32
      %35 = vector.broadcast %cst_16 : f32 to vector<16x8x32xf32>
      %36 = arith.mulf %35, %32 : vector<16x8x32xf32>
      %37 = arith.select %34, %32, %36 : vector<16x8x32xi1>, vector<16x8x32xf32>
      %38 = arith.index_cast %arg1 : i32 to index
      %c0_17 = arith.constant 0 : index
      %c1 = arith.constant 1 : index
      %c0_18 = arith.constant 0 : index
      %39 = tpu.strided_load %arg8[%38, %c0_17, %c1, %c0_18] {strides = array<i32: 1, 1, 2, 1>} : memref<2x16x16x32xf32, #tpu.memory_space<vmem>>, vector<1x16x8x32xf32>
      %40 = vector.shape_cast %39 : vector<1x16x8x32xf32> to vector<16x8x32xf32>
      %41 = vector.shape_cast %20 : vector<1x32xf32> to vector<1x1x32xf32>
      %42 = vector.broadcast %41 : vector<1x1x32xf32> to vector<16x8x32xf32>
      %43 = arith.mulf %40, %42 : vector<16x8x32xf32>
      %44 = vector.shape_cast %23 : vector<1x32xf32> to vector<1x1x32xf32>
      %45 = vector.broadcast %44 : vector<1x1x32xf32> to vector<16x8x32xf32>
      %46 = arith.addf %43, %45 : vector<16x8x32xf32>
      %cst_19 = arith.constant 0.000000e+00 : f32
      %47 = vector.broadcast %cst_19 : f32 to vector<16x8x32xf32>
      %48 = arith.cmpf ogt, %46, %47 : vector<16x8x32xf32>
      %cst_20 = arith.constant 1.000000e-01 : f32
      %49 = vector.broadcast %cst_20 : f32 to vector<16x8x32xf32>
      %50 = arith.mulf %49, %46 : vector<16x8x32xf32>
      %51 = arith.select %48, %46, %50 : vector<16x8x32xi1>, vector<16x8x32xf32>
      %52 = arith.maximumf %37, %51 : vector<16x8x32xf32>
      %53 = vector.shape_cast %52 : vector<16x8x32xf32> to vector<8x2x8x32xf32>
      %cst_21 = arith.constant dense<0xFF800000> : vector<8x8x32xf32>
      %54 = vector.multi_reduction <maximumf>, %53, %cst_21 [1] : vector<8x2x8x32xf32> to vector<8x8x32xf32>
      %c0_22 = arith.constant 0 : index
      %c0_23 = arith.constant 0 : index
      %c0_24 = arith.constant 0 : index
      %c0_25 = arith.constant 0 : index
      %55 = vector.load %arg6[%c0_22, %c0_23, %c0_24, %c0_25] : memref<1x8x8x32xf32, #tpu.memory_space<vmem>>, vector<1x8x8x32xf32>
      %56 = vector.shape_cast %55 : vector<1x8x8x32xf32> to vector<8x8x32xf32>
      %57 = vector.shape_cast %54 : vector<8x8x32xf32> to vector<1x8x8x32xf32>
      tpu.vector_store %arg6[%c0_22, %c0_23, %c0_24, %c0_25], %57 {strides = array<i32>} : memref<1x8x8x32xf32, #tpu.memory_space<vmem>>, vector<1x8x8x32xf32>,
    } else {
    }
    return
  }
  func.func @transform_0(%arg0: i32, %arg1: i32) -> (i32, i32, i32, i32) {
    %c1_i32 = arith.constant 1 : i32
    %0 = arith.subi %c1_i32, %arg0 : i32
    %1 = arith.muli %arg1, %0 : i32
    %c1_i32_0 = arith.constant 1 : i32
    %2 = arith.muli %c1_i32_0, %arg0 : i32
    %3 = arith.addi %1, %2 : i32
    %c0_i32 = arith.constant 0 : i32
    %c0_i32_1 = arith.constant 0 : i32
    %c0_i32_2 = arith.constant 0 : i32
    %c0_i32_3 = arith.constant 0 : i32
    return %3, %c0_i32, %c0_i32_1, %c0_i32_2 : i32, i32, i32, i32
  }
  func.func @transform_1(%arg0: i32, %arg1: i32) -> (i32, i32, i32, i32) {
    %c0_i32 = arith.constant 0 : i32
    %c0_i32_0 = arith.constant 0 : i32
    %c0_i32_1 = arith.constant 0 : i32
    %c0_i32_2 = arith.constant 0 : i32
    %c0_i32_3 = arith.constant 0 : i32
    return %c0_i32, %c0_i32_0, %c0_i32_1, %c0_i32_2 : i32, i32, i32, i32
  }
  func.func @transform_2(%arg0: i32, %arg1: i32) -> (i32, i32) {
    %c0_i32 = arith.constant 0 : i32
    %c0_i32_0 = arith.constant 0 : i32
    %c0_i32_1 = arith.constant 0 : i32
    return %c0_i32, %c0_i32_0 : i32, i32
  }
  func.func @transform_3(%arg0: i32, %arg1: i32) -> (i32, i32) {
    %c0_i32 = arith.constant 0 : i32
    %c0_i32_0 = arith.constant 0 : i32
    %c0_i32_1 = arith.constant 0 : i32
    return %c0_i32, %c0_i32_0 : i32, i32
  }
  func.func @transform_4(%arg0: i32, %arg1: i32) -> (i32, i32, i32, i32) {
    %0 = arith.muli %arg1, %arg0 : i32
    %c0_i32 = arith.constant 0 : i32
    %c0_i32_0 = arith.constant 0 : i32
    %c0_i32_1 = arith.constant 0 : i32
    %c0_i32_2 = arith.constant 0 : i32
    return %0, %c0_i32, %c0_i32_0, %c0_i32_1 : i32, i32, i32, i32
  }
}

</mosaic_0001>

<bundles_post_ra>
// kernel: encoder_n_blocks.2
= control target key start
LH: loop header
LB: loop body
LE: loop exit
PB: predicated region body
PF: predicated region fallthrough
CT: control target
= control target key end

     0   :  { %s4502_s15 = smov 0   ;;  %s4504_s16 = smov 0   ;;  %s5461_s0 = inlined_call_operand.vmem [shape: f32[2,16,16,4], index: 0, kind: input, shape index: {}]   ;;  %s5462_s1 = inlined_call_operand.vmem [shape: bf16[3,3,4,32], index: 1, kind: input, shape index: {}]   ;;  %s5463_s2 = inlined_call_operand.vmem [shape: f32[1,32], index: 2, kind: input, shape index: {}]   ;;  %s5464_s3 = inlined_call_operand.vmem [shape: f32[1,32], index: 3, kind: input, shape index: {}]   ;;  %s5465_s4 = inlined_call_operand.vmem [shape: f32[2,16,16,32], index: 4, kind: output, shape index: {}]  }
   0x1   :  { %s4506_s17 = smov 0   ;;  %s4508_s18 = smov 0  }
   0x2   :  { %s4510_s19 = smov 0  }
   0x3 LB: > { %s23_s20 = sadd.s32 1, %s4466_s17  ;;  %s26_s21 = sadd.s32 1, %s4470_s18  ;;  %s4474_s19 = sphi %s4510_s19, %s14_s19   ;;  %s4470_s18 = sphi %s4508_s18, %s5469_s18   ;;  %s4466_s17 = sphi %s4506_s17, %s5468_s17   ;;  %s4462_s16 = sphi %s4504_s16, %s5467_s16   ;;  %s4458_s15 = sphi %s4502_s15, %s5466_s15  }
   0x4   : > { %p24_p0 = scmp.ge.s32.totalorder %s23_s20, 2  ;;  %p3500_p1 = scmp.ge.s32.totalorder %s4474_s19, 1 }
   0x5   : > { %p188_p2 = scmp.lt.s32.totalorder %s4474_s19, 5 }
   0x6   : > { %s5471_s20 = smov (%p24_p0, %s23_s20), 0  ;;  %s5473_s21 = smov (!%p24_p0, %s26_s21), %s4470_s18 }
   0x7   : > { %p189_p3 = pnand %p3500_p1, %p188_p2  ;;  %p28_p4 = scmp.ge.s32.totalorder %s5473_s21, 2 }
   0x8   : > { %s218_s22 = ssub.s32 (!%p189_p3), 1, %s4462_s16  ;;  %s229_s23 = smul.u32 (!%p189_p3), %s4458_s15, %s4462_s16 }
   0x9   : > { %s5475_s21 = smov (%p28_p4, %s5473_s21), 0  ;;  %192 = sbr.rel (%p189_p3) target bundleno = 666 (0x29a), region = 36 }
   0xa   : > { %s219_s24 = smul.u32 (!%p189_p3), %s4458_s15, %s218_s22  ;;  %p230_p5 = scmp.lt.s32.totalorder (!%p189_p3), %s229_s23, 1 }
   0xb   : > { %p3505_p7 = scmp.ne.s32.totalorder (!%p189_p3), %s4462_s16, 0 }
   0xc   : > { %s220_s25 = sadd.s32 (!%p189_p3), %s4462_s16, %s219_s24 }
   0xd   : > { %p221_p6 = scmp.lt.s32.totalorder (!%p189_p3), %s220_s25, 1 }
  0x10   : > { %s5477_s23 = smov (!%p230_p5, %s229_s23), 1  ;;  %s5479_s25 = smov (!%p221_p6, %s220_s25), 1 }
  0x11   : > { %s3665_s26 = sshll.u32 %s5477_s23, 8  ;;  %s3664_s27 = sshll.u32 %s5479_s25, 8 }
  0x12   : > { %s4544_s30 = scalar_lea.vmem %s5465_s4, %s3665_s26  ;;  %s4549_s7 = scalar_lea.vmem %s5461_s0, %s3664_s27 }
  0x13   : > { %240 = sbr.rel (%p3505_p7) target bundleno = 592 (0x250), region = 40  ;;  %p3506_p8 = scmp.ne.s32.totalorder (!%p3505_p7), %s4458_s15, 0 }
  0x1a   : > { %244 = sbr.rel (%p3506_p8) target bundleno = 55 (0x37), region = 44  ;;  %vm245_vm0 = vcmask (!%p3506_p8), 31744   ;;  %vm248_vm1 = vcmask (!%p3506_p8), 25600   ;;  %vm301_vm2 = vcmask (!%p3506_p8), 253952   ;;  %v4476_v0 = vmov (!%p3506_p8), 0.0  }
  0x1b   : > { %246 = vst.msk [vmem:[#allocation2] sm:$0xff] (!%p3506_p8), %vm245_vm0, %v4476_v0  ;;  %247 = vst.msk [vmem:[#allocation2 + $0x8] sm:$0xff] (!%p3506_p8), %vm245_vm0, %v4476_v0 }
  0x1c   : > { %250 = vst.msk [vmem:[#allocation2 + $0x18] sm:$0xff] (!%p3506_p8), %vm245_vm0, %v4476_v0  ;;  %251 = vst.msk [vmem:[#allocation2 + $0x20] sm:$0xff] (!%p3506_p8), %vm245_vm0, %v4476_v0 }
  0x1d   : > { %253 = vst.msk [vmem:[#allocation2 + $0x30] sm:$0xff] (!%p3506_p8), %vm245_vm0, %v4476_v0  ;;  %254 = vst.msk [vmem:[#allocation2 + $0x38] sm:$0xff] (!%p3506_p8), %vm245_vm0, %v4476_v0 }
  0x1e   : > { %256 = vst.msk [vmem:[#allocation2 + $0x48] sm:$0xff] (!%p3506_p8), %vm245_vm0, %v4476_v0  ;;  %257 = vst.msk [vmem:[#allocation2 + $0x50] sm:$0xff] (!%p3506_p8), %vm245_vm0, %v4476_v0 }
  0x1f   : > { %259 = vst.msk [vmem:[#allocation2 + $0x60] sm:$0xff] (!%p3506_p8), %vm245_vm0, %v4476_v0  ;;  %260 = vst.msk [vmem:[#allocation2 + $0x68] sm:$0xff] (!%p3506_p8), %vm245_vm0, %v4476_v0 }
  0x20   : > { %262 = vst.msk [vmem:[#allocation2 + $0x78] sm:$0xff] (!%p3506_p8), %vm245_vm0, %v4476_v0  ;;  %263 = vst.msk [vmem:[#allocation2 + $0x80] sm:$0xff] (!%p3506_p8), %vm245_vm0, %v4476_v0 }
  0x21   : > { %265 = vst.msk [vmem:[#allocation2 + $0x90] sm:$0xff] %vm245_vm0, %v4476_v0  ;;  %266 = vst.msk [vmem:[#allocation2 + $0x98] sm:$0xff] %vm245_vm0, %v4476_v0 }
  0x22   : > { %268 = vst.msk [vmem:[#allocation2 + $0xa8] sm:$0xff] %vm245_vm0, %v4476_v0  ;;  %269 = vst.msk [vmem:[#allocation2 + $0xb0] sm:$0xff] %vm245_vm0, %v4476_v0 }
  0x23   : > { %271 = vst.msk [vmem:[#allocation2 + $0xc0] sm:$0xff] %vm245_vm0, %v4476_v0  ;;  %272 = vst.msk [vmem:[#allocation2 + $0xc8] sm:$0xff] %vm245_vm0, %v4476_v0 }
  0x24   : > { %274 = vst.msk [vmem:[#allocation2 + $0xd8] sm:$0xff] %vm245_vm0, %v4476_v0  ;;  %275 = vst.msk [vmem:[#allocation2 + $0xe0] sm:$0xff] %vm245_vm0, %v4476_v0 }
  0x25   : > { %277 = vst.msk [vmem:[#allocation2 + $0xf0] sm:$0xff] %vm245_vm0, %v4476_v0  ;;  %278 = vst.msk [vmem:[#allocation2 + $0xf8] sm:$0xff] %vm245_vm0, %v4476_v0 }
  0x26   : > { %280 = vst.msk [vmem:[#allocation2 + $0x108] sm:$0xff] %vm245_vm0, %v4476_v0  ;;  %281 = vst.msk [vmem:[#allocation2 + $0x110] sm:$0xff] %vm245_vm0, %v4476_v0 }
  0x27   : > { %283 = vst.msk [vmem:[#allocation2 + $0x120] sm:$0xff] %vm245_vm0, %v4476_v0  ;;  %284 = vst.msk [vmem:[#allocation2 + $0x128] sm:$0xff] %vm245_vm0, %v4476_v0 }
  0x28   : > { %286 = vst.msk [vmem:[#allocation2 + $0x138] sm:$0xff] %vm245_vm0, %v4476_v0  ;;  %287 = vst.msk [vmem:[#allocation2 + $0x140] sm:$0xff] %vm245_vm0, %v4476_v0 }
  0x29   : > { %289 = vst.msk [vmem:[#allocation2 + $0x150] sm:$0xff] %vm245_vm0, %v4476_v0  ;;  %290 = vst.msk [vmem:[#allocation2 + $0x158] sm:$0xff] %vm245_vm0, %v4476_v0 }
  0x2a   : > { %292 = vst.msk [vmem:[#allocation2 + $0x168] sm:$0xff] %vm245_vm0, %v4476_v0  ;;  %293 = vst.msk [vmem:[#allocation2 + $0x170] sm:$0xff] %vm245_vm0, %v4476_v0 }
  0x2b   : > { %295 = vst.msk [vmem:[#allocation2 + $0x180] sm:$0xff] %vm245_vm0, %v4476_v0  ;;  %296 = vst.msk [vmem:[#allocation2 + $0x188] sm:$0xff] %vm245_vm0, %v4476_v0 }
  0x2c   : > { %298 = vst.msk [vmem:[#allocation2 + $0x198] sm:$0xff] %vm245_vm0, %v4476_v0  ;;  %299 = vst.msk [vmem:[#allocation2 + $0x1a0] sm:$0xff] %vm245_vm0, %v4476_v0 }
  0x2d   : > { %249 = vst.msk [vmem:[#allocation2 + $0x10] sm:$0x3] %vm248_vm1, %v4476_v0  ;;  %252 = vst.msk [vmem:[#allocation2 + $0x28] sm:$0x3] %vm248_vm1, %v4476_v0 }
  0x2e   : > { %255 = vst.msk [vmem:[#allocation2 + $0x40] sm:$0x3] %vm248_vm1, %v4476_v0  ;;  %258 = vst.msk [vmem:[#allocation2 + $0x58] sm:$0x3] %vm248_vm1, %v4476_v0 }
  0x2f   : > { %261 = vst.msk [vmem:[#allocation2 + $0x70] sm:$0x3] %vm248_vm1, %v4476_v0  ;;  %264 = vst.msk [vmem:[#allocation2 + $0x88] sm:$0x3] %vm248_vm1, %v4476_v0 }
  0x30   : > { %267 = vst.msk [vmem:[#allocation2 + $0xa0] sm:$0x3] %vm248_vm1, %v4476_v0  ;;  %270 = vst.msk [vmem:[#allocation2 + $0xb8] sm:$0x3] %vm248_vm1, %v4476_v0 }
  0x31   : > { %273 = vst.msk [vmem:[#allocation2 + $0xd0] sm:$0x3] %vm248_vm1, %v4476_v0  ;;  %276 = vst.msk [vmem:[#allocation2 + $0xe8] sm:$0x3] %vm248_vm1, %v4476_v0 }
  0x32   : > { %279 = vst.msk [vmem:[#allocation2 + $0x100] sm:$0x3] %vm248_vm1, %v4476_v0  ;;  %282 = vst.msk [vmem:[#allocation2 + $0x118] sm:$0x3] %vm248_vm1, %v4476_v0 }
  0x33   : > { %285 = vst.msk [vmem:[#allocation2 + $0x130] sm:$0x3] %vm248_vm1, %v4476_v0  ;;  %288 = vst.msk [vmem:[#allocation2 + $0x148] sm:$0x3] %vm248_vm1, %v4476_v0 }
  0x34   : > { %291 = vst.msk [vmem:[#allocation2 + $0x160] sm:$0x3] %vm248_vm1, %v4476_v0  ;;  %294 = vst.msk [vmem:[#allocation2 + $0x178] sm:$0x3] %vm248_vm1, %v4476_v0 }
  0x35   : > { %297 = vst.msk [vmem:[#allocation2 + $0x190] sm:$0x3] %vm248_vm1, %v4476_v0  ;;  %300 = vst.msk [vmem:[#allocation2 + $0x1a8] sm:$0x3] %vm248_vm1, %v4476_v0 }
  0x36   : > { %302 = vst.msk [vmem:[#allocation4] sm:$0x1] %vm301_vm2, %v4476_v0  ;;  %303 = vst.msk [vmem:[#allocation5] sm:$0x1] %vm301_vm2, %v4476_v0 }
  0x37 PF: > { %v3507_v1 = vld [vmem:[%s5462_s1 + $0x2] sm:$0x3]  ;;  %vm517_vm3 = vcmask 1041408   ;;  %v4615_v2 = vld [vmem:[%s5462_s1 + $0x8] sm:$0x3]  ;;  %vm337_vm4 = vcmask 31744  }
  0x38   : > { %4383 = vmatprep.subr.msk.bf16.mxu1 %vm517_vm3, %v3507_v1  ;;  %4387 = vmatprep.subr.msk.bf16.mxu0 %vm517_vm3, %v4615_v2  ;;  %v519_v3 = vsel %vm517_vm3, %v3507_v1, 0  ;;  %v4623_v4 = vsel %vm517_vm3, %v4615_v2, 0  ;;  %v419_v5 = vld [vmem:[#allocation2 + $0x1] sm:$0xff]  ;;  %v420_v6 = vld [vmem:[#allocation2 + $0x9] sm:$0xff]  ;;  %v307_v13 = vld [vmem:[%s4549_s7 + $0x18] sm:$0xff]  ;;  %s3659_s8 = sshll.u32 %s4458_s15, 8 }
  0x39   : > { %v304_v7 = vld [vmem:[%s4549_s7] sm:$0xff]  ;;  %3820 = vmatpush3.bf16.msra.mxu1 %v519_v3  ;;  %3956 = vmatpush3.bf16.msra.mxu0 %v4623_v4  ;;  %v451_v8 = vpack.c.bf16 %v420_v6, %v419_v5  ;;  %v305_v9 = vld [vmem:[%s4549_s7 + $0x8] sm:$0xff]  ;;  %v306_v12 = vld [vmem:[%s4549_s7 + $0x10] sm:$0xff]  ;;  %341 = vst.msk [vmem:[#allocation2 + $0x39] sm:$0xff] %vm337_vm4, %v307_v13  ;;  %vm2955_vm5 = vcmask 261120   ;;  %s5131_s9 = scalar_lea.vmem [#allocation3], %s3659_s8 }
  0x3a   : > { %338 = vst.msk [vmem:[#allocation2 + $0x19] sm:$0xff] %vm337_vm4, %v304_v7  ;;  %v418_v10 = vld [vmem:[%s5462_s1] sm:$0x3]  ;;  %v3591_v11 = vld [vmem:[%s5462_s1 + $0xa] sm:$0x3]  ;;  %339 = vst.msk [vmem:[#allocation2 + $0x21] sm:$0xff] %vm337_vm4, %v305_v9 }
  0x3b   : > { %4384 = vmatprep.subr.msk.bf16.mxu1 %vm517_vm3, %v418_v10  ;;  %4389 = vmatprep.subr.msk.bf16.mxu0 %vm517_vm3, %v3591_v11  ;;  %v308_v14 = vld [vmem:[%s4549_s7 + $0x20] sm:$0xff]  ;;  %340 = vst.msk [vmem:[#allocation2 + $0x31] sm:$0xff] %vm337_vm4, %v306_v12  ;;  %v309_v15 = vld [vmem:[%s4549_s7 + $0x28] sm:$0xff]  ;;  %v310_v16 = vld [vmem:[%s4549_s7 + $0x30] sm:$0xff]  ;;  %v731_v34 = vsel %vm517_vm3, %v418_v10, 0  ;;  %v1875_v39 = vsel %vm517_vm3, %v3591_v11, 0 }
  0x3c   : > { %3821 = vmatprep.mubr.msk.bf16.mxu1 %vm337_vm4, %v451_v8  ;;  %342 = vst.msk [vmem:[#allocation2 + $0x49] sm:$0xff] %vm337_vm4, %v308_v14  ;;  %v311_v17 = vld [vmem:[%s4549_s7 + $0x38] sm:$0xff]  ;;  %343 = vst.msk [vmem:[#allocation2 + $0x51] sm:$0xff] %vm337_vm4, %v309_v15  ;;  %v312_v18 = vld [vmem:[%s4549_s7 + $0x40] sm:$0xff]  ;;  %vm3059_vm6 = vcmask 253952  }
  0x3d   : > { %344 = vst.msk [vmem:[#allocation2 + $0x61] sm:$0xff] %vm337_vm4, %v310_v16  ;;  %345 = vst.msk [vmem:[#allocation2 + $0x69] sm:$0xff] %vm337_vm4, %v311_v17  ;;  %v313_v19 = vld [vmem:[%s4549_s7 + $0x48] sm:$0xff]  ;;  %v314_v20 = vld [vmem:[%s4549_s7 + $0x50] sm:$0xff] }
  0x3e   : > { %346 = vst.msk [vmem:[#allocation2 + $0x79] sm:$0xff] %vm337_vm4, %v312_v18  ;;  %347 = vst.msk [vmem:[#allocation2 + $0x81] sm:$0xff] %vm337_vm4, %v313_v19  ;;  %v315_v21 = vld [vmem:[%s4549_s7 + $0x58] sm:$0xff]  ;;  %v316_v22 = vld [vmem:[%s4549_s7 + $0x60] sm:$0xff] }
  0x3f   : > { %348 = vst.msk [vmem:[#allocation2 + $0x91] sm:$0xff] %vm337_vm4, %v314_v20  ;;  %v317_v23 = vld [vmem:[%s4549_s7 + $0x68] sm:$0xff]  ;;  %349 = vst.msk [vmem:[#allocation2 + $0x99] sm:$0xff] %vm337_vm4, %v315_v21  ;;  %v318_v24 = vld [vmem:[%s4549_s7 + $0x70] sm:$0xff] }
  0x40   : > { %350 = vst.msk [vmem:[#allocation2 + $0xa9] sm:$0xff] %vm337_vm4, %v316_v22  ;;  %351 = vst.msk [vmem:[#allocation2 + $0xb1] sm:$0xff] %vm337_vm4, %v317_v23  ;;  %v319_v25 = vld [vmem:[%s4549_s7 + $0x78] sm:$0xff]  ;;  %v320_v26 = vld [vmem:[%s4549_s7 + $0x80] sm:$0xff] }
  0x41   : > { %352 = vst.msk [vmem:[#allocation2 + $0xc1] sm:$0xff] %vm337_vm4, %v318_v24  ;;  %353 = vst.msk [vmem:[#allocation2 + $0xc9] sm:$0xff] %vm337_vm4, %v319_v25  ;;  %v321_v27 = vld [vmem:[%s4549_s7 + $0x88] sm:$0xff]  ;;  %v322_v28 = vld [vmem:[%s4549_s7 + $0x90] sm:$0xff] }
  0x42   : > { %354 = vst.msk [vmem:[#allocation2 + $0xd9] sm:$0xff] %vm337_vm4, %v320_v26  ;;  %v421_v29 = vld [vmem:[#allocation2 + $0x19] sm:$0xff]  ;;  %355 = vst.msk [vmem:[#allocation2 + $0xe1] sm:$0xff] %vm337_vm4, %v321_v27  ;;  %v422_v32 = vld [vmem:[#allocation2 + $0x21] sm:$0xff] }
  0x43   : > { %v323_v30 = vld [vmem:[%s4549_s7 + $0x98] sm:$0xff]  ;;  %356 = vst.msk [vmem:[#allocation2 + $0xf1] sm:$0xff] %vm337_vm4, %v322_v28  ;;  %v324_v31 = vld [vmem:[%s4549_s7 + $0xa0] sm:$0xff]  ;;  %v452_v33 = vpack.c.bf16 %v422_v32, %v421_v29  ;;  %v425_v37 = vld [vmem:[#allocation2 + $0x49] sm:$0xff] }
  0x44   : > { %357 = vst.msk [vmem:[#allocation2 + $0xf9] sm:$0xff] %vm337_vm4, %v323_v30  ;;  %358 = vst.msk [vmem:[#allocation2 + $0x109] sm:$0xff] %vm337_vm4, %v324_v31  ;;  %v1484_v35 = vld [vmem:[#allocation2 + $0x31] sm:$0xff]  ;;  %v1485_v36 = vld [vmem:[#allocation2 + $0x39] sm:$0xff] }
  0x45   : > { %v4678_v38 = vpack.c.bf16 %v1485_v36, %v1484_v35  ;;  %v426_v40 = vld [vmem:[#allocation2 + $0x51] sm:$0xff]  ;;  %3822 = vmatmul.mubr.msk.bf16.vlgmr.msra.gmra.mrb[0].mxu1 %vm337_vm4, %v452_v33  ;;  %3957 = vmatprep.mubr.msk.bf16.mxu0 %vm337_vm4, %v452_v33  ;;  %v4688_v42 = vld [vmem:[%s5462_s1 + $0xc] sm:$0x3]  ;;  %v1488_v43 = vld [vmem:[#allocation2 + $0x61] sm:$0xff] }
  0x46   : > { %v4683_v41 = vpack.c.bf16 %v426_v40, %v425_v37  ;;  %3854 = vmatpush3.bf16.msra.mxu1 %v731_v34  ;;  %v1489_v44 = vld [vmem:[#allocation2 + $0x69] sm:$0xff]  ;;  %v429_v45 = vld [vmem:[#allocation2 + $0x79] sm:$0xff]  ;;  %v430_v46 = vld [vmem:[#allocation2 + $0x81] sm:$0xff]  ;;  %v2170_v23 = vsel %vm517_vm3, %v4688_v42, 0 }
  0x47   : > { %3958 = vmatmul.mubr.msk.bf16.vlgmr.msra.gmra.mrb[0].mxu0 %vm337_vm4, %v4678_v38  ;;  %3825 = vmatprep.mubr.msk.bf16.mxu1 %vm337_vm4, %v4678_v38  ;;  %v325_v47 = vld [vmem:[%s4549_s7 + $0xa8] sm:$0xff]  ;;  %v4699_v48 = vpack.c.bf16 %v1489_v44, %v1488_v43  ;;  %v4702_v49 = vpack.c.bf16 %v430_v46, %v429_v45  ;;  %v326_v50 = vld [vmem:[%s4549_s7 + $0xb0] sm:$0xff]  ;;  %v327_v51 = vld [vmem:[%s4549_s7 + $0xb8] sm:$0xff] }
  0x48   : > { %3990 = vmatpush3.bf16.msra.mxu0 %v1875_v39  ;;  %3961 = vmatprep.mubr.msk.bf16.mxu0 %vm337_vm4, %v4683_v41  ;;  %359 = vst.msk [vmem:[#allocation2 + $0x111] sm:$0xff] %vm337_vm4, %v325_v47  ;;  %360 = vst.msk [vmem:[#allocation2 + $0x121] sm:$0xff] %vm337_vm4, %v326_v50  ;;  %v328_v52 = vld [vmem:[%s4549_s7 + $0xc0] sm:$0xff]  ;;  %v329_v53 = vld [vmem:[%s4549_s7 + $0xc8] sm:$0xff] }
  0x49   : > { %4390 = vmatprep.subr.msk.bf16.mxu0 %vm517_vm3, %v4688_v42  ;;  %361 = vst.msk [vmem:[#allocation2 + $0x129] sm:$0xff] %vm337_vm4, %v327_v51  ;;  %362 = vst.msk [vmem:[#allocation2 + $0x139] sm:$0xff] %vm337_vm4, %v328_v52  ;;  %v1492_v54 = vld [vmem:[#allocation2 + $0x91] sm:$0xff]  ;;  %v1493_v57 = vld [vmem:[#allocation2 + $0x99] sm:$0xff] }
  0x4a   : > { %363 = vst.msk [vmem:[#allocation2 + $0x141] sm:$0xff] %vm337_vm4, %v329_v53  ;;  %v330_v55 = vld [vmem:[%s4549_s7 + $0xd0] sm:$0xff]  ;;  %v331_v56 = vld [vmem:[%s4549_s7 + $0xd8] sm:$0xff]  ;;  %v332_v58 = vld [vmem:[%s4549_s7 + $0xe0] sm:$0xff]  ;;  %v4728_v62 = vpack.c.bf16 %v1493_v57, %v1492_v54 }
  0x4b   : > { %364 = vst.msk [vmem:[#allocation2 + $0x151] sm:$0xff] %vm337_vm4, %v330_v55  ;;  %365 = vst.msk [vmem:[#allocation2 + $0x159] sm:$0xff] %vm337_vm4, %v331_v56  ;;  %v333_v59 = vld [vmem:[%s4549_s7 + $0xe8] sm:$0xff]  ;;  %v434_v61 = vld [vmem:[#allocation2 + $0xb1] sm:$0xff] }
  0x4c   : > { %v433_v60 = vld [vmem:[#allocation2 + $0xa9] sm:$0xff]  ;;  %366 = vst.msk [vmem:[#allocation2 + $0x169] sm:$0xff] %vm337_vm4, %v332_v58  ;;  %367 = vst.msk [vmem:[#allocation2 + $0x171] sm:$0xff] %vm337_vm4, %v333_v59  ;;  %v4733_v63 = vld [vmem:[%s5462_s1 + $0x4] sm:$0x3] }
  0x4d   : > { %3826 = vmatmul.mubr.msk.bf16.gmra.mrb[4].mxu1 %vm337_vm4, %v4683_v41  ;;  %v4735_v0 = vpack.c.bf16 %v434_v61, %v433_v60  ;;  %4385 = vmatprep.subr.msk.bf16.mxu1 %vm517_vm3, %v4733_v63  ;;  %v1496_v1 = vld [vmem:[#allocation2 + $0xc1] sm:$0xff]  ;;  %v1497_v3 = vld [vmem:[#allocation2 + $0xc9] sm:$0xff]  ;;  %v437_v9 = vld [vmem:[#allocation2 + $0xd9] sm:$0xff] }
  0x4e   : > { %3829 = vmatprep.mubr.msk.bf16.mxu1 %vm337_vm4, %v4699_v48  ;;  %v1776_v5 = vld [vmem:[#allocation2 + $0x1a] sm:$0xff]  ;;  %v1777_v6 = vld [vmem:[#allocation2 + $0x22] sm:$0xff]  ;;  %v4747_v7 = vpack.c.bf16 %v1497_v3, %v1496_v1  ;;  %v1778_v11 = vld [vmem:[#allocation2 + $0x32] sm:$0xff] }
  0x4f   : > { %3962 = vmatmul.mubr.msk.bf16.gmra.mrb[4].mxu0 %vm337_vm4, %v4699_v48  ;;  %v4749_v8 = vpack.c.bf16 %v1777_v6, %v1776_v5  ;;  %v438_v10 = vld [vmem:[#allocation2 + $0xe1] sm:$0xff]  ;;  %v334_v12 = vld [vmem:[%s4549_s7 + $0xf0] sm:$0xff]  ;;  %v335_v13 = vld [vmem:[%s4549_s7 + $0xf8] sm:$0xff] }
  0x50   : > { %3965 = vmatprep.mubr.msk.bf16.mxu0 %vm337_vm4, %v4702_v49  ;;  %v1779_v14 = vld [vmem:[#allocation2 + $0x3a] sm:$0xff]  ;;  %v439_v15 = vld [vmem:[#allocation2 + $0xf1] sm:$0xff]  ;;  %368 = vst.msk [vmem:[#allocation2 + $0x181] sm:$0xff] %vm337_vm4, %v334_v12  ;;  %369 = vst.msk [vmem:[#allocation2 + $0x189] sm:$0xff] %vm337_vm4, %v335_v13  ;;  %v4763_v19 = vpack.c.bf16 %v438_v10, %v437_v9 }
  0x51   : > { %v440_v16 = vld [vmem:[#allocation2 + $0xf9] sm:$0xff]  ;;  %v1780_v17 = vld [vmem:[#allocation2 + $0x4a] sm:$0xff]  ;;  %v4765_v20 = vpack.c.bf16 %v1779_v14, %v1778_v11  ;;  %v1782_v27 = vld [vmem:[#allocation2 + $0x62] sm:$0xff] }
  0x52   : > { %v1781_v18 = vld [vmem:[#allocation2 + $0x52] sm:$0xff]  ;;  %v4767_v21 = vpack.c.bf16 %v440_v16, %v439_v15  ;;  %v4778_v24 = vld [vmem:[%s5462_s1 + $0xe] sm:$0x3]  ;;  %v443_v29 = vld [vmem:[#allocation2 + $0x121] sm:$0xff] }
  0x53   : > { %v4769_v22 = vpack.c.bf16 %v1781_v18, %v1780_v17  ;;  %v441_v25 = vld [vmem:[#allocation2 + $0x109] sm:$0xff]  ;;  %v442_v26 = vld [vmem:[#allocation2 + $0x111] sm:$0xff]  ;;  %v1784_v31 = vld [vmem:[#allocation2 + $0x7a] sm:$0xff]  ;;  %v993_v18 = vsel %vm517_vm3, %v4733_v63, 0 }
  0x54   : > { %v1783_v28 = vld [vmem:[#allocation2 + $0x6a] sm:$0xff]  ;;  %v1785_v32 = vld [vmem:[#allocation2 + $0x82] sm:$0xff]  ;;  %v4788_v33 = vpack.c.bf16 %v442_v26, %v441_v25  ;;  %v445_v37 = vld [vmem:[#allocation2 + $0x139] sm:$0xff] }
  0x55   : > { %3830 = vmatmul.mubr.msk.bf16.gmra.mrb[8].mxu1 %vm337_vm4, %v4702_v49  ;;  %v444_v30 = vld [vmem:[#allocation2 + $0x129] sm:$0xff]  ;;  %v4790_v34 = vpack.c.bf16 %v1783_v28, %v1782_v27  ;;  %v4794_v36 = vpack.c.bf16 %v1785_v32, %v1784_v31  ;;  %v446_v39 = vld [vmem:[#allocation2 + $0x141] sm:$0xff]  ;;  %v1786_v40 = vld [vmem:[#allocation2 + $0x92] sm:$0xff] }
  0x56   : > { %3833 = vmatprep.mubr.msk.bf16.mxu1 %vm337_vm4, %v4728_v62  ;;  %v4792_v35 = vpack.c.bf16 %v444_v30, %v443_v29  ;;  %v1787_v42 = vld [vmem:[#allocation2 + $0x9a] sm:$0xff]  ;;  %v447_v43 = vld [vmem:[#allocation2 + $0x151] sm:$0xff]  ;;  %v4804_v47 = vpack.c.bf16 %v446_v39, %v445_v37  ;;  %v449_v53 = vld [vmem:[#allocation2 + $0x169] sm:$0xff] }
  0x57   : > { %3966 = vmatmul.mubr.msk.bf16.gmra.mrb[8].mxu0 %vm337_vm4, %v4728_v62  ;;  %v448_v44 = vld [vmem:[#allocation2 + $0x159] sm:$0xff]  ;;  %v1788_v45 = vld [vmem:[#allocation2 + $0xaa] sm:$0xff]  ;;  %v4806_v50 = vpack.c.bf16 %v1787_v42, %v1786_v40  ;;  %v1790_v55 = vld [vmem:[#allocation2 + $0xc2] sm:$0xff] }
  0x58   : > { %3969 = vmatprep.mubr.msk.bf16.mxu0 %vm337_vm4, %v4735_v0  ;;  %v1789_v46 = vld [vmem:[#allocation2 + $0xb2] sm:$0xff]  ;;  %v4808_v51 = vpack.c.bf16 %v448_v44, %v447_v43  ;;  %v1791_v56 = vld [vmem:[#allocation2 + $0xca] sm:$0xff]  ;;  %v370_v57 = vld [vmem:[#allocation2] sm:$0xff] }
  0x59   : > { %v4810_v52 = vpack.c.bf16 %v1789_v46, %v1788_v45  ;;  %v450_v54 = vld [vmem:[#allocation2 + $0x171] sm:$0xff]  ;;  %v371_v58 = vld [vmem:[#allocation2 + $0x8] sm:$0xff]  ;;  %v1792_v59 = vld [vmem:[#allocation2 + $0xda] sm:$0xff]  ;;  %v4822_v1 = vpack.c.bf16 %v1791_v56, %v1790_v55 }
  0x5a   : > { %v1793_v60 = vld [vmem:[#allocation2 + $0xe2] sm:$0xff]  ;;  %v4820_v61 = vpack.c.bf16 %v450_v54, %v449_v53  ;;  %v402_v3 = vpack.c.bf16 %v371_v58, %v370_v57  ;;  %v372_v6 = vld [vmem:[#allocation2 + $0x18] sm:$0xff]  ;;  %v374_v12 = vld [vmem:[#allocation2 + $0x30] sm:$0xff] }
  0x5b   : > { %v4824_v5 = vpack.c.bf16 %v1793_v60, %v1792_v59  ;;  %v373_v9 = vld [vmem:[#allocation2 + $0x20] sm:$0xff]  ;;  %v1794_v10 = vld [vmem:[#allocation2 + $0xf2] sm:$0xff]  ;;  %v1796_v14 = vld [vmem:[#allocation2 + $0x10a] sm:$0xff] }
  0x5c   : > { %v1795_v11 = vld [vmem:[#allocation2 + $0xfa] sm:$0xff]  ;;  %v1797_v15 = vld [vmem:[#allocation2 + $0x112] sm:$0xff]  ;;  %v4833_v16 = vpack.c.bf16 %v373_v9, %v372_v6  ;;  %v4848_v26 = vld [vmem:[%s5462_s1 + $0x6] sm:$0x3] }
  0x5d   : > { %3834 = vmatmul.mubr.msk.bf16.gmra.mrb[12].mxu1 %vm337_vm4, %v4735_v0  ;;  %v375_v13 = vld [vmem:[#allocation2 + $0x38] sm:$0xff]  ;;  %v4835_v17 = vpack.c.bf16 %v1795_v11, %v1794_v10  ;;  %v4841_v25 = vpack.c.bf16 %v1797_v15, %v1796_v14  ;;  %v376_v27 = vld [vmem:[#allocation2 + $0x48] sm:$0xff]  ;;  %v377_v28 = vld [vmem:[#allocation2 + $0x50] sm:$0xff] }
  0x5e   : > { %3837 = vmatprep.mubr.msk.bf16.mxu1 %vm337_vm4, %v4747_v7  ;;  %v1798_v29 = vld [vmem:[#allocation2 + $0x122] sm:$0xff]  ;;  %v1799_v63 = vld [vmem:[#allocation2 + $0x12a] sm:$0xff]  ;;  %v1800_v32 = vld [vmem:[#allocation2 + $0x13a] sm:$0xff]  ;;  %v4858_v39 = vpack.c.bf16 %v377_v28, %v376_v27 }
  0x5f   : > { %3970 = vmatmul.mubr.msk.bf16.gmra.mrb[12].mxu0 %vm337_vm4, %v4747_v7  ;;  %v378_v30 = vld [vmem:[#allocation2 + $0x60] sm:$0xff]  ;;  %v379_v31 = vld [vmem:[#allocation2 + $0x68] sm:$0xff]  ;;  %v4860_v40 = vpack.c.bf16 %v1799_v63, %v1798_v29  ;;  %v380_v44 = vld [vmem:[#allocation2 + $0x78] sm:$0xff] }
  0x60   : > { %3991 = vmatprep.mubr.msk.bf16.mxu0 %vm337_vm4, %v4749_v8  ;;  %v1801_v37 = vld [vmem:[#allocation2 + $0x142] sm:$0xff]  ;;  %v4862_v42 = vpack.c.bf16 %v379_v31, %v378_v30  ;;  %v1802_v46 = vld [vmem:[#allocation2 + $0x152] sm:$0xff]  ;;  %v1803_v53 = vld [vmem:[#allocation2 + $0x15a] sm:$0xff] }
  0x61   : > { %v4864_v43 = vpack.c.bf16 %v1801_v37, %v1800_v32  ;;  %v381_v45 = vld [vmem:[#allocation2 + $0x80] sm:$0xff]  ;;  %v382_v54 = vld [vmem:[#allocation2 + $0x90] sm:$0xff]  ;;  %v383_v55 = vld [vmem:[#allocation2 + $0x98] sm:$0xff]  ;;  %v4876_v59 = vpack.c.bf16 %v1803_v53, %v1802_v46  ;;  %v2464_v32 = vsel %vm517_vm3, %v4778_v24, 0 }
  0x62   : > { %v1804_v56 = vld [vmem:[#allocation2 + $0x16a] sm:$0xff]  ;;  %v1805_v57 = vld [vmem:[#allocation2 + $0x172] sm:$0xff]  ;;  %v4874_v58 = vpack.c.bf16 %v381_v45, %v380_v44  ;;  %v4878_v60 = vpack.c.bf16 %v383_v55, %v382_v54  ;;  %v386_v10 = vld [vmem:[#allocation2 + $0xc0] sm:$0xff] }
  0x63   : > { %v384_v6 = vld [vmem:[#allocation2 + $0xa8] sm:$0xff]  ;;  %v385_v9 = vld [vmem:[#allocation2 + $0xb0] sm:$0xff]  ;;  %v388_v27 = vld [vmem:[#allocation2 + $0xd8] sm:$0xff] }
  0x64   : > { %v1806_v11 = vld [vmem:[#allocation2 + $0x182] sm:$0xff]  ;;  %v4890_v14 = vpack.c.bf16 %v385_v9, %v384_v6  ;;  %v390_v29 = vld [vmem:[#allocation2 + $0xf0] sm:$0xff]  ;;  %v391_v63 = vld [vmem:[#allocation2 + $0xf8] sm:$0xff] }
  0x65   : > { %3838 = vmatmul.mubr.msk.bf16.gmra.mrb[16].mxu1 %vm337_vm4, %v4763_v19  ;;  %v389_v28 = vld [vmem:[#allocation2 + $0xe0] sm:$0xff]  ;;  %v4906_v31 = vpack.c.bf16 %v391_v63, %v390_v29  ;;  %v3642_v37 = vld [vmem:[%s5462_s1 + $0x10] sm:$0x3]  ;;  %v392_v44 = vld [vmem:[#allocation2 + $0x108] sm:$0xff]  ;;  %v1287_v63 = vsel %vm517_vm3, %v4848_v26, 0 }
  0x66   : > { %3841 = vmatprep.mubr.msk.bf16.mxu1 %vm337_vm4, %v4767_v21  ;;  %v4904_v30 = vpack.c.bf16 %v389_v28, %v388_v27  ;;  %v393_v45 = vld [vmem:[#allocation2 + $0x110] sm:$0xff]  ;;  %v395_v46 = vld [vmem:[#allocation2 + $0x128] sm:$0xff]  ;;  %v396_v55 = vld [vmem:[#allocation2 + $0x138] sm:$0xff] }
  0x67   : > { %3992 = vmatmul.mubr.msk.bf16.vlgmr.msra.gmra.mrb[0].mxu0 %vm337_vm4, %v4765_v20  ;;  %v4922_v53 = vpack.c.bf16 %v393_v45, %v392_v44  ;;  %v399_v6 = vld [vmem:[#allocation2 + $0x158] sm:$0xff]  ;;  %v895_v27 = vld [vmem:[#allocation2 + $0xa] sm:$0xff]  ;;  %v2102_v44 = vld [vmem:[#allocation2 + $0x1a0] sm:$0xff] }
  0x68   : > { %4024 = vmatpush3.bf16.msra.mxu0 %v2170_v23  ;;  %3995 = vmatprep.mubr.msk.bf16.mxu0 %vm337_vm4, %v4769_v22  ;;  %v4839_v23 = vpack.c.bf16 %v375_v13, %v374_v12  ;;  %v1807_v12 = vld [vmem:[#allocation2 + $0x18a] sm:$0xff] }
  0x69   : > { %4391 = vmatprep.subr.msk.bf16.mxu0 %vm517_vm3, %v4778_v24  ;;  %v387_v13 = vld [vmem:[#allocation2 + $0xc8] sm:$0xff]  ;;  %v4892_v15 = vpack.c.bf16 %v1807_v12, %v1806_v11  ;;  %v394_v24 = vld [vmem:[#allocation2 + $0x120] sm:$0xff]  ;;  %v401_v12 = vld [vmem:[#allocation2 + $0x170] sm:$0xff] }
  0x6a   : > { %v4924_v54 = vpack.c.bf16 %v395_v46, %v394_v24  ;;  %v400_v11 = vld [vmem:[#allocation2 + $0x168] sm:$0xff]  ;;  %v2758_v24 = vsel %vm517_vm3, %v3642_v37, 0 }
  0x6b   : > { %v4946_v28 = vpack.c.bf16 %v401_v12, %v400_v11 }
  0x6d   : > { %3842 = vmatmul.mubr.msk.bf16.gmra.mrb[20].mxu1 %vm337_vm4, %v4788_v33 }
  0x6e   : > { %3845 = vmatprep.mubr.msk.bf16.mxu1 %vm337_vm4, %v4792_v35 }
  0x6f   : > { %3996 = vmatmul.mubr.msk.bf16.gmra.mrb[4].mxu0 %vm337_vm4, %v4790_v34 }
  0x70   : > { %3999 = vmatprep.mubr.msk.bf16.mxu0 %vm337_vm4, %v4794_v36 }
  0x75   : > { %3846 = vmatmul.mubr.msk.bf16.gmra.mrb[24].mxu1 %vm337_vm4, %v4804_v47 }
  0x76   : > { %3849 = vmatprep.mubr.msk.bf16.mxu1 %vm337_vm4, %v4808_v51 }
  0x77   : > { %4000 = vmatmul.mubr.msk.bf16.gmra.mrb[8].mxu0 %vm337_vm4, %v4806_v50 }
  0x78   : > { %4003 = vmatprep.mubr.msk.bf16.mxu0 %vm337_vm4, %v4810_v52 }
  0x7d   : > { %3850 = vmatmul.mubr.msk.bf16.gmra.mrb[28].mxu1 %vm337_vm4, %v4820_v61 }
  0x7e   : > { %3855 = vmatprep.mubr.msk.bf16.mxu1 %vm337_vm4, %v402_v3  ;;  %v4880_v3 = vpack.c.bf16 %v1805_v57, %v1804_v56  ;;  %v397_v56 = vld [vmem:[#allocation2 + $0x140] sm:$0xff]  ;;  %v398_v57 = vld [vmem:[#allocation2 + $0x150] sm:$0xff] }
  0x7f   : > { %4004 = vmatmul.mubr.msk.bf16.gmra.mrb[12].mxu0 %vm337_vm4, %v4822_v1  ;;  %v4934_v9 = vpack.c.bf16 %v397_v56, %v396_v55 }
  0x80   : > { %4007 = vmatprep.mubr.msk.bf16.mxu0 %vm337_vm4, %v4824_v5 }
  0x85   : > { %3856 = vmatmul.mubr.msk.bf16.vlgmr.msra.gmra.mrb[0].mxu1 %vm337_vm4, %v4833_v16 }
  0x86   : > { %3888 = vmatpush3.bf16.msra.mxu1 %v993_v18  ;;  %3859 = vmatprep.mubr.msk.bf16.mxu1 %vm337_vm4, %v4839_v23  ;;  %v4894_v18 = vpack.c.bf16 %v387_v13, %v386_v10  ;;  %v4936_v10 = vpack.c.bf16 %v399_v6, %v398_v57  ;;  %v894_v13 = vld [vmem:[#allocation2 + $0x2] sm:$0xff] }
  0x87   : > { %4008 = vmatmul.mubr.msk.bf16.gmra.mrb[16].mxu0 %vm337_vm4, %v4835_v17  ;;  %4386 = vmatprep.subr.msk.bf16.mxu1 %vm517_vm3, %v4848_v26  ;;  %v926_v29 = vpack.c.bf16 %v895_v27, %v894_v13  ;;  %v2100_v26 = vld [vmem:[#allocation2 + $0x188] sm:$0xff] }
  0x88   : > { %4011 = vmatprep.mubr.msk.bf16.mxu0 %vm337_vm4, %v4841_v25 }
  0x8d   : > { %3860 = vmatmul.mubr.msk.bf16.gmra.mrb[4].mxu1 %vm337_vm4, %v4858_v39 }
  0x8e   : > { %3863 = vmatprep.mubr.msk.bf16.mxu1 %vm337_vm4, %v4862_v42 }
  0x8f   : > { %4012 = vmatmul.mubr.msk.bf16.gmra.mrb[20].mxu0 %vm337_vm4, %v4860_v40 }
  0x90   : > { %4015 = vmatprep.mubr.msk.bf16.mxu0 %vm337_vm4, %v4864_v43 }
  0x95   : > { %3864 = vmatmul.mubr.msk.bf16.gmra.mrb[8].mxu1 %vm337_vm4, %v4874_v58 }
  0x96   : > { %3867 = vmatprep.mubr.msk.bf16.mxu1 %vm337_vm4, %v4878_v60 }
  0x97   : > { %4016 = vmatmul.mubr.msk.bf16.gmra.mrb[24].mxu0 %vm337_vm4, %v4876_v59 }
  0x98   : > { %4019 = vmatprep.mubr.msk.bf16.mxu0 %vm337_vm4, %v4880_v3 }
  0x9d   : > { %3868 = vmatmul.mubr.msk.bf16.gmra.mrb[12].mxu1 %vm337_vm4, %v4890_v14 }
  0x9e   : > { %3871 = vmatprep.mubr.msk.bf16.mxu1 %vm337_vm4, %v4894_v18 }
  0x9f   : > { %4020 = vmatmul.mubr.msk.bf16.gmra.mrb[28].mxu0 %vm337_vm4, %v4892_v15 }
  0xa0   : > { %4025 = vmatprep.mubr.msk.bf16.mxu0 %vm337_vm4, %v4839_v23 }
  0xa5   : > { %3872 = vmatmul.mubr.msk.bf16.gmra.mrb[16].mxu1 %vm337_vm4, %v4904_v30 }
  0xa6   : > { %3875 = vmatprep.mubr.msk.bf16.mxu1 %vm337_vm4, %v4906_v31 }
  0xa7   : > { %4026 = vmatmul.mubr.msk.bf16.vlgmr.msra.gmra.mrb[0].mxu0 %vm337_vm4, %v4858_v39 }
  0xa8   : > { %4058 = vmatpush3.bf16.msra.mxu0 %v2464_v32  ;;  %4029 = vmatprep.mubr.msk.bf16.mxu0 %vm337_vm4, %v4862_v42 }
  0xa9   : > { %4392 = vmatprep.subr.msk.bf16.mxu0 %vm517_vm3, %v3642_v37 }
  0xad   : > { %3876 = vmatmul.mubr.msk.bf16.gmra.mrb[20].mxu1 %vm337_vm4, %v4922_v53 }
  0xae   : > { %3879 = vmatprep.mubr.msk.bf16.mxu1 %vm337_vm4, %v4924_v54 }
  0xaf   : > { %4030 = vmatmul.mubr.msk.bf16.gmra.mrb[4].mxu0 %vm337_vm4, %v4874_v58 }
  0xb0   : > { %4033 = vmatprep.mubr.msk.bf16.mxu0 %vm337_vm4, %v4878_v60 }
  0xb5   : > { %3880 = vmatmul.mubr.msk.bf16.gmra.mrb[24].mxu1 %vm337_vm4, %v4934_v9 }
  0xb6   : > { %3883 = vmatprep.mubr.msk.bf16.mxu1 %vm337_vm4, %v4936_v10 }
  0xb7   : > { %4034 = vmatmul.mubr.msk.bf16.gmra.mrb[8].mxu0 %vm337_vm4, %v4890_v14 }
  0xb8   : > { %4037 = vmatprep.mubr.msk.bf16.mxu0 %vm337_vm4, %v4894_v18 }
  0xbd   : > { %3884 = vmatmul.mubr.msk.bf16.gmra.mrb[28].mxu1 %vm337_vm4, %v4946_v28 }
  0xbe   : > { %3889 = vmatprep.mubr.msk.bf16.mxu1 %vm337_vm4, %v926_v29 }
  0xbf   : > { %4038 = vmatmul.mubr.msk.bf16.gmra.mrb[12].mxu0 %vm337_vm4, %v4904_v30 }
  0xc0   : > { %4041 = vmatprep.mubr.msk.bf16.mxu0 %vm337_vm4, %v4906_v31 }
  0xc5   : > { %3890 = vmatmul.mubr.msk.bf16.vlgmr.msra.gmra.mrb[0].mxu1 %vm337_vm4, %v4749_v8  ;;  %v2099_v8 = vld [vmem:[#allocation2 + $0x180] sm:$0xff] }
  0xc6   : > { %3922 = vmatpush3.bf16.msra.mxu1 %v1287_v63  ;;  %3893 = vmatprep.mubr.msk.bf16.mxu1 %vm337_vm4, %v4765_v20  ;;  %v4975_v32 = vpack.c.bf16 %v2100_v26, %v2099_v8 }
  0xc7   : > { %4042 = vmatmul.mubr.msk.bf16.gmra.mrb[16].mxu0 %vm337_vm4, %v4922_v53  ;;  %4388 = vmatprep.subr.msk.bf16.mxu1 %vm517_vm3, %v4615_v2  ;;  %v2101_v2 = vld [vmem:[#allocation2 + $0x198] sm:$0xff] }
  0xc8   : > { %4045 = vmatprep.mubr.msk.bf16.mxu0 %vm337_vm4, %v4924_v54  ;;  %v2118_v45 = vpack.c.bf16 %v2102_v44, %v2101_v2 }
  0xcd   : > { %3894 = vmatmul.mubr.msk.bf16.gmra.mrb[4].mxu1 %vm337_vm4, %v4769_v22 }
  0xce   : > { %3897 = vmatprep.mubr.msk.bf16.mxu1 %vm337_vm4, %v4790_v34 }
  0xcf   : > { %4046 = vmatmul.mubr.msk.bf16.gmra.mrb[20].mxu0 %vm337_vm4, %v4934_v9 }
  0xd0   : > { %4049 = vmatprep.mubr.msk.bf16.mxu0 %vm337_vm4, %v4936_v10 }
  0xd5   : > { %3898 = vmatmul.mubr.msk.bf16.gmra.mrb[8].mxu1 %vm337_vm4, %v4794_v36 }
  0xd6   : > { %3901 = vmatprep.mubr.msk.bf16.mxu1 %vm337_vm4, %v4806_v50 }
  0xd7   : > { %4050 = vmatmul.mubr.msk.bf16.gmra.mrb[24].mxu0 %vm337_vm4, %v4946_v28 }
  0xd8   : > { %4053 = vmatprep.mubr.msk.bf16.mxu0 %vm337_vm4, %v4975_v32 }
  0xdd   : > { %3902 = vmatmul.mubr.msk.bf16.gmra.mrb[12].mxu1 %vm337_vm4, %v4810_v52 }
  0xde   : > { %3905 = vmatprep.mubr.msk.bf16.mxu1 %vm337_vm4, %v4822_v1 }
  0xdf   : > { %4054 = vmatmul.mubr.msk.bf16.gmra.mrb[28].mxu0 %vm337_vm4, %v2118_v45 }
  0xe0   : > { %4059 = vmatprep.mubr.msk.bf16.mxu0 %vm337_vm4, %v4678_v38  ;;  %v2394_v38 = vld [vmem:[#allocation2 + $0x189] sm:$0xff] }
  0xe5   : > { %3906 = vmatmul.mubr.msk.bf16.gmra.mrb[16].mxu1 %vm337_vm4, %v4824_v5 }
  0xe6   : > { %3909 = vmatprep.mubr.msk.bf16.mxu1 %vm337_vm4, %v4835_v17 }
  0xe7   : > { %4060 = vmatmul.mubr.msk.bf16.vlgmr.msra.gmra.mrb[0].mxu0 %vm337_vm4, %v4683_v41 }
  0xe8   : > { %4092 = vmatpush3.bf16.msra.mxu0 %v2758_v24  ;;  %4063 = vmatprep.mubr.msk.bf16.mxu0 %vm337_vm4, %v4699_v48  ;;  %v2395_v48 = vld [vmem:[#allocation2 + $0x199] sm:$0xff] }
  0xed   : > { %3910 = vmatmul.mubr.msk.bf16.gmra.mrb[20].mxu1 %vm337_vm4, %v4841_v25 }
  0xee   : > { %3913 = vmatprep.mubr.msk.bf16.mxu1 %vm337_vm4, %v4860_v40 }
  0xef   : > { %4064 = vmatmul.mubr.msk.bf16.gmra.mrb[4].mxu0 %vm337_vm4, %v4702_v49  ;;  %v2396_v49 = vld [vmem:[#allocation2 + $0x1a1] sm:$0xff] }
  0xf0   : > { %4067 = vmatprep.mubr.msk.bf16.mxu0 %vm337_vm4, %v4728_v62  ;;  %v2412_v62 = vpack.c.bf16 %v2396_v49, %v2395_v48 }
  0xf5   : > { %3914 = vmatmul.mubr.msk.bf16.gmra.mrb[24].mxu1 %vm337_vm4, %v4864_v43 }
  0xf6   : > { %3917 = vmatprep.mubr.msk.bf16.mxu1 %vm337_vm4, %v4876_v59 }
  0xf7   : > { %4068 = vmatmul.mubr.msk.bf16.gmra.mrb[8].mxu0 %vm337_vm4, %v4735_v0  ;;  %v2689_v0 = vld [vmem:[#allocation2 + $0x19a] sm:$0xff] }
  0xf8   : > { %4071 = vmatprep.mubr.msk.bf16.mxu0 %vm337_vm4, %v4747_v7  ;;  %v2690_v7 = vld [vmem:[#allocation2 + $0x1a2] sm:$0xff] }
  0xfd   : > { %3918 = vmatmul.mubr.msk.bf16.gmra.mrb[28].mxu1 %vm337_vm4, %v4880_v3 }
  0xfe   : > { %3923 = vmatprep.mubr.msk.bf16.mxu1 %vm337_vm4, %v4833_v16 }
  0xff   : > { %4072 = vmatmul.mubr.msk.bf16.gmra.mrb[12].mxu0 %vm337_vm4, %v4763_v19 }
 0x100   : > { %4075 = vmatprep.mubr.msk.bf16.mxu0 %vm337_vm4, %v4767_v21 }
 0x105   : > { %3924 = vmatmul.mubr.msk.bf16.vlgmr.msra.gmra.mrb[0].mxu1 %vm337_vm4, %v4839_v23 }
 0x106   : > { %4126 = vmatpush3.bf16.msra.mxu1 %v4623_v4  ;;  %3927 = vmatprep.mubr.msk.bf16.mxu1 %vm337_vm4, %v4858_v39  ;;  %v2393_v4 = vld [vmem:[#allocation2 + $0x181] sm:$0xff] }
 0x107   : > { %4076 = vmatmul.mubr.msk.bf16.gmra.mrb[16].mxu0 %vm337_vm4, %v4788_v33  ;;  %v2411_v41 = vpack.c.bf16 %v2394_v38, %v2393_v4 }
 0x108   : > { %4079 = vmatprep.mubr.msk.bf16.mxu0 %vm337_vm4, %v4792_v35 }
 0x10d   : > { %3928 = vmatmul.mubr.msk.bf16.gmra.mrb[4].mxu1 %vm337_vm4, %v4862_v42 }
 0x10e   : > { %3931 = vmatprep.mubr.msk.bf16.mxu1 %vm337_vm4, %v4874_v58 }
 0x10f   : > { %4080 = vmatmul.mubr.msk.bf16.gmra.mrb[20].mxu0 %vm337_vm4, %v4804_v47 }
 0x110   : > { %4083 = vmatprep.mubr.msk.bf16.mxu0 %vm337_vm4, %v4808_v51 }
 0x115   : > { %3932 = vmatmul.mubr.msk.bf16.gmra.mrb[8].mxu1 %vm337_vm4, %v4878_v60 }
 0x116   : > { %3935 = vmatprep.mubr.msk.bf16.mxu1 %vm337_vm4, %v4890_v14 }
 0x117   : > { %4084 = vmatmul.mubr.msk.bf16.gmra.mrb[24].mxu0 %vm337_vm4, %v4820_v61 }
 0x118   : > { %4087 = vmatprep.mubr.msk.bf16.mxu0 %vm337_vm4, %v2411_v41 }
 0x11d   : > { %3936 = vmatmul.mubr.msk.bf16.gmra.mrb[12].mxu1 %vm337_vm4, %v4894_v18 }
 0x11e   : > { %3939 = vmatprep.mubr.msk.bf16.mxu1 %vm337_vm4, %v4904_v30 }
 0x11f   : > { %4088 = vmatmul.mubr.msk.bf16.gmra.mrb[28].mxu0 %vm337_vm4, %v2412_v62 }
 0x120   : > { %4093 = vmatprep.mubr.msk.bf16.mxu0 %vm337_vm4, %v4765_v20 }
 0x125   : > { %3940 = vmatmul.mubr.msk.bf16.gmra.mrb[16].mxu1 %vm337_vm4, %v4906_v31 }
 0x126   : > { %3943 = vmatprep.mubr.msk.bf16.mxu1 %vm337_vm4, %v4922_v53 }
 0x127   : > { %4094 = vmatmul.mubr.msk.bf16.vlgmr.msra.gmra.mrb[0].mxu0 %vm337_vm4, %v4769_v22 }
 0x128   : > { %4097 = vmatprep.mubr.msk.bf16.mxu0 %vm337_vm4, %v4790_v34 }
 0x12d   : > { %3944 = vmatmul.mubr.msk.bf16.gmra.mrb[20].mxu1 %vm337_vm4, %v4924_v54 }
 0x12e   : > { %3947 = vmatprep.mubr.msk.bf16.mxu1 %vm337_vm4, %v4934_v9 }
 0x12f   : > { %4098 = vmatmul.mubr.msk.bf16.gmra.mrb[4].mxu0 %vm337_vm4, %v4794_v36 }
 0x130   : > { %4101 = vmatprep.mubr.msk.bf16.mxu0 %vm337_vm4, %v4806_v50 }
 0x135   : > { %3948 = vmatmul.mubr.msk.bf16.gmra.mrb[24].mxu1 %vm337_vm4, %v4936_v10 }
 0x136   : > { %3951 = vmatprep.mubr.msk.bf16.mxu1 %vm337_vm4, %v4946_v28 }
 0x137   : > { %4102 = vmatmul.mubr.msk.bf16.gmra.mrb[8].mxu0 %vm337_vm4, %v4810_v52 }
 0x138   : > { %4105 = vmatprep.mubr.msk.bf16.mxu0 %vm337_vm4, %v4822_v1 }
 0x13d   : > { %3952 = vmatmul.mubr.msk.bf16.gmra.mrb[28].mxu1 %vm337_vm4, %v4975_v32 }
 0x13e   : > { %3973 = vmatprep.mubr.msk.bf16.mxu1 %vm337_vm4, %v4763_v19  ;;  %v2706_v19 = vpack.c.bf16 %v2690_v7, %v2689_v0 }
 0x13f   : > { %4106 = vmatmul.mubr.msk.bf16.gmra.mrb[12].mxu0 %vm337_vm4, %v4824_v5 }
 0x140   : > { %4109 = vmatprep.mubr.msk.bf16.mxu0 %vm337_vm4, %v4835_v17 }
 0x145   : > { %3974 = vmatmul.mubr.msk.bf16.vlgmr.msra.gmra.mrb[16].mxu1 %vm337_vm4, %v4767_v21 }
 0x146   : > { %3977 = vmatprep.mubr.msk.bf16.mxu1 %vm337_vm4, %v4788_v33 }
 0x147   : > { %4110 = vmatmul.mubr.msk.bf16.gmra.mrb[16].mxu0 %vm337_vm4, %v4841_v25 }
 0x148   : > { %4113 = vmatprep.mubr.msk.bf16.mxu0 %vm337_vm4, %v4860_v40 }
 0x14d   : > { %3978 = vmatmul.mubr.msk.bf16.gmra.mrb[20].mxu1 %vm337_vm4, %v4792_v35 }
 0x14e   : > { %3981 = vmatprep.mubr.msk.bf16.mxu1 %vm337_vm4, %v4804_v47 }
 0x14f   : > { %4114 = vmatmul.mubr.msk.bf16.gmra.mrb[20].mxu0 %vm337_vm4, %v4864_v43 }
 0x150   : > { %4117 = vmatprep.mubr.msk.bf16.mxu0 %vm337_vm4, %v4876_v59 }
 0x155   : > { %3982 = vmatmul.mubr.msk.bf16.gmra.mrb[24].mxu1 %vm337_vm4, %v4808_v51 }
 0x156   : > { %3985 = vmatprep.mubr.msk.bf16.mxu1 %vm337_vm4, %v4820_v61 }
 0x157   : > { %4118 = vmatmul.mubr.msk.bf16.gmra.mrb[24].mxu0 %vm337_vm4, %v4880_v3 }
 0x158   : > { %4121 = vmatprep.mubr.msk.bf16.mxu0 %vm337_vm4, %v4892_v15 }
 0x15d   : > { %3986 = vmatmul.mubr.msk.bf16.gmra.mrb[28].mxu1 %vm337_vm4, %v2411_v41 }
 0x15f   : > { %4122 = vmatmul.mubr.msk.bf16.gmra.mrb[28].mxu0 %vm337_vm4, %v2706_v19 }
 0x1d8   : > { %v3925_v20 = vpop.f32.mrb[0].mxu1 }
 0x1d9   : > { %v1323_v21 = vpop.f32.mrb[1].mxu1 }
 0x1da   : > { %v3926_v22 = vpop.f32.mrb[2].mxu1 }
 0x1db   : > { %v1326_v33 = vpop.f32.mrb[3].mxu1 }
 0x1e0   : > { %v3929_v34 = vpop.f32.mrb[4].mxu1 }
 0x1e1   : > { %v1339_v35 = vpop.f32.mrb[5].mxu1 }
 0x1e2   : > { %v3930_v36 = vpop.f32.mrb[6].mxu1 }
 0x1e3   : > { %v1342_v47 = vpop.f32.mrb[7].mxu1 }
 0x1e8   : > { %v5114_v50 = vpop.f32.mrb[8].mxu1 }
 0x1e9   : > { %v5116_v51 = vpop.f32.mrb[9].mxu1 }
 0x1ea   : > { %v5118_v52 = vpop.f32.mrb[10].mxu1 }
 0x1eb   : > { %v5120_v61 = vpop.f32.mrb[11].mxu1 }
 0x1f0   : > { %v5122_v1 = vpop.f32.mrb[12].mxu1 }
 0x1f1   : > { %v5124_v5 = vpop.f32.mrb[13].mxu1 }
 0x1f2   : > { %v5126_v16 = vpop.f32.mrb[14].mxu1 }
 0x1f3   : > { %v5128_v17 = vpop.f32.mrb[15].mxu1 }
 0x1fa   : > { %v4095_v23 = vpop.f32.mrb[0].mxu0 }
 0x1fb   : > { %v4127_v25 = vadd.f32 %v4095_v23, %v3925_v20  ;;  %v2794_v39 = vpop.f32.mrb[1].mxu0 }
 0x1fc   : > { %v4128_v40 = vadd.f32 %v2794_v39, %v1323_v21  ;;  %v4096_v42 = vpop.f32.mrb[2].mxu0 }
 0x1fd   : > { %2958 = vst.msk [vmem:[%s5131_s9 + $0x10] sm:$0xff] %vm2955_vm5, %v4127_v25  ;;  %v4129_v43 = vadd.f32 %v4096_v42, %v3926_v22  ;;  %v2797_v58 = vpop.f32.mrb[3].mxu0  ;;  %v3064_v3 = vmul.f32 %v4127_v25, %v4127_v25  ;;  %v2992_v37 = vsel %vm2955_vm5, %v4127_v25, 0.0 }
 0x1fe   : > { %2956 = vst.msk [vmem:[%s5131_s9] sm:$0xff] %vm2955_vm5, %v4128_v40  ;;  %v3062_v59 = vmul.f32 %v4128_v40, %v4128_v40  ;;  %v4130_v60 = vadd.f32 %v2797_v58, %v1326_v33  ;;  %v2989_v14 = vsel %vm2955_vm5, %v4128_v40, 0.0 }
 0x1ff   : > { %2959 = vst.msk [vmem:[%s5131_s9 + $0x18] sm:$0xff] %vm2955_vm5, %v4129_v43  ;;  %v3065_v30 = vmul.f32 %v4129_v43, %v4129_v43  ;;  %v3097_v9 = vsel %vm2955_vm5, %v3064_v3, 0.0  ;;  %v2994_v10 = vsel %vm2955_vm5, %v4129_v43, 0.0 }
 0x200   : > { %2957 = vst.msk [vmem:[%s5131_s9 + $0x8] sm:$0xff] %vm2955_vm5, %v4130_v60  ;;  %v2990_v15 = vsel %vm2955_vm5, %v4130_v60, 0.0  ;;  %v3063_v18 = vmul.f32 %v4130_v60, %v4130_v60  ;;  %v3094_v46 = vsel %vm2955_vm5, %v3062_v59, 0.0 }
 0x201   : > { %v2991_v31 = vadd.f32 %v2990_v15, %v2989_v14  ;;  %v3099_v13 = vsel %vm2955_vm5, %v3065_v30, 0.0 }
 0x202   : > { %v3095_v53 = vsel %vm2955_vm5, %v3063_v18, 0.0  ;;  %v4099_v54 = vpop.f32.mrb[4].mxu0 }
 0x203   : > { %v2993_v55 = vadd.f32 %v2992_v37, %v2991_v31  ;;  %v3096_v56 = vadd.f32 %v3095_v53, %v3094_v46  ;;  %v4131_v57 = vadd.f32 %v4099_v54, %v3929_v34  ;;  %v2810_v6 = vpop.f32.mrb[5].mxu0 }
 0x204   : > { %v4132_v11 = vadd.f32 %v2810_v6, %v1339_v35  ;;  %v4100_v12 = vpop.f32.mrb[6].mxu0 }
 0x205   : > { %v3098_v27 = vadd.f32 %v3097_v9, %v3096_v56  ;;  %2962 = vst.msk [vmem:[%s5131_s9 + $0x30] sm:$0xff] %vm2955_vm5, %v4131_v57  ;;  %v2995_v28 = vadd.f32 %v2994_v10, %v2993_v55  ;;  %v2813_v29 = vpop.f32.mrb[7].mxu0  ;;  %v4133_v26 = vadd.f32 %v4100_v12, %v3930_v36  ;;  %v3068_v4 = vmul.f32 %v4131_v57, %v4131_v57 }
 0x206   : > { %2960 = vst.msk [vmem:[%s5131_s9 + $0x20] sm:$0xff] %vm2955_vm5, %v4132_v11  ;;  %v2996_v63 = vsel %vm2955_vm5, %v4132_v11, 0.0  ;;  %v3066_v8 = vmul.f32 %v4132_v11, %v4132_v11  ;;  %v4134_v32 = vadd.f32 %v2813_v29, %v1342_v47  ;;  %v3000_v49 = vsel %vm2955_vm5, %v4131_v57, 0.0 }
 0x207   : > { %v2997_v2 = vadd.f32 %v2996_v63, %v2995_v28  ;;  %v3100_v44 = vadd.f32 %v3099_v13, %v3098_v27  ;;  %2963 = vst.msk [vmem:[%s5131_s9 + $0x38] sm:$0xff] %vm2955_vm5, %v4133_v26  ;;  %v3069_v0 = vmul.f32 %v4133_v26, %v4133_v26  ;;  %v3002_v22 = vsel %vm2955_vm5, %v4133_v26, 0.0 }
 0x208   : > { %v3101_v45 = vsel %vm2955_vm5, %v3066_v8, 0.0  ;;  %2961 = vst.msk [vmem:[%s5131_s9 + $0x28] sm:$0xff] %vm2955_vm5, %v4134_v32  ;;  %v2998_v24 = vsel %vm2955_vm5, %v4134_v32, 0.0  ;;  %v3067_v48 = vmul.f32 %v4134_v32, %v4134_v32  ;;  %v3105_v36 = vsel %vm2955_vm5, %v3068_v4, 0.0 }
 0x209   : > { %v3102_v38 = vadd.f32 %v3101_v45, %v3100_v44  ;;  %v2999_v41 = vadd.f32 %v2998_v24, %v2997_v2 }
 0x20a   : > { %v4103_v62 = vpop.f32.mrb[8].mxu0  ;;  %v3103_v19 = vsel %vm2955_vm5, %v3067_v48, 0.0 }
 0x20b   : > { %v3001_v7 = vadd.f32 %v3000_v49, %v2999_v41  ;;  %v4135_v20 = vadd.f32 %v4103_v62, %v5114_v50  ;;  %v2826_v21 = vpop.f32.mrb[9].mxu0  ;;  %v3104_v33 = vadd.f32 %v3103_v19, %v3102_v38 }
 0x20c   : > { %v4136_v34 = vadd.f32 %v2826_v21, %v5116_v51  ;;  %v4104_v35 = vpop.f32.mrb[10].mxu0  ;;  %v3107_v51 = vsel %vm2955_vm5, %v3069_v0, 0.0 }
 0x20d   : > { %2966 = vst.msk [vmem:[%s5131_s9 + $0x50] sm:$0xff] %vm2955_vm5, %v4135_v20  ;;  %v3003_v47 = vadd.f32 %v3002_v22, %v3001_v7  ;;  %v4137_v23 = vadd.f32 %v4104_v35, %v5118_v52  ;;  %v2829_v25 = vpop.f32.mrb[11].mxu0  ;;  %v3106_v39 = vadd.f32 %v3105_v36, %v3104_v33  ;;  %v3072_v3 = vmul.f32 %v4135_v20, %v4135_v20 }
 0x20e   : > { %2964 = vst.msk [vmem:[%s5131_s9 + $0x40] sm:$0xff] %vm2955_vm5, %v4136_v34  ;;  %v3004_v50 = vsel %vm2955_vm5, %v4136_v34, 0.0  ;;  %v3070_v40 = vmul.f32 %v4136_v34, %v4136_v34  ;;  %v4138_v42 = vadd.f32 %v2829_v25, %v5120_v61  ;;  %v3008_v15 = vsel %vm2955_vm5, %v4135_v20, 0.0 }
 0x20f   : > { %v3005_v43 = vadd.f32 %v3004_v50, %v3003_v47  ;;  %2967 = vst.msk [vmem:[%s5131_s9 + $0x58] sm:$0xff] %vm2955_vm5, %v4137_v23  ;;  %v3108_v58 = vadd.f32 %v3107_v51, %v3106_v39  ;;  %v3073_v31 = vmul.f32 %v4137_v23, %v4137_v23  ;;  %v3010_v54 = vsel %vm2955_vm5, %v4137_v23, 0.0 }
 0x210   : > { %v3109_v59 = vsel %vm2955_vm5, %v3070_v40, 0.0  ;;  %2965 = vst.msk [vmem:[%s5131_s9 + $0x48] sm:$0xff] %vm2955_vm5, %v4138_v42  ;;  %v3006_v52 = vsel %vm2955_vm5, %v4138_v42, 0.0  ;;  %v3071_v60 = vmul.f32 %v4138_v42, %v4138_v42  ;;  %v3113_v6 = vsel %vm2955_vm5, %v3072_v3, 0.0 }
 0x211   : > { %v3007_v14 = vadd.f32 %v3006_v52, %v3005_v43  ;;  %v3110_v18 = vadd.f32 %v3109_v59, %v3108_v58 }
 0x212   : > { %v3111_v61 = vsel %vm2955_vm5, %v3071_v60, 0.0  ;;  %v4107_v30 = vpop.f32.mrb[12].mxu0 }
 0x213   : > { %v3009_v37 = vadd.f32 %v3008_v15, %v3007_v14  ;;  %v4139_v46 = vadd.f32 %v4107_v30, %v5122_v1  ;;  %v2842_v53 = vpop.f32.mrb[13].mxu0  ;;  %v3112_v55 = vadd.f32 %v3111_v61, %v3110_v18 }
 0x214   : > { %v4140_v56 = vadd.f32 %v2842_v53, %v5124_v5  ;;  %v4108_v57 = vpop.f32.mrb[14].mxu0  ;;  %v3115_v5 = vsel %vm2955_vm5, %v3073_v31, 0.0 }
 0x215   : > { %2970 = vst.msk [vmem:[%s5131_s9 + $0x70] sm:$0xff] %vm2955_vm5, %v4139_v46  ;;  %v3011_v9 = vadd.f32 %v3010_v54, %v3009_v37  ;;  %v4141_v10 = vadd.f32 %v4108_v57, %v5126_v16  ;;  %v2845_v11 = vpop.f32.mrb[15].mxu0  ;;  %v3114_v12 = vadd.f32 %v3113_v6, %v3112_v55  ;;  %v3076_v26 = vmul.f32 %v4139_v46, %v4139_v46 }
 0x216   : > { %2968 = vst.msk [vmem:[%s5131_s9 + $0x60] sm:$0xff] %vm2955_vm5, %v4140_v56  ;;  %v3012_v1 = vsel %vm2955_vm5, %v4140_v56, 0.0  ;;  %v3074_v13 = vmul.f32 %v4140_v56, %v4140_v56  ;;  %v4142_v27 = vadd.f32 %v2845_v11, %v5128_v17  ;;  %v3016_v44 = vsel %vm2955_vm5, %v4139_v46, 0.0 }
 0x217   : > { %v3013_v28 = vadd.f32 %v3012_v1, %v3011_v9  ;;  %2971 = vst.msk [vmem:[%s5131_s9 + $0x78] sm:$0xff] %vm2955_vm5, %v4141_v10  ;;  %v3116_v29 = vadd.f32 %v3115_v5, %v3114_v12  ;;  %v3077_v38 = vmul.f32 %v4141_v10, %v4141_v10  ;;  %v3018_v0 = vsel %vm2955_vm5, %v4141_v10, 0.0 }
 0x218   : > { %v3117_v63 = vsel %vm2955_vm5, %v3074_v13, 0.0  ;;  %2969 = vst.msk [vmem:[%s5131_s9 + $0x68] sm:$0xff] %vm2955_vm5, %v4142_v27  ;;  %v3014_v16 = vsel %vm2955_vm5, %v4142_v27, 0.0  ;;  %v3075_v8 = vmul.f32 %v4142_v27, %v4142_v27  ;;  %v3975_v2 = vpop.f32.mrb[16].mxu1  ;;  %v3121_v22 = vsel %vm2955_vm5, %v3076_v26, 0.0 }
 0x219   : > { %v3015_v32 = vadd.f32 %v3014_v16, %v3013_v28  ;;  %v3118_v17 = vadd.f32 %v3117_v63, %v3116_v29  ;;  %v1681_v24 = vpop.f32.mrb[17].mxu1  ;;  %v3123_v39 = vsel %vm2955_vm5, %v3077_v38, 0.0 }
 0x21a   : > { %v3119_v45 = vsel %vm2955_vm5, %v3075_v8, 0.0  ;;  %v4111_v4 = vpop.f32.mrb[16].mxu0  ;;  %v3976_v49 = vpop.f32.mrb[18].mxu1 }
 0x21b   : > { %v3017_v41 = vadd.f32 %v3016_v44, %v3015_v32  ;;  %v4143_v48 = vadd.f32 %v4111_v4, %v3975_v2  ;;  %v2858_v62 = vpop.f32.mrb[17].mxu0  ;;  %v3120_v7 = vadd.f32 %v3119_v45, %v3118_v17  ;;  %v1684_v20 = vpop.f32.mrb[19].mxu1 }
 0x21c   : > { %v4144_v19 = vadd.f32 %v2858_v62, %v1681_v24  ;;  %v4112_v21 = vpop.f32.mrb[18].mxu0 }
 0x21d   : > { %2974 = vst.msk [vmem:[%s5131_s9 + $0x90] sm:$0xff] %vm2955_vm5, %v4143_v48  ;;  %v3019_v33 = vadd.f32 %v3018_v0, %v3017_v41  ;;  %v4145_v34 = vadd.f32 %v4112_v21, %v3976_v49  ;;  %v2861_v35 = vpop.f32.mrb[19].mxu0  ;;  %v3122_v36 = vadd.f32 %v3121_v22, %v3120_v7  ;;  %v3080_v58 = vmul.f32 %v4143_v48, %v4143_v48 }
 0x21e   : > { %2972 = vst.msk [vmem:[%s5131_s9 + $0x80] sm:$0xff] %vm2955_vm5, %v4144_v19  ;;  %v3020_v47 = vsel %vm2955_vm5, %v4144_v19, 0.0  ;;  %v3078_v23 = vmul.f32 %v4144_v19, %v4144_v19  ;;  %v4146_v25 = vadd.f32 %v2861_v35, %v1684_v20  ;;  %v3024_v60 = vsel %vm2955_vm5, %v4143_v48, 0.0 }
 0x21f   : > { %v3021_v50 = vadd.f32 %v3020_v47, %v3019_v33  ;;  %2975 = vst.msk [vmem:[%s5131_s9 + $0x98] sm:$0xff] %vm2955_vm5, %v4145_v34  ;;  %v3124_v40 = vadd.f32 %v3123_v39, %v3122_v36  ;;  %v3081_v61 = vmul.f32 %v4145_v34, %v4145_v34  ;;  %v3026_v53 = vsel %vm2955_vm5, %v4145_v34, 0.0 }
 0x220   : > { %v3125_v42 = vsel %vm2955_vm5, %v3078_v23, 0.0  ;;  %2973 = vst.msk [vmem:[%s5131_s9 + $0x88] sm:$0xff] %vm2955_vm5, %v4146_v25  ;;  %v3022_v51 = vsel %vm2955_vm5, %v4146_v25, 0.0  ;;  %v3079_v43 = vmul.f32 %v4146_v25, %v4146_v25  ;;  %v3979_v52 = vpop.f32.mrb[20].mxu1  ;;  %v3129_v6 = vsel %vm2955_vm5, %v3080_v58, 0.0 }
 0x221   : > { %v3023_v59 = vadd.f32 %v3022_v51, %v3021_v50  ;;  %v3126_v3 = vadd.f32 %v3125_v42, %v3124_v40  ;;  %v1697_v15 = vpop.f32.mrb[21].mxu1  ;;  %v3131_v5 = vsel %vm2955_vm5, %v3081_v61, 0.0 }
 0x222   : > { %v3127_v14 = vsel %vm2955_vm5, %v3079_v43, 0.0  ;;  %v4115_v18 = vpop.f32.mrb[20].mxu0  ;;  %v3980_v37 = vpop.f32.mrb[22].mxu1 }
 0x223   : > { %v3025_v30 = vadd.f32 %v3024_v60, %v3023_v59  ;;  %v4147_v31 = vadd.f32 %v4115_v18, %v3979_v52  ;;  %v2874_v46 = vpop.f32.mrb[21].mxu0  ;;  %v3128_v54 = vadd.f32 %v3127_v14, %v3126_v3  ;;  %v1700_v56 = vpop.f32.mrb[23].mxu1 }
 0x224   : > { %v4148_v55 = vadd.f32 %v2874_v46, %v1697_v15  ;;  %v4116_v57 = vpop.f32.mrb[22].mxu0 }
 0x225   : > { %2978 = vst.msk [vmem:[%s5131_s9 + $0xb0] sm:$0xff] %vm2955_vm5, %v4147_v31  ;;  %v3027_v9 = vadd.f32 %v3026_v53, %v3025_v30  ;;  %v4149_v10 = vadd.f32 %v4116_v57, %v3980_v37  ;;  %v2877_v11 = vpop.f32.mrb[23].mxu0  ;;  %v3130_v12 = vadd.f32 %v3129_v6, %v3128_v54  ;;  %v3084_v26 = vmul.f32 %v4147_v31, %v4147_v31 }
 0x226   : > { %2976 = vst.msk [vmem:[%s5131_s9 + $0xa0] sm:$0xff] %vm2955_vm5, %v4148_v55  ;;  %v3028_v1 = vsel %vm2955_vm5, %v4148_v55, 0.0  ;;  %v3082_v13 = vmul.f32 %v4148_v55, %v4148_v55  ;;  %v4150_v27 = vadd.f32 %v2877_v11, %v1700_v56  ;;  %v3032_v44 = vsel %vm2955_vm5, %v4147_v31, 0.0 }
 0x227   : > { %v3029_v28 = vadd.f32 %v3028_v1, %v3027_v9  ;;  %2979 = vst.msk [vmem:[%s5131_s9 + $0xb8] sm:$0xff] %vm2955_vm5, %v4149_v10  ;;  %v3132_v29 = vadd.f32 %v3131_v5, %v3130_v12  ;;  %v3085_v38 = vmul.f32 %v4149_v10, %v4149_v10  ;;  %v3034_v0 = vsel %vm2955_vm5, %v4149_v10, 0.0 }
 0x228   : > { %v3133_v63 = vsel %vm2955_vm5, %v3082_v13, 0.0  ;;  %2977 = vst.msk [vmem:[%s5131_s9 + $0xa8] sm:$0xff] %vm2955_vm5, %v4150_v27  ;;  %v3030_v16 = vsel %vm2955_vm5, %v4150_v27, 0.0  ;;  %v3083_v8 = vmul.f32 %v4150_v27, %v4150_v27  ;;  %v3983_v2 = vpop.f32.mrb[24].mxu1  ;;  %v3137_v22 = vsel %vm2955_vm5, %v3084_v26, 0.0 }
 0x229   : > { %v3031_v32 = vadd.f32 %v3030_v16, %v3029_v28  ;;  %v3134_v17 = vadd.f32 %v3133_v63, %v3132_v29  ;;  %v1713_v24 = vpop.f32.mrb[25].mxu1  ;;  %v3139_v39 = vsel %vm2955_vm5, %v3085_v38, 0.0 }
 0x22a   : > { %v3135_v45 = vsel %vm2955_vm5, %v3083_v8, 0.0  ;;  %v4119_v4 = vpop.f32.mrb[24].mxu0  ;;  %v3984_v49 = vpop.f32.mrb[26].mxu1 }
 0x22b   : > { %v3033_v41 = vadd.f32 %v3032_v44, %v3031_v32  ;;  %v4151_v48 = vadd.f32 %v4119_v4, %v3983_v2  ;;  %v2890_v62 = vpop.f32.mrb[25].mxu0  ;;  %v3136_v7 = vadd.f32 %v3135_v45, %v3134_v17  ;;  %v1716_v20 = vpop.f32.mrb[27].mxu1 }
 0x22c   : > { %v4152_v19 = vadd.f32 %v2890_v62, %v1713_v24  ;;  %v4120_v21 = vpop.f32.mrb[26].mxu0 }
 0x22d   : > { %2982 = vst.msk [vmem:[%s5131_s9 + $0xd0] sm:$0xff] %vm2955_vm5, %v4151_v48  ;;  %v3035_v33 = vadd.f32 %v3034_v0, %v3033_v41  ;;  %v4153_v34 = vadd.f32 %v4120_v21, %v3984_v49  ;;  %v2893_v35 = vpop.f32.mrb[27].mxu0  ;;  %v3138_v36 = vadd.f32 %v3137_v22, %v3136_v7  ;;  %v3088_v58 = vmul.f32 %v4151_v48, %v4151_v48 }
 0x22e   : > { %2980 = vst.msk [vmem:[%s5131_s9 + $0xc0] sm:$0xff] %vm2955_vm5, %v4152_v19  ;;  %v3036_v47 = vsel %vm2955_vm5, %v4152_v19, 0.0  ;;  %v3086_v23 = vmul.f32 %v4152_v19, %v4152_v19  ;;  %v4154_v25 = vadd.f32 %v2893_v35, %v1716_v20  ;;  %v3040_v60 = vsel %vm2955_vm5, %v4151_v48, 0.0 }
 0x22f   : > { %v3037_v50 = vadd.f32 %v3036_v47, %v3035_v33  ;;  %2983 = vst.msk [vmem:[%s5131_s9 + $0xd8] sm:$0xff] %vm2955_vm5, %v4153_v34  ;;  %v3140_v40 = vadd.f32 %v3139_v39, %v3138_v36  ;;  %v3089_v61 = vmul.f32 %v4153_v34, %v4153_v34  ;;  %v3042_v53 = vsel %vm2955_vm5, %v4153_v34, 0.0  ;;  %v2988_v36 = vld [vmem:[#allocation4] sm:$0x1] }
 0x230   : > { %v3141_v42 = vsel %vm2955_vm5, %v3086_v23, 0.0  ;;  %2981 = vst.msk [vmem:[%s5131_s9 + $0xc8] sm:$0xff] %vm2955_vm5, %v4154_v25  ;;  %v3038_v51 = vsel %vm2955_vm5, %v4154_v25, 0.0  ;;  %v3087_v43 = vmul.f32 %v4154_v25, %v4154_v25  ;;  %v3987_v52 = vpop.f32.mrb[28].mxu1  ;;  %v3145_v6 = vsel %vm2955_vm5, %v3088_v58, 0.0 }
 0x231   : > { %v3039_v59 = vadd.f32 %v3038_v51, %v3037_v50  ;;  %v3142_v3 = vadd.f32 %v3141_v42, %v3140_v40  ;;  %v1729_v15 = vpop.f32.mrb[29].mxu1  ;;  %v3147_v28 = vsel %vm2955_vm5, %v3089_v61, 0.0  ;;  %v3061_v50 = vld [vmem:[#allocation5] sm:$0x1] }
 0x232   : > { %v3143_v14 = vsel %vm2955_vm5, %v3087_v43, 0.0  ;;  %v4123_v18 = vpop.f32.mrb[28].mxu0  ;;  %v3988_v37 = vpop.f32.mrb[30].mxu1 }
 0x233   : > { %v3041_v30 = vadd.f32 %v3040_v60, %v3039_v59  ;;  %v4155_v31 = vadd.f32 %v4123_v18, %v3987_v52  ;;  %v2906_v46 = vpop.f32.mrb[29].mxu0  ;;  %v3144_v54 = vadd.f32 %v3143_v14, %v3142_v3  ;;  %v1732_v56 = vpop.f32.mrb[31].mxu1 }
 0x234   : > { %v4156_v55 = vadd.f32 %v2906_v46, %v1729_v15  ;;  %v4124_v57 = vpop.f32.mrb[30].mxu0 }
 0x235   : > { %2986 = vst.msk [vmem:[%s5131_s9 + $0xf0] sm:$0xff] %vm2955_vm5, %v4155_v31  ;;  %v3092_v9 = vmul.f32 %v4155_v31, %v4155_v31  ;;  %v3043_v10 = vadd.f32 %v3042_v53, %v3041_v30  ;;  %v4157_v11 = vadd.f32 %v4124_v57, %v3988_v37  ;;  %v2909_v12 = vpop.f32.mrb[31].mxu0  ;;  %v3146_v1 = vadd.f32 %v3145_v6, %v3144_v54 }
 0x236   : > { %2984 = vst.msk [vmem:[%s5131_s9 + $0xe0] sm:$0xff] %vm2955_vm5, %v4156_v55  ;;  %v3044_v13 = vsel %vm2955_vm5, %v4156_v55, 0.0  ;;  %v3090_v27 = vmul.f32 %v4156_v55, %v4156_v55  ;;  %v4158_v5 = vadd.f32 %v2909_v12, %v1732_v56  ;;  %v3048_v45 = vsel %vm2955_vm5, %v4155_v31, 0.0 }
 0x237   : > { %v3153_v29 = vsel %vm2955_vm5, %v3092_v9, 0.0  ;;  %v3045_v63 = vadd.f32 %v3044_v13, %v3043_v10  ;;  %2987 = vst.msk [vmem:[%s5131_s9 + $0xf8] sm:$0xff] %vm2955_vm5, %v4157_v11  ;;  %v3093_v16 = vmul.f32 %v4157_v11, %v4157_v11  ;;  %v3148_v8 = vadd.f32 %v3147_v28, %v3146_v1 }
 0x238   : > { %v3149_v26 = vsel %vm2955_vm5, %v3090_v27, 0.0  ;;  %2985 = vst.msk [vmem:[%s5131_s9 + $0xe8] sm:$0xff] %vm2955_vm5, %v4158_v5  ;;  %v3046_v32 = vsel %vm2955_vm5, %v4158_v5, 0.0  ;;  %v3091_v2 = vmul.f32 %v4158_v5, %v4158_v5  ;;  %v3050_v41 = vsel %vm2955_vm5, %v4157_v11, 0.0 }
 0x239   : > { %v3155_v44 = vsel %vm2955_vm5, %v3093_v16, 0.0  ;;  %v3047_v17 = vadd.f32 %v3046_v32, %v3045_v63  ;;  %v3150_v24 = vadd.f32 %v3149_v26, %v3148_v8 }
 0x23a   : > { %v3151_v4 = vsel %vm2955_vm5, %v3091_v2, 0.0 }
 0x23b   : > { %v3049_v38 = vadd.f32 %v3048_v45, %v3047_v17  ;;  %v3152_v48 = vadd.f32 %v3151_v4, %v3150_v24 }
 0x23d   : > { %v3051_v49 = vadd.f32 %v3050_v41, %v3049_v38  ;;  %v3154_v62 = vadd.f32 %v3153_v29, %v3152_v48 }
 0x23f   : > { %v3052_v0 = vrot.slane %v3051_v49, 4  ;;  %v3156_v7 = vadd.f32 %v3155_v44, %v3154_v62 }
 0x241   : > { %v3053_v19 = vadd.f32 %v3052_v0, %v3051_v49  ;;  %v3157_v20 = vrot.slane %v3156_v7, 4 }
 0x243   : > { %v3054_v21 = vrot.slane %v3053_v19, 2  ;;  %v3158_v22 = vadd.f32 %v3157_v20, %v3156_v7 }
 0x245   : > { %v3055_v33 = vadd.f32 %v3054_v21, %v3053_v19  ;;  %v3159_v34 = vrot.slane %v3158_v22, 2 }
 0x247   : > { %v3056_v35 = vrot.slane %v3055_v33, 1  ;;  %v3160_v47 = vadd.f32 %v3159_v34, %v3158_v22 }
 0x249   : > { %v3057_v23 = vadd.f32 %v3056_v35, %v3055_v33  ;;  %v3161_v25 = vrot.slane %v3160_v47, 1 }
 0x24b   : > { %v3058_v39 = vadd.f32 %v3057_v23, %v2988_v36  ;;  %v3162_v40 = vadd.f32 %v3161_v25, %v3160_v47 }
 0x24d   : > { %3060 = vst.msk [vmem:[#allocation4] sm:$0x1] %vm3059_vm6, %v3058_v39  ;;  %v3163_v42 = vadd.f32 %v3162_v40, %v3061_v50 }
 0x24f   : > { %3164 = vst.msk [vmem:[#allocation5] sm:$0x1] %vm3059_vm6, %v3163_v42 }
 0x250 PF: > { %p3660_p9 = scmp.ne.s32.totalorder %s4462_s16, 1 }
 0x251   : > { %v3218_v15 = vlaneseq (!%p3660_p9)  ;;  %s3661_s10 = sshll.u32 (!%p3660_p9), %s4458_s15, 8  ;;  %v3176_v61 = vld [vmem:[%s5463_s2] sm:$0x1] (!%p3660_p9)  ;;  %vm3389_vm7 = vcmask (!%p3660_p9), 261120  }
 0x252   : > { %3168 = sbr.rel (%p3660_p9) target bundleno = 666 (0x29a), region = 48  ;;  %v3180_v46 = vld [vmem:[%s5464_s3] sm:$0x1] (!%p3660_p9)  ;;  %s5277_s14 = scalar_lea.vmem (!%p3660_p9), [#allocation3], %s3661_s10 }
 0x253   : > { %v3219_v18 = vshrl.u32 (!%p3660_p9), %v3218_v15, 7  ;;  %v3185_v53 = vld [vmem:[%s5277_s14] sm:$0xff] (!%p3660_p9)  ;;  %v3186_v54 = vld [vmem:[%s5277_s14 + $0x8] sm:$0xff] (!%p3660_p9)  ;;  %v3187_v55 = vld [vmem:[%s5277_s14 + $0x10] sm:$0xff] (!%p3660_p9) }
 0x254   : > { %v3169_v51 = vld [vmem:[#allocation4] sm:$0x1] (!%p3660_p9)  ;;  %v3188_v56 = vld [vmem:[%s5277_s14 + $0x18] sm:$0xff] (!%p3660_p9)  ;;  %v3189_v57 = vld [vmem:[%s5277_s14 + $0x20] sm:$0xff] (!%p3660_p9) }
 0x255   : > { %v3170_v58 = vmul.f32 (!%p3660_p9), 0.001953125, %v3169_v51  ;;  %v3220_v30 = vsub.s32 (!%p3660_p9), 0, %v3219_v18  ;;  %v3190_v10 = vld [vmem:[%s5277_s14 + $0x28] sm:$0xff] (!%p3660_p9)  ;;  %v3191_v11 = vld [vmem:[%s5277_s14 + $0x30] sm:$0xff] (!%p3660_p9)  ;;  %v3192_v12 = vld [vmem:[%s5277_s14 + $0x38] sm:$0xff] (!%p3660_p9) }
 0x256   : > { %v3171_v43 = vld [vmem:[#allocation5] sm:$0x1] (!%p3660_p9)  ;;  %v3193_v1 = vld [vmem:[%s5277_s14 + $0x40] sm:$0xff] (!%p3660_p9)  ;;  %v3194_v13 = vld [vmem:[%s5277_s14 + $0x48] sm:$0xff] (!%p3660_p9) }
 0x257   : > { %v3172_v59 = vmul.f32 (!%p3660_p9), 0.001953125, %v3171_v43  ;;  %v3173_v52 = vmul.f32 (!%p3660_p9), %v3170_v58, %v3170_v58  ;;  %v3195_v27 = vld [vmem:[%s5277_s14 + $0x50] sm:$0xff] (!%p3660_p9)  ;;  %v3196_v16 = vld [vmem:[%s5277_s14 + $0x58] sm:$0xff] (!%p3660_p9)  ;;  %v3197_v8 = vld [vmem:[%s5277_s14 + $0x60] sm:$0xff] (!%p3660_p9) }
 0x258   : > { %v3198_v26 = vld [vmem:[%s5277_s14 + $0x68] sm:$0xff] (!%p3660_p9) }
 0x259   : > { %v3174_v60 = vsub.f32 %v3172_v59, %v3173_v52 }
 0x25b   : > { %v3175_v3 = vmax.f32 %v3174_v60, 0.0 }
 0x25d   : > { %v3177_v14 = vadd.f32 1e-05, %v3175_v3 }
 0x25f   : > { %4434 = vrsqrt.f32 %v3177_v14 }
 0x269   : > { %v4435_v31 = vpop.eup %4434 }
 0x26a   : > { %v3179_v37 = vmul.f32 %v4435_v31, %v3176_v61 }
 0x26c   : > { %v3181_v6 = vmul.f32 %v3179_v37, %v3170_v58  ;;  %v5284_v9 = vrot.slane %v3179_v37, %v3220_v30 }
 0x26e   : > { %v3182_v5 = vsub.f32 %v3180_v46, %v3181_v6  ;;  %v3223_v28 = vmul.f32 %v5284_v9, %v3185_v53  ;;  %v3224_v29 = vmul.f32 %v5284_v9, %v3186_v54  ;;  %v3225_v63 = vmul.f32 %v5284_v9, %v3187_v55  ;;  %v3200_v46 = vld [vmem:[%s5277_s14 + $0x78] sm:$0xff]  ;;  %v3201_v53 = vld [vmem:[%s5277_s14 + $0x80] sm:$0xff] }
 0x26f   : > { %v3226_v32 = vmul.f32 %v5284_v9, %v3188_v56  ;;  %v3227_v2 = vmul.f32 %v5284_v9, %v3189_v57  ;;  %v3228_v44 = vmul.f32 %v5284_v9, %v3190_v10  ;;  %v3229_v17 = vmul.f32 %v5284_v9, %v3191_v11  ;;  %v3202_v10 = vld [vmem:[%s5277_s14 + $0x88] sm:$0xff] }
 0x270   : > { %v5302_v45 = vrot.slane %v3182_v5, %v3220_v30  ;;  %v3230_v24 = vmul.f32 %v5284_v9, %v3192_v12  ;;  %v3231_v4 = vmul.f32 %v5284_v9, %v3193_v1  ;;  %v3232_v38 = vmul.f32 %v5284_v9, %v3194_v13  ;;  %v3199_v30 = vld [vmem:[%s5277_s14 + $0x70] sm:$0xff]  ;;  %v3204_v5 = vld [vmem:[%s5277_s14 + $0x98] sm:$0xff] }
 0x271   : > { %v3233_v41 = vmul.f32 %v5284_v9, %v3195_v27  ;;  %v3234_v48 = vmul.f32 %v5284_v9, %v3196_v16  ;;  %v3235_v49 = vmul.f32 %v5284_v9, %v3197_v8  ;;  %v5311_v62 = vmul.f32 %v5284_v9, %v3198_v26  ;;  %v3203_v27 = vld [vmem:[%s5277_s14 + $0x90] sm:$0xff] }
 0x272   : > { %v3261_v0 = vadd.f32 %v5302_v45, %v3223_v28  ;;  %v3262_v7 = vadd.f32 %v5302_v45, %v3224_v29  ;;  %v3263_v19 = vadd.f32 %v5302_v45, %v3225_v63  ;;  %v3264_v20 = vadd.f32 %v5302_v45, %v3226_v32 }
 0x273   : > { %v3265_v21 = vadd.f32 %v5302_v45, %v3227_v2  ;;  %v3266_v22 = vadd.f32 %v5302_v45, %v3228_v44  ;;  %v3267_v33 = vadd.f32 %v5302_v45, %v3229_v17  ;;  %v3268_v34 = vadd.f32 %v5302_v45, %v3230_v24 }
 0x274   : > { %vm3293_vm8 = vcmp.gt.f32.partialorder %v3261_v0, 0.0  ;;  %v3325_v35 = vmul.f32 0.1, %v3261_v0  ;;  %vm3294_vm9 = vcmp.gt.f32.partialorder %v3262_v7, 0.0  ;;  %v3326_v36 = vmul.f32 0.1, %v3262_v7 }
 0x275   : > { %vm3295_vm10 = vcmp.gt.f32.partialorder %v3263_v19, 0.0  ;;  %v3327_v47 = vmul.f32 0.1, %v3263_v19  ;;  %vm3296_vm11 = vcmp.gt.f32.partialorder %v3264_v20, 0.0  ;;  %v3328_v23 = vmul.f32 0.1, %v3264_v20 }
 0x276   : > { %v3357_v25 = vsel %vm3293_vm8, %v3261_v0, %v3325_v35  ;;  %v3358_v39 = vsel %vm3294_vm9, %v3262_v7, %v3326_v36  ;;  %vm3297_vm12 = vcmp.gt.f32.partialorder %v3265_v21, 0.0  ;;  %v3329_v50 = vmul.f32 0.1, %v3265_v21  ;;  %v3208_v36 = vld [vmem:[%s5277_s14 + $0xb8] sm:$0xff] }
 0x277   : > { %3390 = vst.msk [vmem:[%s4544_s30] sm:$0xff] %vm3389_vm7, %v3357_v25  ;;  %3391 = vst.msk [vmem:[%s4544_s30 + $0x8] sm:$0xff] %vm3389_vm7, %v3358_v39  ;;  %v3359_v40 = vsel %vm3295_vm10, %v3263_v19, %v3327_v47  ;;  %v3360_v42 = vsel %vm3296_vm11, %v3264_v20, %v3328_v23  ;;  %vm3298_vm13 = vcmp.gt.f32.partialorder %v3266_v22, 0.0  ;;  %v3330_v51 = vmul.f32 0.1, %v3266_v22  ;;  %v3209_v47 = vld [vmem:[%s5277_s14 + $0xc0] sm:$0xff] }
 0x278   : > { %3392 = vst.msk [vmem:[%s4544_s30 + $0x10] sm:$0xff] %vm3389_vm7, %v3359_v40  ;;  %3393 = vst.msk [vmem:[%s4544_s30 + $0x18] sm:$0xff] %vm3389_vm7, %v3360_v42  ;;  %v3361_v43 = vsel %vm3297_vm12, %v3265_v21, %v3329_v50  ;;  %vm3299_vm14 = vcmp.gt.f32.partialorder %v3267_v33, 0.0  ;;  %v3331_v58 = vmul.f32 0.1, %v3267_v33  ;;  %vm3300_vm15 = vcmp.gt.f32.partialorder %v3268_v34, 0.0 }
 0x279   : > { %3394 = vst.msk [vmem:[%s4544_s30 + $0x20] sm:$0xff] %vm3389_vm7, %v3361_v43  ;;  %v3362_v59 = vsel %vm3298_vm13, %v3266_v22, %v3330_v51  ;;  %v3332_v52 = vmul.f32 0.1, %v3268_v34  ;;  %v3269_v60 = vadd.f32 %v5302_v45, %v3231_v4  ;;  %v3270_v3 = vadd.f32 %v5302_v45, %v3232_v38  ;;  %v3207_v21 = vld [vmem:[%s5277_s14 + $0xb0] sm:$0xff] }
 0x27a   : > { %3395 = vst.msk [vmem:[%s4544_s30 + $0x28] sm:$0xff] %vm3389_vm7, %v3362_v59  ;;  %v3363_v14 = vsel %vm3299_vm14, %v3267_v33, %v3331_v58  ;;  %v3271_v15 = vadd.f32 %v5302_v45, %v3233_v41  ;;  %v3272_v18 = vadd.f32 %v5302_v45, %v3234_v48  ;;  %v3273_v61 = vadd.f32 %v5302_v45, %v3235_v49  ;;  %v3205_v48 = vld [vmem:[%s5277_s14 + $0xa0] sm:$0xff]  ;;  %v3206_v49 = vld [vmem:[%s5277_s14 + $0xa8] sm:$0xff] }
 0x27b   : > { %3396 = vst.msk [vmem:[%s4544_s30 + $0x30] sm:$0xff] %vm3389_vm7, %v3363_v14  ;;  %v3364_v31 = vsel %vm3300_vm15, %v3268_v34, %v3332_v52  ;;  %vm3301_vm0 = vcmp.gt.f32.partialorder %v3269_v60, 0.0  ;;  %v3333_v37 = vmul.f32 0.1, %v3269_v60  ;;  %vm3302_vm1 = vcmp.gt.f32.partialorder %v3270_v3, 0.0  ;;  %v3210_v52 = vld [vmem:[%s5277_s14 + $0xc8] sm:$0xff] }
 0x27c   : > { %3397 = vst.msk [vmem:[%s4544_s30 + $0x38] sm:$0xff] %vm3389_vm7, %v3364_v31  ;;  %v3334_v54 = vmul.f32 0.1, %v3270_v3  ;;  %vm3303_vm2 = vcmp.gt.f32.partialorder %v3271_v15, 0.0  ;;  %v3335_v55 = vmul.f32 0.1, %v3271_v15  ;;  %v3274_v1 = vadd.f32 %v5302_v45, %v5311_v62 }
 0x27d   : > { %vm3304_vm3 = vcmp.gt.f32.partialorder %v3272_v18, 0.0  ;;  %v3365_v56 = vsel %vm3301_vm0, %v3269_v60, %v3333_v37  ;;  %v3336_v57 = vmul.f32 0.1, %v3272_v18  ;;  %vm3305_vm4 = vcmp.gt.f32.partialorder %v3273_v61, 0.0 }
 0x27e   : > { %v3337_v6 = vmul.f32 0.1, %v3273_v61  ;;  %3398 = vst.msk [vmem:[%s4544_s30 + $0x40] sm:$0xff] %vm3389_vm7, %v3365_v56  ;;  %v3366_v11 = vsel %vm3302_vm1, %v3270_v3, %v3334_v54  ;;  %v3367_v12 = vsel %vm3303_vm2, %v3271_v15, %v3335_v55  ;;  %v3237_v13 = vmul.f32 %v5284_v9, %v3199_v30  ;;  %v3211_v30 = vld [vmem:[%s5277_s14 + $0xd0] sm:$0xff]  ;;  %v3213_v54 = vld [vmem:[%s5277_s14 + $0xe0] sm:$0xff]  ;;  %v3214_v55 = vld [vmem:[%s5277_s14 + $0xe8] sm:$0xff] }
 0x27f   : > { %3399 = vst.msk [vmem:[%s4544_s30 + $0x48] sm:$0xff] %vm3389_vm7, %v3366_v11  ;;  %3400 = vst.msk [vmem:[%s4544_s30 + $0x50] sm:$0xff] %vm3389_vm7, %v3367_v12  ;;  %v3368_v28 = vsel %vm3304_vm3, %v3272_v18, %v3336_v57  ;;  %v3238_v63 = vmul.f32 %v5284_v9, %v3200_v46  ;;  %v3239_v16 = vmul.f32 %v5284_v9, %v3201_v53  ;;  %vm3306_vm5 = vcmp.gt.f32.partialorder %v3274_v1, 0.0  ;;  %v3212_v53 = vld [vmem:[%s5277_s14 + $0xd8] sm:$0xff] }
 0x280   : > { %v3369_v29 = vsel %vm3305_vm4, %v3273_v61, %v3337_v6  ;;  %3401 = vst.msk [vmem:[%s4544_s30 + $0x58] sm:$0xff] %vm3389_vm7, %v3368_v28  ;;  %v3338_v8 = vmul.f32 0.1, %v3274_v1  ;;  %v3275_v26 = vadd.f32 %v5302_v45, %v3237_v13  ;;  %v3240_v32 = vmul.f32 %v5284_v9, %v3202_v10 }
 0x281   : > { %3402 = vst.msk [vmem:[%s4544_s30 + $0x60] sm:$0xff] %vm3389_vm7, %v3369_v29  ;;  %v3276_v2 = vadd.f32 %v5302_v45, %v3238_v63  ;;  %v3277_v44 = vadd.f32 %v5302_v45, %v3239_v16  ;;  %v3241_v17 = vmul.f32 %v5284_v9, %v3203_v27  ;;  %v3242_v24 = vmul.f32 %v5284_v9, %v3204_v5  ;;  %v3216_v29 = vld [vmem:[%s5277_s14 + $0xf8] sm:$0xff] }
 0x282   : > { %v3370_v4 = vsel %vm3306_vm5, %v3274_v1, %v3338_v8  ;;  %vm3307_vm6 = vcmp.gt.f32.partialorder %v3275_v26, 0.0  ;;  %v3339_v38 = vmul.f32 0.1, %v3275_v26  ;;  %v3278_v41 = vadd.f32 %v5302_v45, %v3240_v32  ;;  %v3215_v1 = vld [vmem:[%s5277_s14 + $0xf0] sm:$0xff] }
 0x283   : > { %3403 = vst.msk [vmem:[%s4544_s30 + $0x68] sm:$0xff] %vm3389_vm7, %v3370_v4  ;;  %vm3308_vm8 = vcmp.gt.f32.partialorder %v3276_v2, 0.0  ;;  %v3340_v62 = vmul.f32 0.1, %v3276_v2  ;;  %vm3309_vm9 = vcmp.gt.f32.partialorder %v3277_v44, 0.0  ;;  %v3279_v20 = vadd.f32 %v5302_v45, %v3241_v17 }
 0x284   : > { %v3341_v0 = vmul.f32 0.1, %v3277_v44  ;;  %v3371_v7 = vsel %vm3307_vm6, %v3275_v26, %v3339_v38  ;;  %vm3310_vm10 = vcmp.gt.f32.partialorder %v3278_v41, 0.0  ;;  %v3342_v19 = vmul.f32 0.1, %v3278_v41 }
 0x285   : > { %3404 = vst.msk [vmem:[%s4544_s30 + $0x70] sm:$0xff] %vm3389_vm7, %v3371_v7  ;;  %v3372_v22 = vsel %vm3308_vm8, %v3276_v2, %v3340_v62  ;;  %v3280_v34 = vadd.f32 %v5302_v45, %v3242_v24  ;;  %v3243_v35 = vmul.f32 %v5284_v9, %v3205_v48  ;;  %vm3311_vm11 = vcmp.gt.f32.partialorder %v3279_v20, 0.0 }
 0x286   : > { %v3373_v33 = vsel %vm3309_vm9, %v3277_v44, %v3341_v0  ;;  %3405 = vst.msk [vmem:[%s4544_s30 + $0x78] sm:$0xff] %vm3389_vm7, %v3372_v22  ;;  %v3374_v23 = vsel %vm3310_vm10, %v3278_v41, %v3342_v19  ;;  %v3343_v25 = vmul.f32 0.1, %v3279_v20  ;;  %v3244_v39 = vmul.f32 %v5284_v9, %v3206_v49 }
 0x287   : > { %3406 = vst.msk [vmem:[%s4544_s30 + $0x80] sm:$0xff] %vm3389_vm7, %v3373_v33  ;;  %3407 = vst.msk [vmem:[%s4544_s30 + $0x88] sm:$0xff] %vm3389_vm7, %v3374_v23  ;;  %vm3312_vm12 = vcmp.gt.f32.partialorder %v3280_v34, 0.0  ;;  %v3344_v50 = vmul.f32 0.1, %v3280_v34  ;;  %v3281_v40 = vadd.f32 %v5302_v45, %v3243_v35  ;;  %v3245_v42 = vmul.f32 %v5284_v9, %v3207_v21 }
 0x288   : > { %v3375_v51 = vsel %vm3311_vm11, %v3279_v20, %v3343_v25  ;;  %v3282_v43 = vadd.f32 %v5302_v45, %v3244_v39  ;;  %v3246_v58 = vmul.f32 %v5284_v9, %v3208_v36  ;;  %v3247_v59 = vmul.f32 %v5284_v9, %v3209_v47 }
 0x289   : > { %3408 = vst.msk [vmem:[%s4544_s30 + $0x90] sm:$0xff] %vm3389_vm7, %v3375_v51  ;;  %v3376_v60 = vsel %vm3312_vm12, %v3280_v34, %v3344_v50  ;;  %vm3313_vm13 = vcmp.gt.f32.partialorder %v3281_v40, 0.0  ;;  %v3345_v3 = vmul.f32 0.1, %v3281_v40  ;;  %v3283_v14 = vadd.f32 %v5302_v45, %v3245_v42 }
 0x28a   : > { %3409 = vst.msk [vmem:[%s4544_s30 + $0x98] sm:$0xff] %vm3389_vm7, %v3376_v60  ;;  %vm3314_vm14 = vcmp.gt.f32.partialorder %v3282_v43, 0.0  ;;  %v3346_v15 = vmul.f32 0.1, %v3282_v43  ;;  %v3284_v18 = vadd.f32 %v5302_v45, %v3246_v58  ;;  %v3285_v61 = vadd.f32 %v5302_v45, %v3247_v59 }
 0x28b   : > { %v3377_v31 = vsel %vm3313_vm13, %v3281_v40, %v3345_v3  ;;  %vm3315_vm15 = vcmp.gt.f32.partialorder %v3283_v14, 0.0  ;;  %v3347_v37 = vmul.f32 0.1, %v3283_v14  ;;  %v3248_v46 = vmul.f32 %v5284_v9, %v3210_v52 }
 0x28c   : > { %3410 = vst.msk [vmem:[%s4544_s30 + $0xa0] sm:$0xff] %vm3389_vm7, %v3377_v31  ;;  %v3378_v56 = vsel %vm3314_vm14, %v3282_v43, %v3346_v15  ;;  %vm3316_vm0 = vcmp.gt.f32.partialorder %v3284_v18, 0.0  ;;  %v3348_v57 = vmul.f32 0.1, %v3284_v18  ;;  %vm3317_vm1 = vcmp.gt.f32.partialorder %v3285_v61, 0.0 }
 0x28d   : > { %3411 = vst.msk [vmem:[%s4544_s30 + $0xa8] sm:$0xff] %vm3389_vm7, %v3378_v56  ;;  %v3379_v6 = vsel %vm3315_vm15, %v3283_v14, %v3347_v37  ;;  %v3349_v10 = vmul.f32 0.1, %v3285_v61  ;;  %v3286_v11 = vadd.f32 %v5302_v45, %v3248_v46  ;;  %v3249_v12 = vmul.f32 %v5284_v9, %v3211_v30 }
 0x28e   : > { %3412 = vst.msk [vmem:[%s4544_s30 + $0xb0] sm:$0xff] %vm3389_vm7, %v3379_v6  ;;  %v3380_v13 = vsel %vm3316_vm0, %v3284_v18, %v3348_v57  ;;  %v3250_v27 = vmul.f32 %v5284_v9, %v3212_v53  ;;  %v3251_v5 = vmul.f32 %v5284_v9, %v3213_v54  ;;  %v3252_v28 = vmul.f32 %v5284_v9, %v3214_v55 }
 0x28f   : > { %3413 = vst.msk [vmem:[%s4544_s30 + $0xb8] sm:$0xff] %vm3389_vm7, %v3380_v13  ;;  %v3381_v63 = vsel %vm3317_vm1, %v3285_v61, %v3349_v10  ;;  %vm3318_vm2 = vcmp.gt.f32.partialorder %v3286_v11, 0.0  ;;  %v3350_v16 = vmul.f32 0.1, %v3286_v11  ;;  %v3287_v8 = vadd.f32 %v5302_v45, %v3249_v12 }
 0x290   : > { %3414 = vst.msk [vmem:[%s4544_s30 + $0xc0] sm:$0xff] %vm3389_vm7, %v3381_v63  ;;  %v3288_v26 = vadd.f32 %v5302_v45, %v3250_v27  ;;  %v3289_v32 = vadd.f32 %v5302_v45, %v3251_v5  ;;  %v3290_v2 = vadd.f32 %v5302_v45, %v3252_v28  ;;  %v3253_v44 = vmul.f32 %v5284_v9, %v3215_v1 }
 0x291   : > { %v3382_v17 = vsel %vm3318_vm2, %v3286_v11, %v3350_v16  ;;  %vm3319_vm3 = vcmp.gt.f32.partialorder %v3287_v8, 0.0  ;;  %v3351_v24 = vmul.f32 0.1, %v3287_v8  ;;  %v3254_v4 = vmul.f32 %v5284_v9, %v3216_v29 }
 0x292   : > { %3415 = vst.msk [vmem:[%s4544_s30 + $0xc8] sm:$0xff] %vm3389_vm7, %v3382_v17  ;;  %vm3320_vm4 = vcmp.gt.f32.partialorder %v3288_v26, 0.0  ;;  %v3352_v38 = vmul.f32 0.1, %v3288_v26  ;;  %vm3321_vm5 = vcmp.gt.f32.partialorder %v3289_v32, 0.0  ;;  %vm3322_vm6 = vcmp.gt.f32.partialorder %v3290_v2, 0.0 }
 0x293   : > { %v3353_v41 = vmul.f32 0.1, %v3289_v32  ;;  %v3383_v48 = vsel %vm3319_vm3, %v3287_v8, %v3351_v24  ;;  %v3354_v49 = vmul.f32 0.1, %v3290_v2  ;;  %v3291_v62 = vadd.f32 %v5302_v45, %v3253_v44 }
 0x294   : > { %3416 = vst.msk [vmem:[%s4544_s30 + $0xd0] sm:$0xff] %vm3389_vm7, %v3383_v48  ;;  %v3384_v0 = vsel %vm3320_vm4, %v3288_v26, %v3352_v38  ;;  %v3292_v9 = vadd.f32 %v5302_v45, %v3254_v4 }
 0x295   : > { %v3385_v7 = vsel %vm3321_vm5, %v3289_v32, %v3353_v41  ;;  %3417 = vst.msk [vmem:[%s4544_s30 + $0xd8] sm:$0xff] %vm3389_vm7, %v3384_v0  ;;  %v3386_v19 = vsel %vm3322_vm6, %v3290_v2, %v3354_v49  ;;  %vm3323_vm8 = vcmp.gt.f32.partialorder %v3291_v62, 0.0  ;;  %v3355_v20 = vmul.f32 0.1, %v3291_v62 }
 0x296   : > { %3418 = vst.msk [vmem:[%s4544_s30 + $0xe0] sm:$0xff] %vm3389_vm7, %v3385_v7  ;;  %3419 = vst.msk [vmem:[%s4544_s30 + $0xe8] sm:$0xff] %vm3389_vm7, %v3386_v19  ;;  %vm3324_vm9 = vcmp.gt.f32.partialorder %v3292_v9, 0.0  ;;  %v3356_v21 = vmul.f32 0.1, %v3292_v9 }
 0x297   : > { %v3387_v22 = vsel %vm3323_vm8, %v3291_v62, %v3355_v20 }
 0x298   : > { %3420 = vst.msk [vmem:[%s4544_s30 + $0xf0] sm:$0xff] %vm3389_vm7, %v3387_v22  ;;  %v3388_v33 = vsel %vm3324_vm9, %v3292_v9, %v3356_v21 }
 0x299   : > { %3421 = vst.msk [vmem:[%s4544_s30 + $0xf8] sm:$0xff] %vm3389_vm7, %v3388_v33 }
 0x29a PF: > { %s14_s19 = sadd.s32 1, %s4474_s19   ;;  %s5466_s15 = smov %s4466_s17 }
 0x29b   : > { %p11_p10 = scmp.ge.s32.totalorder %s14_s19, 6   ;;  %s5467_s16 = smov %s4470_s18 }
 0x29c   : > { %s5468_s17 = smov %s5471_s20  ;;  %s5469_s18 = smov %s5475_s21 }
 0x29d   :  { %13 = sbr.rel (!%p11_p10) target bundleno = 3 (0x3), region = 90 }

// kernel: encoder_n_blocks.3
= control target key start
LH: loop header
LB: loop body
LE: loop exit
PB: predicated region body
PF: predicated region fallthrough
CT: control target
= control target key end

     0   :  { %9 = vsyncpa [#allocation7], 0  ;;  %s5894_s0 = inlined_call_operand.vmem [shape: f32[2,16,16,32], index: 0, kind: input, shape index: {}]   ;;  %s5895_s1 = inlined_call_operand.vmem [shape: bf16[3,3,32,32], index: 1, kind: input, shape index: {}]   ;;  %s5896_s2 = inlined_call_operand.vmem [shape: f32[1,32], index: 2, kind: input, shape index: {}]   ;;  %s5897_s3 = inlined_call_operand.vmem [shape: f32[1,32], index: 3, kind: input, shape index: {}]   ;;  %s5898_s4 = inlined_call_operand.hbm [shape: f32[2,8,8,32], index: 4, kind: output, shape index: {}]  }
   0x1   :  { %11 = vsyncpa [#allocation7 + $0x1], 0  ;;  %s4873_s15 = smov 0   ;;  %s4875_s16 = smov 0  }
   0x2   :  { %s4877_s17 = smov 0   ;;  %s4879_s18 = smov 0  }
   0x3   :  { %s4881_s19 = smov 0   ;;  %s4883_s20 = smov 0  }
   0x4   :  { %s4885_s21 = smov 0   ;;  %s4887_s22 = smov 0  }
   0x5 LB: > { %s3663_s23 = sadd.s32 4294967295, %s4842_s22   ;;  %s3664_s24 = sadd.s32 4294967294, %s4842_s22   ;;  %s4842_s22 = sphi %s4887_s22, %s17_s22   ;;  %s4838_s21 = sphi %s4885_s21, %s5907_s21   ;;  %s4834_s20 = sphi %s4883_s20, %s5906_s20   ;;  %s4830_s19 = sphi %s4881_s19, %s5905_s19   ;;  %s4826_s18 = sphi %s4879_s18, %s5904_s18   ;;  %s4822_s17 = sphi %s4877_s17, %s5903_s17   ;;  %s4818_s16 = sphi %s4875_s16, %s5902_s16   ;;  %s4814_s15 = sphi %s4873_s15, %s5901_s15  }
   0x6   : > { %s26_s25 = sadd.s32 1, %s4834_s20  ;;  %s29_s26 = sadd.s32 1, %s4838_s21 }
   0x7   : > { %p27_p0 = scmp.ge.s32.totalorder %s26_s25, 2  ;;  %s128_s27 = smul.u32 %s4834_s20, %s4838_s21 }
   0x8   : > { %p143_p1 = scmp.ne.s32.totalorder %s4822_s17, %s4818_s16  ;;  %p144_p2 = scmp.eq.s32.totalorder %s3663_s23, 3 }
   0x9   : > { %s5909_s25 = smov (%p27_p0, %s26_s25), 0  ;;  %s5911_s26 = smov (!%p27_p0, %s29_s26), %s4838_s21 }
   0xa   : > { %p149_p3 = scmp.ne.s32.totalorder %s4818_s16, %s4814_s15  ;;  %p31_p4 = scmp.ge.s32.totalorder %s5911_s26, 2 }
   0xb   : > { %p150_p5 = scmp.eq.s32.totalorder %s3664_s24, 3  ;;  %p4926_p6 = por %p144_p2, %p143_p1 }
   0xc   : > { %p3667_p7 = scmp.ge.s32.totalorder %s4842_s22, 1  ;;  %s5913_s26 = smov (%p31_p4, %s5911_s26), 0 }
   0xd   : > { %p4933_p8 = por %p150_p5, %p149_p3  ;;  %p191_p9 = scmp.lt.s32.totalorder %s4842_s22, 5 }
   0xe   : > { %s129_s30 = smul.u32 %s5913_s26, %s5909_s25  ;;  %s133_s6 = sadd.s32 1, %s4822_s17 }
   0xf   : > { %p192_p10 = pnand %p3667_p7, %p191_p9 }
  0x10   : > { %s130_s5 = ssub.s32 %s128_s27, %s129_s30  ;;  %s217_s8 = sand.u32 (!%p192_p10), 1, %s4818_s16  }
  0x11   : > { %p131_p11 = scmp.eq.s32.totalorder %s130_s5, 0  ;;  %195 = sbr.rel (%p192_p10) target bundleno = 711 (0x2c7), region = 36 }
  0x12   : > { %s220_s9 = ssub.s32 (!%p192_p10), 1, %s4830_s19  ;;  %s3668_s10 = sshll.u32 (!%p192_p10), %s217_s8, 6 }
  0x13   : > { %s4942_s7 = scalar_select %p131_p11, %s4822_s17, %s133_s6  }
  0x14   : > { %s221_s11 = smul.u32 (!%p192_p10), %s4826_s18, %s220_s9  ;;  %s4955_s27 = scalar_lea.vmem (!%p192_p10), [#allocation6], %s3668_s10 }
  0x15   : > { %p3671_p13 = scmp.ne.s32.totalorder (!%p192_p10), %s4830_s19, 0 }
  0x16   : > { %s222_s12 = sadd.s32 (!%p192_p10), %s4830_s19, %s221_s11 }
  0x17   : > { %p223_p12 = scmp.lt.s32.totalorder (!%p192_p10), %s222_s12, 1 }
  0x18   : > { %236 = sbr.rel (%p3671_p13) target bundleno = 597 (0x255), region = 40  ;;  %p3672_p0 = scmp.ne.s32.totalorder (!%p3671_p13), %s4826_s18, 0 }
  0x19   : > { %s5915_s12 = smov (!%p223_p12, %s222_s12), 1 }
  0x1a   : > { %s3906_s13 = sshll.u32 %s5915_s12, 8 }
  0x1b   : > { %s4953_s24 = scalar_lea.vmem %s5894_s0, %s3906_s13 }
  0x1f   : > { %240 = sbr.rel (%p3672_p0) target bundleno = 60 (0x3c), region = 44  ;;  %vm241_vm0 = vcmask (!%p3672_p0), 261120   ;;  %vm244_vm1 = vcmask (!%p3672_p0), 254976   ;;  %vm297_vm2 = vcmask (!%p3672_p0), 253952   ;;  %v4844_v0 = vmov (!%p3672_p0), 0.0  }
  0x20   : > { %242 = vst.msk [vmem:[#allocation2] sm:$0xff] (!%p3672_p0), %vm241_vm0, %v4844_v0  ;;  %243 = vst.msk [vmem:[#allocation2 + $0x8] sm:$0xff] (!%p3672_p0), %vm241_vm0, %v4844_v0 }
  0x21   : > { %246 = vst.msk [vmem:[#allocation2 + $0x18] sm:$0xff] (!%p3672_p0), %vm241_vm0, %v4844_v0  ;;  %247 = vst.msk [vmem:[#allocation2 + $0x20] sm:$0xff] (!%p3672_p0), %vm241_vm0, %v4844_v0 }
  0x22   : > { %249 = vst.msk [vmem:[#allocation2 + $0x30] sm:$0xff] (!%p3672_p0), %vm241_vm0, %v4844_v0  ;;  %250 = vst.msk [vmem:[#allocation2 + $0x38] sm:$0xff] (!%p3672_p0), %vm241_vm0, %v4844_v0 }
  0x23   : > { %252 = vst.msk [vmem:[#allocation2 + $0x48] sm:$0xff] (!%p3672_p0), %vm241_vm0, %v4844_v0  ;;  %253 = vst.msk [vmem:[#allocation2 + $0x50] sm:$0xff] (!%p3672_p0), %vm241_vm0, %v4844_v0 }
  0x24   : > { %255 = vst.msk [vmem:[#allocation2 + $0x60] sm:$0xff] (!%p3672_p0), %vm241_vm0, %v4844_v0  ;;  %256 = vst.msk [vmem:[#allocation2 + $0x68] sm:$0xff] (!%p3672_p0), %vm241_vm0, %v4844_v0 }
  0x25   : > { %258 = vst.msk [vmem:[#allocation2 + $0x78] sm:$0xff] (!%p3672_p0), %vm241_vm0, %v4844_v0  ;;  %259 = vst.msk [vmem:[#allocation2 + $0x80] sm:$0xff] (!%p3672_p0), %vm241_vm0, %v4844_v0 }
  0x26   : > { %261 = vst.msk [vmem:[#allocation2 + $0x90] sm:$0xff] %vm241_vm0, %v4844_v0  ;;  %262 = vst.msk [vmem:[#allocation2 + $0x98] sm:$0xff] %vm241_vm0, %v4844_v0 }
  0x27   : > { %264 = vst.msk [vmem:[#allocation2 + $0xa8] sm:$0xff] %vm241_vm0, %v4844_v0  ;;  %265 = vst.msk [vmem:[#allocation2 + $0xb0] sm:$0xff] %vm241_vm0, %v4844_v0 }
  0x28   : > { %267 = vst.msk [vmem:[#allocation2 + $0xc0] sm:$0xff] %vm241_vm0, %v4844_v0  ;;  %268 = vst.msk [vmem:[#allocation2 + $0xc8] sm:$0xff] %vm241_vm0, %v4844_v0 }
  0x29   : > { %270 = vst.msk [vmem:[#allocation2 + $0xd8] sm:$0xff] %vm241_vm0, %v4844_v0  ;;  %271 = vst.msk [vmem:[#allocation2 + $0xe0] sm:$0xff] %vm241_vm0, %v4844_v0 }
  0x2a   : > { %273 = vst.msk [vmem:[#allocation2 + $0xf0] sm:$0xff] %vm241_vm0, %v4844_v0  ;;  %274 = vst.msk [vmem:[#allocation2 + $0xf8] sm:$0xff] %vm241_vm0, %v4844_v0 }
  0x2b   : > { %276 = vst.msk [vmem:[#allocation2 + $0x108] sm:$0xff] %vm241_vm0, %v4844_v0  ;;  %277 = vst.msk [vmem:[#allocation2 + $0x110] sm:$0xff] %vm241_vm0, %v4844_v0 }
  0x2c   : > { %279 = vst.msk [vmem:[#allocation2 + $0x120] sm:$0xff] %vm241_vm0, %v4844_v0  ;;  %280 = vst.msk [vmem:[#allocation2 + $0x128] sm:$0xff] %vm241_vm0, %v4844_v0 }
  0x2d   : > { %282 = vst.msk [vmem:[#allocation2 + $0x138] sm:$0xff] %vm241_vm0, %v4844_v0  ;;  %283 = vst.msk [vmem:[#allocation2 + $0x140] sm:$0xff] %vm241_vm0, %v4844_v0 }
  0x2e   : > { %285 = vst.msk [vmem:[#allocation2 + $0x150] sm:$0xff] %vm241_vm0, %v4844_v0  ;;  %286 = vst.msk [vmem:[#allocation2 + $0x158] sm:$0xff] %vm241_vm0, %v4844_v0 }
  0x2f   : > { %288 = vst.msk [vmem:[#allocation2 + $0x168] sm:$0xff] %vm241_vm0, %v4844_v0  ;;  %289 = vst.msk [vmem:[#allocation2 + $0x170] sm:$0xff] %vm241_vm0, %v4844_v0 }
  0x30   : > { %291 = vst.msk [vmem:[#allocation2 + $0x180] sm:$0xff] %vm241_vm0, %v4844_v0  ;;  %292 = vst.msk [vmem:[#allocation2 + $0x188] sm:$0xff] %vm241_vm0, %v4844_v0 }
  0x31   : > { %294 = vst.msk [vmem:[#allocation2 + $0x198] sm:$0xff] %vm241_vm0, %v4844_v0  ;;  %295 = vst.msk [vmem:[#allocation2 + $0x1a0] sm:$0xff] %vm241_vm0, %v4844_v0 }
  0x32   : > { %245 = vst.msk [vmem:[#allocation2 + $0x10] sm:$0x3] %vm244_vm1, %v4844_v0  ;;  %248 = vst.msk [vmem:[#allocation2 + $0x28] sm:$0x3] %vm244_vm1, %v4844_v0 }
  0x33   : > { %251 = vst.msk [vmem:[#allocation2 + $0x40] sm:$0x3] %vm244_vm1, %v4844_v0  ;;  %254 = vst.msk [vmem:[#allocation2 + $0x58] sm:$0x3] %vm244_vm1, %v4844_v0 }
  0x34   : > { %257 = vst.msk [vmem:[#allocation2 + $0x70] sm:$0x3] %vm244_vm1, %v4844_v0  ;;  %260 = vst.msk [vmem:[#allocation2 + $0x88] sm:$0x3] %vm244_vm1, %v4844_v0 }
  0x35   : > { %263 = vst.msk [vmem:[#allocation2 + $0xa0] sm:$0x3] %vm244_vm1, %v4844_v0  ;;  %266 = vst.msk [vmem:[#allocation2 + $0xb8] sm:$0x3] %vm244_vm1, %v4844_v0 }
  0x36   : > { %269 = vst.msk [vmem:[#allocation2 + $0xd0] sm:$0x3] %vm244_vm1, %v4844_v0  ;;  %272 = vst.msk [vmem:[#allocation2 + $0xe8] sm:$0x3] %vm244_vm1, %v4844_v0 }
  0x37   : > { %275 = vst.msk [vmem:[#allocation2 + $0x100] sm:$0x3] %vm244_vm1, %v4844_v0  ;;  %278 = vst.msk [vmem:[#allocation2 + $0x118] sm:$0x3] %vm244_vm1, %v4844_v0 }
  0x38   : > { %281 = vst.msk [vmem:[#allocation2 + $0x130] sm:$0x3] %vm244_vm1, %v4844_v0  ;;  %284 = vst.msk [vmem:[#allocation2 + $0x148] sm:$0x3] %vm244_vm1, %v4844_v0 }
  0x39   : > { %287 = vst.msk [vmem:[#allocation2 + $0x160] sm:$0x3] %vm244_vm1, %v4844_v0  ;;  %290 = vst.msk [vmem:[#allocation2 + $0x178] sm:$0x3] %vm244_vm1, %v4844_v0 }
  0x3a   : > { %293 = vst.msk [vmem:[#allocation2 + $0x190] sm:$0x3] %vm244_vm1, %v4844_v0  ;;  %296 = vst.msk [vmem:[#allocation2 + $0x1a8] sm:$0x3] %vm244_vm1, %v4844_v0 }
  0x3b   : > { %298 = vst.msk [vmem:[#allocation4] sm:$0x1] %vm297_vm2, %v4844_v0  ;;  %299 = vst.msk [vmem:[#allocation5] sm:$0x1] %vm297_vm2, %v4844_v0 }
  0x3c PF: > { %v4728_v1 = vld [vmem:[%s5895_s1 + $0x10] sm:$0xff]   ;;  %v5021_v2 = vld [vmem:[%s5895_s1 + $0x40] sm:$0xff]   ;;  %v4730_v3 = vld [vmem:[%s5895_s1 + $0x18] sm:$0xff]   ;;  %vm333_vm3 = vcmask 261120   ;;  %s3867_s10 = sshll.u32 %s4826_s18, 8  ;;  %vm3161_vm4 = vcmask 253952  }
  0x3d   : > { %4070 = vmatprep.subr.bf16.mxu1 %v4728_v1  ;;  %4214 = vmatprep.subr.bf16.mxu0 %v5021_v2  ;;  %v5030_v4 = vld [vmem:[%s5895_s1 + $0x48] sm:$0xff]   ;;  %v300_v7 = vld [vmem:[%s4953_s24] sm:$0xff]  ;;  %v4733_v11 = vld [vmem:[%s5895_s1 + $0x50] sm:$0xff]   ;;  %s5546_s11 = scalar_lea.vmem [#allocation3], %s3867_s10 }
  0x3e   : > { %4071 = vmatpush3.bf16.msra.mxu1 %v4728_v1  ;;  %4215 = vmatpush3.bf16.msra.mxu0 %v5021_v2  ;;  %v418_v5 = vld [vmem:[#allocation2 + $0x1] sm:$0xff]  ;;  %v419_v6 = vld [vmem:[#allocation2 + $0x9] sm:$0xff]  ;;  %334 = vst.msk [vmem:[#allocation2 + $0x19] sm:$0xff] %vm333_vm3, %v300_v7  ;;  %v303_v13 = vld [vmem:[%s4953_s24 + $0x18] sm:$0xff] }
  0x3f   : > { %4072 = vmatprep.subr.bf16.mxu1 %v4730_v3  ;;  %4216 = vmatprep.subr.bf16.mxu0 %v5030_v4  ;;  %v450_v8 = vpack.c.bf16 %v419_v6, %v418_v5  ;;  %v301_v9 = vld [vmem:[%s4953_s24 + $0x8] sm:$0xff]  ;;  %v4732_v10 = vld [vmem:[%s5895_s1] sm:$0xff]   ;;  %v302_v12 = vld [vmem:[%s4953_s24 + $0x10] sm:$0xff]  ;;  %337 = vst.msk [vmem:[#allocation2 + $0x39] sm:$0xff] %vm333_vm3, %v303_v13 }
  0x40   : > { %335 = vst.msk [vmem:[#allocation2 + $0x21] sm:$0xff] %vm333_vm3, %v301_v9  ;;  %336 = vst.msk [vmem:[#allocation2 + $0x31] sm:$0xff] %vm333_vm3, %v302_v12  ;;  %v304_v14 = vld [vmem:[%s4953_s24 + $0x20] sm:$0xff]  ;;  %v305_v15 = vld [vmem:[%s4953_s24 + $0x28] sm:$0xff] }
  0x41   : > { %4074 = vmatprep.mubr.msk.bf16.mxu1 %vm333_vm3, %v450_v8  ;;  %v306_v16 = vld [vmem:[%s4953_s24 + $0x30] sm:$0xff]  ;;  %338 = vst.msk [vmem:[#allocation2 + $0x49] sm:$0xff] %vm333_vm3, %v304_v14  ;;  %339 = vst.msk [vmem:[#allocation2 + $0x51] sm:$0xff] %vm333_vm3, %v305_v15  ;;  %v307_v17 = vld [vmem:[%s4953_s24 + $0x38] sm:$0xff] }
  0x42   : > { %4073 = vmatpush3.bf16.msra.mxu1 %v4730_v3  ;;  %4217 = vmatpush3.bf16.msra.mxu0 %v5030_v4  ;;  %340 = vst.msk [vmem:[#allocation2 + $0x61] sm:$0xff] %vm333_vm3, %v306_v16  ;;  %v308_v18 = vld [vmem:[%s4953_s24 + $0x40] sm:$0xff]  ;;  %v309_v19 = vld [vmem:[%s4953_s24 + $0x48] sm:$0xff]  ;;  %341 = vst.msk [vmem:[#allocation2 + $0x69] sm:$0xff] %vm333_vm3, %v307_v17 }
  0x43   : > { %4106 = vmatprep.subr.bf16.mxu1 %v4732_v10  ;;  %4250 = vmatprep.subr.bf16.mxu0 %v4733_v11  ;;  %342 = vst.msk [vmem:[#allocation2 + $0x79] sm:$0xff] %vm333_vm3, %v308_v18  ;;  %343 = vst.msk [vmem:[#allocation2 + $0x81] sm:$0xff] %vm333_vm3, %v309_v19  ;;  %v310_v20 = vld [vmem:[%s4953_s24 + $0x50] sm:$0xff]  ;;  %v311_v21 = vld [vmem:[%s4953_s24 + $0x58] sm:$0xff] }
  0x44   : > { %v312_v22 = vld [vmem:[%s4953_s24 + $0x60] sm:$0xff]  ;;  %344 = vst.msk [vmem:[#allocation2 + $0x91] sm:$0xff] %vm333_vm3, %v310_v20  ;;  %345 = vst.msk [vmem:[#allocation2 + $0x99] sm:$0xff] %vm333_vm3, %v311_v21  ;;  %v313_v24 = vld [vmem:[%s4953_s24 + $0x68] sm:$0xff] }
  0x45   : > { %v420_v23 = vld [vmem:[#allocation2 + $0x19] sm:$0xff]  ;;  %346 = vst.msk [vmem:[#allocation2 + $0xa9] sm:$0xff] %vm333_vm3, %v312_v22  ;;  %v314_v25 = vld [vmem:[%s4953_s24 + $0x70] sm:$0xff]  ;;  %347 = vst.msk [vmem:[#allocation2 + $0xb1] sm:$0xff] %vm333_vm3, %v313_v24 }
  0x46   : > { %v315_v27 = vld [vmem:[%s4953_s24 + $0x78] sm:$0xff]  ;;  %348 = vst.msk [vmem:[#allocation2 + $0xc1] sm:$0xff] %vm333_vm3, %v314_v25  ;;  %v316_v28 = vld [vmem:[%s4953_s24 + $0x80] sm:$0xff]  ;;  %v317_v30 = vld [vmem:[%s4953_s24 + $0x88] sm:$0xff] }
  0x47   : > { %v421_v26 = vld [vmem:[#allocation2 + $0x21] sm:$0xff]  ;;  %349 = vst.msk [vmem:[#allocation2 + $0xc9] sm:$0xff] %vm333_vm3, %v315_v27  ;;  %350 = vst.msk [vmem:[#allocation2 + $0xd9] sm:$0xff] %vm333_vm3, %v316_v28  ;;  %v1527_v31 = vld [vmem:[#allocation2 + $0x31] sm:$0xff] }
  0x48   : > { %v451_v29 = vpack.c.bf16 %v421_v26, %v420_v23  ;;  %v1528_v32 = vld [vmem:[#allocation2 + $0x39] sm:$0xff]  ;;  %351 = vst.msk [vmem:[#allocation2 + $0xe1] sm:$0xff] %vm333_vm3, %v317_v30  ;;  %v424_v35 = vld [vmem:[#allocation2 + $0x49] sm:$0xff]  ;;  %v425_v36 = vld [vmem:[#allocation2 + $0x51] sm:$0xff] }
  0x49   : > { %v4734_v33 = vld [vmem:[%s5895_s1 + $0x58] sm:$0xff]   ;;  %v5083_v34 = vpack.c.bf16 %v1528_v32, %v1527_v31  ;;  %v4735_v37 = vld [vmem:[%s5895_s1 + $0x8] sm:$0xff]   ;;  %v5088_v38 = vpack.c.bf16 %v425_v36, %v424_v35  ;;  %v5099_v43 = vld [vmem:[%s5895_s1 + $0x60] sm:$0xff]  }
  0x4a   : > { %4075 = vmatmul.mubr.msk.bf16.vlgmr.msra.gmra.mrb[0].mxu1 %vm333_vm3, %v451_v29  ;;  %4218 = vmatprep.mubr.msk.bf16.mxu0 %vm333_vm3, %v451_v29  ;;  %v1531_v39 = vld [vmem:[#allocation2 + $0x61] sm:$0xff]  ;;  %v1532_v40 = vld [vmem:[#allocation2 + $0x69] sm:$0xff]  ;;  %v428_v41 = vld [vmem:[#allocation2 + $0x79] sm:$0xff] }
  0x4b   : > { %4107 = vmatpush3.bf16.msra.mxu1 %v4732_v10  ;;  %4219 = vmatmul.mubr.msk.bf16.vlgmr.msra.gmra.mrb[0].mxu0 %vm333_vm3, %v5083_v34  ;;  %v429_v42 = vld [vmem:[#allocation2 + $0x81] sm:$0xff]  ;;  %v5101_v44 = vpack.c.bf16 %v1532_v40, %v1531_v39  ;;  %v318_v46 = vld [vmem:[%s4953_s24 + $0x90] sm:$0xff]  ;;  %v319_v47 = vld [vmem:[%s4953_s24 + $0x98] sm:$0xff] }
  0x4c   : > { %4078 = vmatprep.mubr.msk.bf16.mxu1 %vm333_vm3, %v5083_v34  ;;  %4251 = vmatpush3.bf16.msra.mxu0 %v4733_v11  ;;  %v5103_v45 = vpack.c.bf16 %v429_v42, %v428_v41  ;;  %v320_v48 = vld [vmem:[%s4953_s24 + $0xa0] sm:$0xff]  ;;  %352 = vst.msk [vmem:[#allocation2 + $0xf1] sm:$0xff] %vm333_vm3, %v318_v46  ;;  %353 = vst.msk [vmem:[#allocation2 + $0xf9] sm:$0xff] %vm333_vm3, %v319_v47  ;;  %v321_v49 = vld [vmem:[%s4953_s24 + $0xa8] sm:$0xff] }
  0x4d   : > { %4222 = vmatprep.mubr.msk.bf16.mxu0 %vm333_vm3, %v5088_v38  ;;  %4252 = vmatprep.subr.bf16.mxu0 %v4734_v33  ;;  %354 = vst.msk [vmem:[#allocation2 + $0x109] sm:$0xff] %vm333_vm3, %v320_v48  ;;  %355 = vst.msk [vmem:[#allocation2 + $0x111] sm:$0xff] %vm333_vm3, %v321_v49  ;;  %v322_v50 = vld [vmem:[%s4953_s24 + $0xb0] sm:$0xff]  ;;  %v323_v51 = vld [vmem:[%s4953_s24 + $0xb8] sm:$0xff] }
  0x4e   : > { %4108 = vmatprep.subr.bf16.mxu1 %v4735_v37  ;;  %356 = vst.msk [vmem:[#allocation2 + $0x121] sm:$0xff] %vm333_vm3, %v322_v50  ;;  %v324_v52 = vld [vmem:[%s4953_s24 + $0xc0] sm:$0xff]  ;;  %v325_v53 = vld [vmem:[%s4953_s24 + $0xc8] sm:$0xff]  ;;  %v1535_v54 = vld [vmem:[#allocation2 + $0x91] sm:$0xff] }
  0x4f   : > { %4109 = vmatpush3.bf16.msra.mxu1 %v4735_v37  ;;  %v1536_v55 = vld [vmem:[#allocation2 + $0x99] sm:$0xff]  ;;  %v432_v56 = vld [vmem:[#allocation2 + $0xa9] sm:$0xff]  ;;  %357 = vst.msk [vmem:[#allocation2 + $0x129] sm:$0xff] %vm333_vm3, %v323_v51  ;;  %358 = vst.msk [vmem:[#allocation2 + $0x139] sm:$0xff] %vm333_vm3, %v324_v52 }
  0x50   : > { %4253 = vmatpush3.bf16.msra.mxu0 %v4734_v33  ;;  %359 = vst.msk [vmem:[#allocation2 + $0x141] sm:$0xff] %vm333_vm3, %v325_v53  ;;  %v433_v57 = vld [vmem:[#allocation2 + $0xb1] sm:$0xff]  ;;  %v328_v60 = vld [vmem:[%s4953_s24 + $0xe0] sm:$0xff]  ;;  %v329_v61 = vld [vmem:[%s4953_s24 + $0xe8] sm:$0xff]  ;;  %v5136_v62 = vpack.c.bf16 %v1536_v55, %v1535_v54 }
  0x51   : > { %4286 = vmatprep.subr.bf16.mxu0 %v5099_v43  ;;  %v326_v58 = vld [vmem:[%s4953_s24 + $0xd0] sm:$0xff]  ;;  %v327_v59 = vld [vmem:[%s4953_s24 + $0xd8] sm:$0xff]  ;;  %362 = vst.msk [vmem:[#allocation2 + $0x169] sm:$0xff] %vm333_vm3, %v328_v60  ;;  %363 = vst.msk [vmem:[#allocation2 + $0x171] sm:$0xff] %vm333_vm3, %v329_v61  ;;  %v5140_v63 = vpack.c.bf16 %v433_v57, %v432_v56 }
  0x52   : > { %4079 = vmatmul.mubr.msk.bf16.gmra.mrb[4].mxu1 %vm333_vm3, %v5088_v38  ;;  %360 = vst.msk [vmem:[#allocation2 + $0x151] sm:$0xff] %vm333_vm3, %v326_v58  ;;  %361 = vst.msk [vmem:[#allocation2 + $0x159] sm:$0xff] %vm333_vm3, %v327_v59  ;;  %v1539_v0 = vld [vmem:[#allocation2 + $0xc1] sm:$0xff]  ;;  %v1540_v1 = vld [vmem:[#allocation2 + $0xc9] sm:$0xff] }
  0x53   : > { %4082 = vmatprep.mubr.msk.bf16.mxu1 %vm333_vm3, %v5101_v44  ;;  %4223 = vmatmul.mubr.msk.bf16.gmra.mrb[4].mxu0 %vm333_vm3, %v5101_v44  ;;  %v5153_v3 = vld [vmem:[%s5895_s1 + $0x20] sm:$0xff]   ;;  %v5156_v7 = vpack.c.bf16 %v1540_v1, %v1539_v0  ;;  %v438_v11 = vld [vmem:[#allocation2 + $0xf1] sm:$0xff]  ;;  %v4738_v25 = vld [vmem:[%s5895_s1 + $0x68] sm:$0xff]  }
  0x54   : > { %4226 = vmatprep.mubr.msk.bf16.mxu0 %vm333_vm3, %v5103_v45  ;;  %v1831_v5 = vld [vmem:[#allocation2 + $0x1a] sm:$0xff]  ;;  %v1832_v6 = vld [vmem:[#allocation2 + $0x22] sm:$0xff]  ;;  %4142 = vmatprep.subr.bf16.mxu1 %v5153_v3  ;;  %v1833_v13 = vld [vmem:[#allocation2 + $0x32] sm:$0xff] }
  0x55   : > { %v5158_v8 = vpack.c.bf16 %v1832_v6, %v1831_v5  ;;  %v436_v9 = vld [vmem:[#allocation2 + $0xd9] sm:$0xff]  ;;  %v437_v10 = vld [vmem:[#allocation2 + $0xe1] sm:$0xff]  ;;  %v1835_v16 = vld [vmem:[#allocation2 + $0x4a] sm:$0xff] }
  0x56   : > { %v439_v12 = vld [vmem:[#allocation2 + $0xf9] sm:$0xff]  ;;  %v5168_v15 = vpack.c.bf16 %v437_v10, %v436_v9  ;;  %v330_v21 = vld [vmem:[%s4953_s24 + $0xf0] sm:$0xff]  ;;  %v442_v26 = vld [vmem:[#allocation2 + $0x121] sm:$0xff] }
  0x57   : > { %v1834_v14 = vld [vmem:[#allocation2 + $0x3a] sm:$0xff]  ;;  %v1836_v17 = vld [vmem:[#allocation2 + $0x52] sm:$0xff]  ;;  %v5170_v18 = vpack.c.bf16 %v439_v12, %v438_v11  ;;  %v440_v23 = vld [vmem:[#allocation2 + $0x109] sm:$0xff]  ;;  %364 = vst.msk [vmem:[#allocation2 + $0x181] sm:$0xff] %vm333_vm3, %v330_v21 }
  0x58   : > { %v5172_v19 = vpack.c.bf16 %v1834_v14, %v1833_v13  ;;  %v5174_v20 = vpack.c.bf16 %v1836_v17, %v1835_v16  ;;  %v331_v22 = vld [vmem:[%s4953_s24 + $0xf8] sm:$0xff]  ;;  %v443_v27 = vld [vmem:[#allocation2 + $0x129] sm:$0xff]  ;;  %v445_v40 = vld [vmem:[#allocation2 + $0x141] sm:$0xff] }
  0x59   : > { %v441_v24 = vld [vmem:[#allocation2 + $0x111] sm:$0xff]  ;;  %365 = vst.msk [vmem:[#allocation2 + $0x189] sm:$0xff] %vm333_vm3, %v331_v22  ;;  %v1837_v28 = vld [vmem:[#allocation2 + $0x62] sm:$0xff]  ;;  %v1839_v31 = vld [vmem:[#allocation2 + $0x7a] sm:$0xff]  ;;  %v5199_v35 = vpack.c.bf16 %v443_v27, %v442_v26 }
  0x5a   : > { %4083 = vmatmul.mubr.msk.bf16.gmra.mrb[8].mxu1 %vm333_vm3, %v5103_v45  ;;  %v1838_v29 = vld [vmem:[#allocation2 + $0x6a] sm:$0xff]  ;;  %v5192_v30 = vpack.c.bf16 %v441_v24, %v440_v23  ;;  %v1840_v32 = vld [vmem:[#allocation2 + $0x82] sm:$0xff]  ;;  %v444_v39 = vld [vmem:[#allocation2 + $0x139] sm:$0xff] }
  0x5b   : > { %4086 = vmatprep.mubr.msk.bf16.mxu1 %vm333_vm3, %v5136_v62  ;;  %4227 = vmatmul.mubr.msk.bf16.gmra.mrb[8].mxu0 %vm333_vm3, %v5136_v62  ;;  %v5197_v33 = vld [vmem:[%s5895_s1 + $0x70] sm:$0xff]   ;;  %v5201_v36 = vpack.c.bf16 %v1838_v29, %v1837_v28  ;;  %v5203_v37 = vpack.c.bf16 %v1840_v32, %v1839_v31  ;;  %v1842_v46 = vld [vmem:[#allocation2 + $0x9a] sm:$0xff]  ;;  %v5214_v48 = vpack.c.bf16 %v445_v40, %v444_v39  ;;  %v367_v56 = vld [vmem:[#allocation2 + $0x8] sm:$0xff] }
  0x5c   : > { %4230 = vmatprep.mubr.msk.bf16.mxu0 %vm333_vm3, %v5140_v63  ;;  %v1841_v41 = vld [vmem:[#allocation2 + $0x92] sm:$0xff]  ;;  %v1843_v47 = vld [vmem:[#allocation2 + $0xaa] sm:$0xff]  ;;  %v366_v55 = vld [vmem:[#allocation2] sm:$0xff] }
  0x5d   : > { %v446_v42 = vld [vmem:[#allocation2 + $0x151] sm:$0xff]  ;;  %v5218_v51 = vpack.c.bf16 %v1842_v46, %v1841_v41  ;;  %v448_v53 = vld [vmem:[#allocation2 + $0x169] sm:$0xff]  ;;  %v1847_v60 = vld [vmem:[#allocation2 + $0xda] sm:$0xff]  ;;  %v398_v0 = vpack.c.bf16 %v367_v56, %v366_v55 }
  0x5e   : > { %v1844_v49 = vld [vmem:[#allocation2 + $0xb2] sm:$0xff]  ;;  %v1845_v57 = vld [vmem:[#allocation2 + $0xc2] sm:$0xff]  ;;  %v1846_v58 = vld [vmem:[#allocation2 + $0xca] sm:$0xff] }
  0x5f   : > { %v5220_v52 = vpack.c.bf16 %v1844_v49, %v1843_v47  ;;  %v449_v54 = vld [vmem:[#allocation2 + $0x171] sm:$0xff]  ;;  %v1848_v61 = vld [vmem:[#allocation2 + $0xe2] sm:$0xff]  ;;  %v5232_v1 = vpack.c.bf16 %v1846_v58, %v1845_v57  ;;  %v1850_v13 = vld [vmem:[#allocation2 + $0xfa] sm:$0xff] }
  0x60   : > { %v5230_v59 = vpack.c.bf16 %v449_v54, %v448_v53  ;;  %v5234_v5 = vpack.c.bf16 %v1848_v61, %v1847_v60  ;;  %v368_v6 = vld [vmem:[#allocation2 + $0x18] sm:$0xff]  ;;  %v369_v9 = vld [vmem:[#allocation2 + $0x20] sm:$0xff]  ;;  %v370_v10 = vld [vmem:[#allocation2 + $0x30] sm:$0xff] }
  0x61   : > { %v371_v11 = vld [vmem:[#allocation2 + $0x38] sm:$0xff]  ;;  %v5243_v14 = vpack.c.bf16 %v369_v9, %v368_v6  ;;  %v1851_v16 = vld [vmem:[#allocation2 + $0x10a] sm:$0xff]  ;;  %v374_v27 = vld [vmem:[#allocation2 + $0x60] sm:$0xff] }
  0x62   : > { %4087 = vmatmul.mubr.msk.bf16.gmra.mrb[12].mxu1 %vm333_vm3, %v5140_v63  ;;  %v1849_v12 = vld [vmem:[#allocation2 + $0xf2] sm:$0xff]  ;;  %v5245_v21 = vpack.c.bf16 %v371_v11, %v370_v10  ;;  %v4739_v23 = vld [vmem:[%s5895_s1 + $0x28] sm:$0xff]   ;;  %v1855_v39 = vld [vmem:[#allocation2 + $0x13a] sm:$0xff] }
  0x63   : > { %4090 = vmatprep.mubr.msk.bf16.mxu1 %vm333_vm3, %v5156_v7  ;;  %4231 = vmatmul.mubr.msk.bf16.gmra.mrb[12].mxu0 %vm333_vm3, %v5156_v7  ;;  %v1852_v17 = vld [vmem:[#allocation2 + $0x112] sm:$0xff]  ;;  %v5247_v22 = vpack.c.bf16 %v1850_v13, %v1849_v12  ;;  %v375_v28 = vld [vmem:[#allocation2 + $0x68] sm:$0xff]  ;;  %v377_v47 = vld [vmem:[#allocation2 + $0x80] sm:$0xff] }
  0x64   : > { %4254 = vmatprep.mubr.msk.bf16.mxu0 %vm333_vm3, %v5158_v8  ;;  %v5252_v24 = vpack.c.bf16 %v1852_v17, %v1851_v16  ;;  %v373_v26 = vld [vmem:[#allocation2 + $0x50] sm:$0xff]  ;;  %v1856_v40 = vld [vmem:[#allocation2 + $0x142] sm:$0xff]  ;;  %v5270_v41 = vpack.c.bf16 %v375_v28, %v374_v27  ;;  %v376_v46 = vld [vmem:[#allocation2 + $0x78] sm:$0xff] }
  0x65   : > { %v5264_v29 = vld [vmem:[%s5895_s1 + $0x30] sm:$0xff]   ;;  %v379_v53 = vld [vmem:[#allocation2 + $0x98] sm:$0xff]  ;;  %v5285_v56 = vpack.c.bf16 %v377_v47, %v376_v46  ;;  %v380_v6 = vld [vmem:[#allocation2 + $0xa8] sm:$0xff] }
  0x66   : > { %v1854_v31 = vld [vmem:[#allocation2 + $0x12a] sm:$0xff]  ;;  %v1857_v54 = vld [vmem:[#allocation2 + $0x152] sm:$0xff]  ;;  %v1858_v55 = vld [vmem:[#allocation2 + $0x15a] sm:$0xff] }
  0x67   : > { %v378_v49 = vld [vmem:[#allocation2 + $0x90] sm:$0xff]  ;;  %v5289_v61 = vpack.c.bf16 %v1858_v55, %v1857_v54  ;;  %v382_v10 = vld [vmem:[#allocation2 + $0xc0] sm:$0xff]  ;;  %v383_v11 = vld [vmem:[#allocation2 + $0xc8] sm:$0xff] }
  0x68   : > { %v1859_v57 = vld [vmem:[#allocation2 + $0x16a] sm:$0xff]  ;;  %v1860_v58 = vld [vmem:[#allocation2 + $0x172] sm:$0xff]  ;;  %v5287_v60 = vpack.c.bf16 %v379_v53, %v378_v49  ;;  %v1861_v12 = vld [vmem:[#allocation2 + $0x182] sm:$0xff]  ;;  %v5303_v17 = vpack.c.bf16 %v383_v11, %v382_v10 }
  0x69   : > { %v381_v9 = vld [vmem:[#allocation2 + $0xb0] sm:$0xff]  ;;  %v387_v28 = vld [vmem:[#allocation2 + $0xf8] sm:$0xff]  ;;  %v390_v47 = vld [vmem:[#allocation2 + $0x120] sm:$0xff] }
  0x6a   : > { %4091 = vmatmul.mubr.msk.bf16.gmra.mrb[16].mxu1 %vm333_vm3, %v5168_v15  ;;  %v1862_v13 = vld [vmem:[#allocation2 + $0x18a] sm:$0xff]  ;;  %v5301_v16 = vpack.c.bf16 %v381_v9, %v380_v6  ;;  %v4744_v54 = vld [vmem:[%s5895_s1 + $0x80] sm:$0xff]   ;;  %v395_v6 = vld [vmem:[#allocation2 + $0x158] sm:$0xff] }
  0x6b   : > { %4094 = vmatprep.mubr.msk.bf16.mxu1 %vm333_vm3, %v5170_v18  ;;  %4255 = vmatmul.mubr.msk.bf16.vlgmr.msra.gmra.mrb[0].mxu0 %vm333_vm3, %v5172_v19  ;;  %v386_v27 = vld [vmem:[#allocation2 + $0xf0] sm:$0xff]  ;;  %v391_v49 = vld [vmem:[#allocation2 + $0x128] sm:$0xff] }
  0x6c   : > { %4287 = vmatpush3.bf16.msra.mxu0 %v5099_v43  ;;  %4258 = vmatprep.mubr.msk.bf16.mxu0 %vm333_vm3, %v5174_v20  ;;  %v447_v43 = vld [vmem:[#allocation2 + $0x159] sm:$0xff]  ;;  %v389_v46 = vld [vmem:[#allocation2 + $0x110] sm:$0xff]  ;;  %v5336_v55 = vpack.c.bf16 %v391_v49, %v390_v47  ;;  %v396_v11 = vld [vmem:[#allocation2 + $0x168] sm:$0xff] }
  0x6d   : > { %4288 = vmatprep.subr.bf16.mxu0 %v4738_v25  ;;  %v5216_v50 = vpack.c.bf16 %v447_v43, %v446_v42  ;;  %v5275_v43 = vpack.c.bf16 %v1856_v40, %v1855_v39  ;;  %v4742_v39 = vld [vmem:[%s5895_s1 + $0x78] sm:$0xff]   ;;  %v388_v40 = vld [vmem:[#allocation2 + $0x108] sm:$0xff] }
  0x6e   : > { %v5331_v53 = vpack.c.bf16 %v389_v46, %v388_v40  ;;  %v2168_v40 = vld [vmem:[#allocation2 + $0x198] sm:$0xff]  ;;  %v2169_v46 = vld [vmem:[#allocation2 + $0x1a0] sm:$0xff]  ;;  %v4745_v49 = vld [vmem:[%s5895_s1 + $0x88] sm:$0xff]  }
  0x6f   : > { %v2185_v47 = vpack.c.bf16 %v2169_v46, %v2168_v40 }
  0x70   : > { %4289 = vmatpush3.bf16.msra.mxu0 %v4738_v25  ;;  %v372_v25 = vld [vmem:[#allocation2 + $0x48] sm:$0xff] }
  0x71   : > { %4322 = vmatprep.subr.bf16.mxu0 %v5197_v33  ;;  %v5268_v32 = vpack.c.bf16 %v373_v26, %v372_v25  ;;  %v384_v25 = vld [vmem:[#allocation2 + $0xd8] sm:$0xff]  ;;  %v385_v26 = vld [vmem:[#allocation2 + $0xe0] sm:$0xff] }
  0x72   : > { %4095 = vmatmul.mubr.msk.bf16.gmra.mrb[20].mxu1 %vm333_vm3, %v5192_v30 }
  0x73   : > { %4098 = vmatprep.mubr.msk.bf16.mxu1 %vm333_vm3, %v5199_v35  ;;  %4259 = vmatmul.mubr.msk.bf16.gmra.mrb[4].mxu0 %vm333_vm3, %v5201_v36 }
  0x74   : > { %4262 = vmatprep.mubr.msk.bf16.mxu0 %vm333_vm3, %v5203_v37 }
  0x7a   : > { %4099 = vmatmul.mubr.msk.bf16.gmra.mrb[24].mxu1 %vm333_vm3, %v5214_v48 }
  0x7b   : > { %4102 = vmatprep.mubr.msk.bf16.mxu1 %vm333_vm3, %v5216_v50  ;;  %4263 = vmatmul.mubr.msk.bf16.gmra.mrb[8].mxu0 %vm333_vm3, %v5218_v51 }
  0x7c   : > { %4266 = vmatprep.mubr.msk.bf16.mxu0 %vm333_vm3, %v5220_v52 }
  0x82   : > { %4103 = vmatmul.mubr.msk.bf16.gmra.mrb[28].mxu1 %vm333_vm3, %v5230_v59 }
  0x83   : > { %4110 = vmatprep.mubr.msk.bf16.mxu1 %vm333_vm3, %v398_v0  ;;  %4267 = vmatmul.mubr.msk.bf16.gmra.mrb[12].mxu0 %vm333_vm3, %v5232_v1  ;;  %v5291_v0 = vpack.c.bf16 %v1860_v58, %v1859_v57  ;;  %v393_v57 = vld [vmem:[#allocation2 + $0x140] sm:$0xff]  ;;  %v394_v58 = vld [vmem:[#allocation2 + $0x150] sm:$0xff] }
  0x84   : > { %4270 = vmatprep.mubr.msk.bf16.mxu0 %vm333_vm3, %v5234_v5  ;;  %v5348_v10 = vpack.c.bf16 %v395_v6, %v394_v58 }
  0x8a   : > { %4111 = vmatmul.mubr.msk.bf16.vlgmr.msra.gmra.mrb[0].mxu1 %vm333_vm3, %v5243_v14 }
  0x8b   : > { %4143 = vmatpush3.bf16.msra.mxu1 %v5153_v3  ;;  %4114 = vmatprep.mubr.msk.bf16.mxu1 %vm333_vm3, %v5245_v21  ;;  %v1853_v3 = vld [vmem:[#allocation2 + $0x122] sm:$0xff] }
  0x8c   : > { %4271 = vmatmul.mubr.msk.bf16.gmra.mrb[16].mxu0 %vm333_vm3, %v5247_v22  ;;  %4144 = vmatprep.subr.bf16.mxu1 %v4739_v23  ;;  %v5272_v42 = vpack.c.bf16 %v1854_v31, %v1853_v3  ;;  %v5315_v3 = vpack.c.bf16 %v385_v26, %v384_v25  ;;  %v5317_v31 = vpack.c.bf16 %v387_v28, %v386_v27  ;;  %v914_v25 = vld [vmem:[#allocation2 + $0xa] sm:$0xff]  ;;  %v4743_v28 = vld [vmem:[%s5895_s1 + $0x38] sm:$0xff]  }
  0x8d   : > { %4274 = vmatprep.mubr.msk.bf16.mxu0 %vm333_vm3, %v5252_v24 }
  0x8f   : > { %4145 = vmatpush3.bf16.msra.mxu1 %v4739_v23  ;;  %v5305_v23 = vpack.c.bf16 %v1862_v13, %v1861_v12  ;;  %v397_v12 = vld [vmem:[#allocation2 + $0x170] sm:$0xff]  ;;  %v913_v13 = vld [vmem:[#allocation2 + $0x2] sm:$0xff] }
  0x90   : > { %4178 = vmatprep.subr.bf16.mxu1 %v5264_v29  ;;  %v5358_v26 = vpack.c.bf16 %v397_v12, %v396_v11  ;;  %v945_v27 = vpack.c.bf16 %v914_v25, %v913_v13 }
  0x92   : > { %4115 = vmatmul.mubr.msk.bf16.gmra.mrb[4].mxu1 %vm333_vm3, %v5268_v32 }
  0x93   : > { %4118 = vmatprep.mubr.msk.bf16.mxu1 %vm333_vm3, %v5270_v41 }
  0x94   : > { %4275 = vmatmul.mubr.msk.bf16.gmra.mrb[20].mxu0 %vm333_vm3, %v5272_v42 }
  0x95   : > { %4278 = vmatprep.mubr.msk.bf16.mxu0 %vm333_vm3, %v5275_v43 }
  0x9a   : > { %4119 = vmatmul.mubr.msk.bf16.gmra.mrb[8].mxu1 %vm333_vm3, %v5285_v56 }
  0x9b   : > { %4122 = vmatprep.mubr.msk.bf16.mxu1 %vm333_vm3, %v5287_v60 }
  0x9c   : > { %4279 = vmatmul.mubr.msk.bf16.gmra.mrb[24].mxu0 %vm333_vm3, %v5289_v61 }
  0x9d   : > { %4282 = vmatprep.mubr.msk.bf16.mxu0 %vm333_vm3, %v5291_v0 }
  0xa2   : > { %4123 = vmatmul.mubr.msk.bf16.gmra.mrb[12].mxu1 %vm333_vm3, %v5301_v16 }
  0xa3   : > { %4126 = vmatprep.mubr.msk.bf16.mxu1 %vm333_vm3, %v5303_v17 }
  0xa4   : > { %4283 = vmatmul.mubr.msk.bf16.gmra.mrb[28].mxu0 %vm333_vm3, %v5305_v23 }
  0xa5   : > { %4290 = vmatprep.mubr.msk.bf16.mxu0 %vm333_vm3, %v5245_v21 }
  0xaa   : > { %4127 = vmatmul.mubr.msk.bf16.gmra.mrb[16].mxu1 %vm333_vm3, %v5315_v3 }
  0xab   : > { %4130 = vmatprep.mubr.msk.bf16.mxu1 %vm333_vm3, %v5317_v31 }
  0xac   : > { %4291 = vmatmul.mubr.msk.bf16.vlgmr.msra.gmra.mrb[0].mxu0 %vm333_vm3, %v5268_v32 }
  0xad   : > { %4323 = vmatpush3.bf16.msra.mxu0 %v5197_v33  ;;  %4294 = vmatprep.mubr.msk.bf16.mxu0 %vm333_vm3, %v5270_v41  ;;  %v392_v33 = vld [vmem:[#allocation2 + $0x138] sm:$0xff] }
  0xae   : > { %4324 = vmatprep.subr.bf16.mxu0 %v4742_v39  ;;  %v5346_v9 = vpack.c.bf16 %v393_v57, %v392_v33 }
  0xb1   : > { %4325 = vmatpush3.bf16.msra.mxu0 %v4742_v39 }
  0xb2   : > { %4131 = vmatmul.mubr.msk.bf16.gmra.mrb[20].mxu1 %vm333_vm3, %v5331_v53  ;;  %4358 = vmatprep.subr.bf16.mxu0 %v4744_v54 }
  0xb3   : > { %4134 = vmatprep.mubr.msk.bf16.mxu1 %vm333_vm3, %v5336_v55 }
  0xb4   : > { %4295 = vmatmul.mubr.msk.bf16.gmra.mrb[4].mxu0 %vm333_vm3, %v5285_v56 }
  0xb5   : > { %4298 = vmatprep.mubr.msk.bf16.mxu0 %vm333_vm3, %v5287_v60 }
  0xba   : > { %4135 = vmatmul.mubr.msk.bf16.gmra.mrb[24].mxu1 %vm333_vm3, %v5346_v9 }
  0xbb   : > { %4138 = vmatprep.mubr.msk.bf16.mxu1 %vm333_vm3, %v5348_v10 }
  0xbc   : > { %4299 = vmatmul.mubr.msk.bf16.gmra.mrb[8].mxu0 %vm333_vm3, %v5301_v16 }
  0xbd   : > { %4302 = vmatprep.mubr.msk.bf16.mxu0 %vm333_vm3, %v5303_v17 }
  0xc2   : > { %4139 = vmatmul.mubr.msk.bf16.gmra.mrb[28].mxu1 %vm333_vm3, %v5358_v26 }
  0xc3   : > { %4146 = vmatprep.mubr.msk.bf16.mxu1 %vm333_vm3, %v945_v27 }
  0xc4   : > { %4303 = vmatmul.mubr.msk.bf16.gmra.mrb[12].mxu0 %vm333_vm3, %v5315_v3 }
  0xc5   : > { %4306 = vmatprep.mubr.msk.bf16.mxu0 %vm333_vm3, %v5317_v31 }
  0xca   : > { %4147 = vmatmul.mubr.msk.bf16.vlgmr.msra.gmra.mrb[0].mxu1 %vm333_vm3, %v5158_v8  ;;  %v2166_v8 = vld [vmem:[#allocation2 + $0x180] sm:$0xff] }
  0xcb   : > { %4179 = vmatpush3.bf16.msra.mxu1 %v5264_v29  ;;  %4150 = vmatprep.mubr.msk.bf16.mxu1 %vm333_vm3, %v5172_v19  ;;  %v2167_v29 = vld [vmem:[#allocation2 + $0x188] sm:$0xff] }
  0xcc   : > { %4307 = vmatmul.mubr.msk.bf16.gmra.mrb[16].mxu0 %vm333_vm3, %v5331_v53  ;;  %4180 = vmatprep.subr.bf16.mxu1 %v4743_v28  ;;  %v5388_v39 = vpack.c.bf16 %v2167_v29, %v2166_v8 }
  0xcd   : > { %4310 = vmatprep.mubr.msk.bf16.mxu0 %vm333_vm3, %v5336_v55 }
  0xcf   : > { %4181 = vmatpush3.bf16.msra.mxu1 %v4743_v28 }
  0xd0   : > { %4394 = vmatprep.subr.bf16.mxu1 %v5021_v2 }
  0xd2   : > { %4151 = vmatmul.mubr.msk.bf16.gmra.mrb[4].mxu1 %vm333_vm3, %v5174_v20 }
  0xd3   : > { %4154 = vmatprep.mubr.msk.bf16.mxu1 %vm333_vm3, %v5201_v36 }
  0xd4   : > { %4311 = vmatmul.mubr.msk.bf16.gmra.mrb[20].mxu0 %vm333_vm3, %v5346_v9 }
  0xd5   : > { %4314 = vmatprep.mubr.msk.bf16.mxu0 %vm333_vm3, %v5348_v10 }
  0xda   : > { %4155 = vmatmul.mubr.msk.bf16.gmra.mrb[8].mxu1 %vm333_vm3, %v5203_v37 }
  0xdb   : > { %4158 = vmatprep.mubr.msk.bf16.mxu1 %vm333_vm3, %v5218_v51 }
  0xdc   : > { %4315 = vmatmul.mubr.msk.bf16.gmra.mrb[24].mxu0 %vm333_vm3, %v5358_v26 }
  0xdd   : > { %4318 = vmatprep.mubr.msk.bf16.mxu0 %vm333_vm3, %v5388_v39 }
  0xe2   : > { %4159 = vmatmul.mubr.msk.bf16.gmra.mrb[12].mxu1 %vm333_vm3, %v5220_v52 }
  0xe3   : > { %4162 = vmatprep.mubr.msk.bf16.mxu1 %vm333_vm3, %v5232_v1 }
  0xe4   : > { %4319 = vmatmul.mubr.msk.bf16.gmra.mrb[28].mxu0 %vm333_vm3, %v2185_v47 }
  0xe5   : > { %4326 = vmatprep.mubr.msk.bf16.mxu0 %vm333_vm3, %v5083_v34  ;;  %v2473_v34 = vld [vmem:[#allocation2 + $0x189] sm:$0xff] }
  0xea   : > { %4163 = vmatmul.mubr.msk.bf16.gmra.mrb[16].mxu1 %vm333_vm3, %v5234_v5 }
  0xeb   : > { %4166 = vmatprep.mubr.msk.bf16.mxu1 %vm333_vm3, %v5247_v22 }
  0xec   : > { %4327 = vmatmul.mubr.msk.bf16.vlgmr.msra.gmra.mrb[0].mxu0 %vm333_vm3, %v5088_v38 }
  0xed   : > { %4359 = vmatpush3.bf16.msra.mxu0 %v4744_v54  ;;  %4330 = vmatprep.mubr.msk.bf16.mxu0 %vm333_vm3, %v5101_v44  ;;  %v2475_v44 = vld [vmem:[#allocation2 + $0x1a1] sm:$0xff] }
  0xee   : > { %4360 = vmatprep.subr.bf16.mxu0 %v4745_v49 }
  0xf1   : > { %4361 = vmatpush3.bf16.msra.mxu0 %v4745_v49 }
  0xf2   : > { %4167 = vmatmul.mubr.msk.bf16.gmra.mrb[20].mxu1 %vm333_vm3, %v5252_v24 }
  0xf3   : > { %4170 = vmatprep.mubr.msk.bf16.mxu1 %vm333_vm3, %v5272_v42 }
  0xf4   : > { %4331 = vmatmul.mubr.msk.bf16.gmra.mrb[4].mxu0 %vm333_vm3, %v5103_v45 }
  0xf5   : > { %4334 = vmatprep.mubr.msk.bf16.mxu0 %vm333_vm3, %v5136_v62  ;;  %v1541_v62 = vld [vmem:[#allocation2 + $0xd9] sm:$0xff] }
  0xfa   : > { %4171 = vmatmul.mubr.msk.bf16.gmra.mrb[24].mxu1 %vm333_vm3, %v5275_v43 }
  0xfb   : > { %4174 = vmatprep.mubr.msk.bf16.mxu1 %vm333_vm3, %v5289_v61 }
  0xfc   : > { %4335 = vmatmul.mubr.msk.bf16.gmra.mrb[8].mxu0 %vm333_vm3, %v5140_v63  ;;  %v1542_v63 = vld [vmem:[#allocation2 + $0xe1] sm:$0xff] }
  0xfd   : > { %4338 = vmatprep.mubr.msk.bf16.mxu0 %vm333_vm3, %v5156_v7  ;;  %v1565_v7 = vpack.c.bf16 %v1542_v63, %v1541_v62 }
 0x102   : > { %4175 = vmatmul.mubr.msk.bf16.gmra.mrb[28].mxu1 %vm333_vm3, %v5291_v0 }
 0x103   : > { %4182 = vmatprep.mubr.msk.bf16.mxu1 %vm333_vm3, %v5243_v14 }
 0x104   : > { %4339 = vmatmul.mubr.msk.bf16.gmra.mrb[12].mxu0 %vm333_vm3, %v5168_v15  ;;  %v1545_v15 = vld [vmem:[#allocation2 + $0x109] sm:$0xff] }
 0x105   : > { %4342 = vmatprep.mubr.msk.bf16.mxu0 %vm333_vm3, %v5170_v18 }
 0x10a   : > { %4183 = vmatmul.mubr.msk.bf16.vlgmr.msra.gmra.mrb[0].mxu1 %vm333_vm3, %v5245_v21 }
 0x10b   : > { %4396 = vmatpush3.bf16.msra.mxu1 %v5021_v2  ;;  %4186 = vmatprep.mubr.msk.bf16.mxu1 %vm333_vm3, %v5268_v32  ;;  %v2472_v2 = vld [vmem:[#allocation2 + $0x181] sm:$0xff] }
 0x10c   : > { %4343 = vmatmul.mubr.msk.bf16.gmra.mrb[16].mxu0 %vm333_vm3, %v5192_v30  ;;  %4395 = vmatprep.subr.bf16.mxu1 %v5030_v4  ;;  %v2490_v38 = vpack.c.bf16 %v2473_v34, %v2472_v2  ;;  %v2781_v30 = vld [vmem:[#allocation2 + $0x1a2] sm:$0xff] }
 0x10d   : > { %4346 = vmatprep.mubr.msk.bf16.mxu0 %vm333_vm3, %v5199_v35 }
 0x10f   : > { %4397 = vmatpush3.bf16.msra.mxu1 %v5030_v4  ;;  %v2474_v4 = vld [vmem:[#allocation2 + $0x199] sm:$0xff] }
 0x110   : > { %v2491_v45 = vpack.c.bf16 %v2475_v44, %v2474_v4 }
 0x112   : > { %4187 = vmatmul.mubr.msk.bf16.gmra.mrb[4].mxu1 %vm333_vm3, %v5270_v41 }
 0x113   : > { %4190 = vmatprep.mubr.msk.bf16.mxu1 %vm333_vm3, %v5285_v56 }
 0x114   : > { %4347 = vmatmul.mubr.msk.bf16.gmra.mrb[20].mxu0 %vm333_vm3, %v5214_v48 }
 0x115   : > { %4350 = vmatprep.mubr.msk.bf16.mxu0 %vm333_vm3, %v5216_v50 }
 0x11a   : > { %4191 = vmatmul.mubr.msk.bf16.gmra.mrb[8].mxu1 %vm333_vm3, %v5287_v60 }
 0x11b   : > { %4194 = vmatprep.mubr.msk.bf16.mxu1 %vm333_vm3, %v5301_v16 }
 0x11c   : > { %4351 = vmatmul.mubr.msk.bf16.gmra.mrb[24].mxu0 %vm333_vm3, %v5230_v59 }
 0x11d   : > { %4354 = vmatprep.mubr.msk.bf16.mxu0 %vm333_vm3, %v2490_v38 }
 0x122   : > { %4195 = vmatmul.mubr.msk.bf16.gmra.mrb[12].mxu1 %vm333_vm3, %v5303_v17 }
 0x123   : > { %4198 = vmatprep.mubr.msk.bf16.mxu1 %vm333_vm3, %v5315_v3 }
 0x124   : > { %4355 = vmatmul.mubr.msk.bf16.gmra.mrb[28].mxu0 %vm333_vm3, %v2491_v45 }
 0x125   : > { %4362 = vmatprep.mubr.msk.bf16.mxu0 %vm333_vm3, %v5172_v19  ;;  %v1546_v19 = vld [vmem:[#allocation2 + $0x111] sm:$0xff] }
 0x12a   : > { %4199 = vmatmul.mubr.msk.bf16.gmra.mrb[16].mxu1 %vm333_vm3, %v5317_v31 }
 0x12b   : > { %4202 = vmatprep.mubr.msk.bf16.mxu1 %vm333_vm3, %v5331_v53 }
 0x12c   : > { %4363 = vmatmul.mubr.msk.bf16.vlgmr.msra.gmra.mrb[0].mxu0 %vm333_vm3, %v5174_v20  ;;  %v1567_v20 = vpack.c.bf16 %v1546_v19, %v1545_v15 }
 0x12d   : > { %4366 = vmatprep.mubr.msk.bf16.mxu0 %vm333_vm3, %v5201_v36 }
 0x132   : > { %4203 = vmatmul.mubr.msk.bf16.gmra.mrb[20].mxu1 %vm333_vm3, %v5336_v55 }
 0x133   : > { %4206 = vmatprep.mubr.msk.bf16.mxu1 %vm333_vm3, %v5346_v9 }
 0x134   : > { %4367 = vmatmul.mubr.msk.bf16.gmra.mrb[4].mxu0 %vm333_vm3, %v5203_v37 }
 0x135   : > { %4370 = vmatprep.mubr.msk.bf16.mxu0 %vm333_vm3, %v5218_v51 }
 0x13a   : > { %4207 = vmatmul.mubr.msk.bf16.gmra.mrb[24].mxu1 %vm333_vm3, %v5348_v10 }
 0x13b   : > { %4210 = vmatprep.mubr.msk.bf16.mxu1 %vm333_vm3, %v5358_v26 }
 0x13c   : > { %4371 = vmatmul.mubr.msk.bf16.gmra.mrb[8].mxu0 %vm333_vm3, %v5220_v52 }
 0x13d   : > { %4374 = vmatprep.mubr.msk.bf16.mxu0 %vm333_vm3, %v5232_v1 }
 0x142   : > { %4211 = vmatmul.mubr.msk.bf16.gmra.mrb[28].mxu1 %vm333_vm3, %v5388_v39 }
 0x143   : > { %4234 = vmatprep.mubr.msk.bf16.mxu1 %vm333_vm3, %v1565_v7 }
 0x144   : > { %4375 = vmatmul.mubr.msk.bf16.gmra.mrb[12].mxu0 %vm333_vm3, %v5234_v5 }
 0x145   : > { %4378 = vmatprep.mubr.msk.bf16.mxu0 %vm333_vm3, %v5247_v22 }
 0x14a   : > { %4235 = vmatmul.mubr.msk.bf16.vlgmr.msra.gmra.mrb[16].mxu1 %vm333_vm3, %v5170_v18  ;;  %v2780_v18 = vld [vmem:[#allocation2 + $0x19a] sm:$0xff] }
 0x14b   : > { %4238 = vmatprep.mubr.msk.bf16.mxu1 %vm333_vm3, %v1567_v20 }
 0x14c   : > { %4379 = vmatmul.mubr.msk.bf16.gmra.mrb[16].mxu0 %vm333_vm3, %v5252_v24 }
 0x14d   : > { %4382 = vmatprep.mubr.msk.bf16.mxu0 %vm333_vm3, %v5272_v42 }
 0x152   : > { %4239 = vmatmul.mubr.msk.bf16.gmra.mrb[20].mxu1 %vm333_vm3, %v5199_v35  ;;  %v2797_v35 = vpack.c.bf16 %v2781_v30, %v2780_v18 }
 0x153   : > { %4242 = vmatprep.mubr.msk.bf16.mxu1 %vm333_vm3, %v5214_v48 }
 0x154   : > { %4383 = vmatmul.mubr.msk.bf16.gmra.mrb[20].mxu0 %vm333_vm3, %v5275_v43 }
 0x155   : > { %4386 = vmatprep.mubr.msk.bf16.mxu0 %vm333_vm3, %v5289_v61 }
 0x15a   : > { %4243 = vmatmul.mubr.msk.bf16.gmra.mrb[24].mxu1 %vm333_vm3, %v5216_v50 }
 0x15b   : > { %4246 = vmatprep.mubr.msk.bf16.mxu1 %vm333_vm3, %v5230_v59 }
 0x15c   : > { %4387 = vmatmul.mubr.msk.bf16.gmra.mrb[24].mxu0 %vm333_vm3, %v5291_v0 }
 0x15d   : > { %4390 = vmatprep.mubr.msk.bf16.mxu0 %vm333_vm3, %v5305_v23 }
 0x162   : > { %4247 = vmatmul.mubr.msk.bf16.gmra.mrb[28].mxu1 %vm333_vm3, %v2490_v38 }
 0x164   : > { %4391 = vmatmul.mubr.msk.bf16.gmra.mrb[28].mxu0 %vm333_vm3, %v2797_v35 }
 0x1dd   : > { %v4184_v36 = vpop.f32.mrb[0].mxu1 }
 0x1de   : > { %v1366_v37 = vpop.f32.mrb[1].mxu1 }
 0x1df   : > { %v4185_v48 = vpop.f32.mrb[2].mxu1 }
 0x1e0   : > { %v1369_v50 = vpop.f32.mrb[3].mxu1 }
 0x1e5   : > { %v4188_v51 = vpop.f32.mrb[4].mxu1 }
 0x1e6   : > { %v1382_v52 = vpop.f32.mrb[5].mxu1 }
 0x1e7   : > { %v4189_v59 = vpop.f32.mrb[6].mxu1 }
 0x1e8   : > { %v1385_v1 = vpop.f32.mrb[7].mxu1 }
 0x1ed   : > { %v5529_v5 = vpop.f32.mrb[8].mxu1 }
 0x1ee   : > { %v5531_v14 = vpop.f32.mrb[9].mxu1 }
 0x1ef   : > { %v5533_v21 = vpop.f32.mrb[10].mxu1 }
 0x1f0   : > { %v5535_v22 = vpop.f32.mrb[11].mxu1 }
 0x1f5   : > { %v5537_v24 = vpop.f32.mrb[12].mxu1 }
 0x1f6   : > { %v5539_v32 = vpop.f32.mrb[13].mxu1 }
 0x1f7   : > { %v5541_v41 = vpop.f32.mrb[14].mxu1 }
 0x1f8   : > { %v5543_v42 = vpop.f32.mrb[15].mxu1 }
 0x1ff   : > { %v4364_v43 = vpop.f32.mrb[0].mxu0 }
 0x200   : > { %v4398_v56 = vadd.f32 %v4364_v43, %v4184_v36  ;;  %v2897_v60 = vpop.f32.mrb[1].mxu0 }
 0x201   : > { %v4399_v61 = vadd.f32 %v2897_v60, %v1366_v37  ;;  %v4365_v0 = vpop.f32.mrb[2].mxu0 }
 0x202   : > { %3060 = vst.msk [vmem:[%s5546_s11 + $0x10] sm:$0xff] %vm333_vm3, %v4398_v56  ;;  %v4400_v16 = vadd.f32 %v4365_v0, %v4185_v48  ;;  %v2900_v17 = vpop.f32.mrb[3].mxu0  ;;  %v3166_v31 = vmul.f32 %v4398_v56, %v4398_v56  ;;  %v3094_v58 = vsel %vm333_vm3, %v4398_v56, 0.0 }
 0x203   : > { %3058 = vst.msk [vmem:[%s5546_s11] sm:$0xff] %vm333_vm3, %v4399_v61  ;;  %v3164_v23 = vmul.f32 %v4399_v61, %v4399_v61  ;;  %v4401_v3 = vadd.f32 %v2900_v17, %v1369_v50  ;;  %v3091_v53 = vsel %vm333_vm3, %v4399_v61, 0.0 }
 0x204   : > { %3061 = vst.msk [vmem:[%s5546_s11 + $0x18] sm:$0xff] %vm333_vm3, %v4400_v16  ;;  %v3167_v33 = vmul.f32 %v4400_v16, %v4400_v16  ;;  %v3199_v26 = vsel %vm333_vm3, %v3166_v31, 0.0  ;;  %v3096_v27 = vsel %vm333_vm3, %v4400_v16, 0.0 }
 0x205   : > { %3059 = vst.msk [vmem:[%s5546_s11 + $0x8] sm:$0xff] %vm333_vm3, %v4401_v3  ;;  %v3092_v54 = vsel %vm333_vm3, %v4401_v3, 0.0  ;;  %v3165_v55 = vmul.f32 %v4401_v3, %v4401_v3  ;;  %v3196_v6 = vsel %vm333_vm3, %v3164_v23, 0.0 }
 0x206   : > { %v3093_v57 = vadd.f32 %v3092_v54, %v3091_v53  ;;  %v3201_v29 = vsel %vm333_vm3, %v3167_v33, 0.0 }
 0x207   : > { %v3197_v9 = vsel %vm333_vm3, %v3165_v55, 0.0  ;;  %v4368_v10 = vpop.f32.mrb[4].mxu0 }
 0x208   : > { %v3095_v11 = vadd.f32 %v3094_v58, %v3093_v57  ;;  %v3198_v12 = vadd.f32 %v3197_v9, %v3196_v6  ;;  %v4402_v13 = vadd.f32 %v4368_v10, %v4188_v51  ;;  %v2913_v25 = vpop.f32.mrb[5].mxu0 }
 0x209   : > { %v4403_v28 = vadd.f32 %v2913_v25, %v1382_v52  ;;  %v4369_v8 = vpop.f32.mrb[6].mxu0 }
 0x20a   : > { %v3200_v39 = vadd.f32 %v3199_v26, %v3198_v12  ;;  %3064 = vst.msk [vmem:[%s5546_s11 + $0x30] sm:$0xff] %vm333_vm3, %v4402_v13  ;;  %v3097_v40 = vadd.f32 %v3096_v27, %v3095_v11  ;;  %v2916_v46 = vpop.f32.mrb[7].mxu0  ;;  %v4404_v2 = vadd.f32 %v4369_v8, %v4189_v59  ;;  %v3170_v62 = vmul.f32 %v4402_v13, %v4402_v13 }
 0x20b   : > { %3062 = vst.msk [vmem:[%s5546_s11 + $0x20] sm:$0xff] %vm333_vm3, %v4403_v28  ;;  %v3098_v47 = vsel %vm333_vm3, %v4403_v28, 0.0  ;;  %v3168_v49 = vmul.f32 %v4403_v28, %v4403_v28  ;;  %v4405_v34 = vadd.f32 %v2916_v46, %v1385_v1  ;;  %v3102_v19 = vsel %vm333_vm3, %v4402_v13, 0.0 }
 0x20c   : > { %v3099_v38 = vadd.f32 %v3098_v47, %v3097_v40  ;;  %v3202_v4 = vadd.f32 %v3201_v29, %v3200_v39  ;;  %3065 = vst.msk [vmem:[%s5546_s11 + $0x38] sm:$0xff] %vm333_vm3, %v4404_v2  ;;  %v3171_v18 = vmul.f32 %v4404_v2, %v4404_v2  ;;  %v3104_v48 = vsel %vm333_vm3, %v4404_v2, 0.0 }
 0x20d   : > { %v3203_v44 = vsel %vm333_vm3, %v3168_v49, 0.0  ;;  %3063 = vst.msk [vmem:[%s5546_s11 + $0x28] sm:$0xff] %vm333_vm3, %v4405_v34  ;;  %v3100_v45 = vsel %vm333_vm3, %v4405_v34, 0.0  ;;  %v3169_v15 = vmul.f32 %v4405_v34, %v4405_v34  ;;  %v3207_v59 = vsel %vm333_vm3, %v3170_v62, 0.0 }
 0x20e   : > { %v3204_v63 = vadd.f32 %v3203_v44, %v3202_v4  ;;  %v3101_v7 = vadd.f32 %v3100_v45, %v3099_v38 }
 0x20f   : > { %v4372_v20 = vpop.f32.mrb[8].mxu0  ;;  %v3205_v35 = vsel %vm333_vm3, %v3169_v15, 0.0 }
 0x210   : > { %v3103_v30 = vadd.f32 %v3102_v19, %v3101_v7  ;;  %v4406_v36 = vadd.f32 %v4372_v20, %v5529_v5  ;;  %v2929_v37 = vpop.f32.mrb[9].mxu0  ;;  %v3206_v50 = vadd.f32 %v3205_v35, %v3204_v63 }
 0x211   : > { %v4407_v51 = vadd.f32 %v2929_v37, %v5531_v14  ;;  %v4373_v52 = vpop.f32.mrb[10].mxu0  ;;  %v3209_v14 = vsel %vm333_vm3, %v3171_v18, 0.0 }
 0x212   : > { %3068 = vst.msk [vmem:[%s5546_s11 + $0x50] sm:$0xff] %vm333_vm3, %v4406_v36  ;;  %v3105_v1 = vadd.f32 %v3104_v48, %v3103_v30  ;;  %v4408_v43 = vadd.f32 %v4373_v52, %v5533_v21  ;;  %v2932_v56 = vpop.f32.mrb[11].mxu0  ;;  %v3208_v60 = vadd.f32 %v3207_v59, %v3206_v50  ;;  %v3174_v31 = vmul.f32 %v4406_v36, %v4406_v36 }
 0x213   : > { %3066 = vst.msk [vmem:[%s5546_s11 + $0x40] sm:$0xff] %vm333_vm3, %v4407_v51  ;;  %v3106_v5 = vsel %vm333_vm3, %v4407_v51, 0.0  ;;  %v3172_v61 = vmul.f32 %v4407_v51, %v4407_v51  ;;  %v4409_v0 = vadd.f32 %v2932_v56, %v5535_v22  ;;  %v3110_v54 = vsel %vm333_vm3, %v4406_v36, 0.0 }
 0x214   : > { %v3107_v16 = vadd.f32 %v3106_v5, %v3105_v1  ;;  %3069 = vst.msk [vmem:[%s5546_s11 + $0x58] sm:$0xff] %vm333_vm3, %v4408_v43  ;;  %v3210_v17 = vadd.f32 %v3209_v14, %v3208_v60  ;;  %v3175_v57 = vmul.f32 %v4408_v43, %v4408_v43  ;;  %v3112_v10 = vsel %vm333_vm3, %v4408_v43, 0.0 }
 0x215   : > { %v3211_v23 = vsel %vm333_vm3, %v3172_v61, 0.0  ;;  %3067 = vst.msk [vmem:[%s5546_s11 + $0x48] sm:$0xff] %vm333_vm3, %v4409_v0  ;;  %v3108_v21 = vsel %vm333_vm3, %v4409_v0, 0.0  ;;  %v3173_v3 = vmul.f32 %v4409_v0, %v4409_v0  ;;  %v3215_v25 = vsel %vm333_vm3, %v3174_v31, 0.0 }
 0x216   : > { %v3109_v53 = vadd.f32 %v3108_v21, %v3107_v16  ;;  %v3212_v55 = vadd.f32 %v3211_v23, %v3210_v17 }
 0x217   : > { %v3213_v22 = vsel %vm333_vm3, %v3173_v3, 0.0  ;;  %v4376_v33 = vpop.f32.mrb[12].mxu0 }
 0x218   : > { %v3111_v58 = vadd.f32 %v3110_v54, %v3109_v53  ;;  %v4410_v6 = vadd.f32 %v4376_v33, %v5537_v24  ;;  %v2945_v9 = vpop.f32.mrb[13].mxu0  ;;  %v3214_v11 = vadd.f32 %v3213_v22, %v3212_v55 }
 0x219   : > { %v4411_v12 = vadd.f32 %v2945_v9, %v5539_v32  ;;  %v4377_v13 = vpop.f32.mrb[14].mxu0  ;;  %v3217_v32 = vsel %vm333_vm3, %v3175_v57, 0.0 }
 0x21a   : > { %3072 = vst.msk [vmem:[%s5546_s11 + $0x70] sm:$0xff] %vm333_vm3, %v4410_v6  ;;  %v3113_v26 = vadd.f32 %v3112_v10, %v3111_v58  ;;  %v4412_v27 = vadd.f32 %v4377_v13, %v5541_v41  ;;  %v2948_v28 = vpop.f32.mrb[15].mxu0  ;;  %v3216_v8 = vadd.f32 %v3215_v25, %v3214_v11  ;;  %v3178_v34 = vmul.f32 %v4410_v6, %v4410_v6 }
 0x21b   : > { %3070 = vst.msk [vmem:[%s5546_s11 + $0x60] sm:$0xff] %vm333_vm3, %v4411_v12  ;;  %v3114_v24 = vsel %vm333_vm3, %v4411_v12, 0.0  ;;  %v3176_v29 = vmul.f32 %v4411_v12, %v4411_v12  ;;  %v4413_v39 = vadd.f32 %v2948_v28, %v5543_v42  ;;  %v3118_v42 = vsel %vm333_vm3, %v4410_v6, 0.0 }
 0x21c   : > { %v3115_v40 = vadd.f32 %v3114_v24, %v3113_v26  ;;  %3073 = vst.msk [vmem:[%s5546_s11 + $0x78] sm:$0xff] %vm333_vm3, %v4412_v27  ;;  %v3218_v46 = vadd.f32 %v3217_v32, %v3216_v8  ;;  %v3179_v7 = vmul.f32 %v4412_v27, %v4412_v27  ;;  %v3120_v30 = vsel %vm333_vm3, %v4412_v27, 0.0 }
 0x21d   : > { %v3219_v47 = vsel %vm333_vm3, %v3176_v29, 0.0  ;;  %3071 = vst.msk [vmem:[%s5546_s11 + $0x68] sm:$0xff] %vm333_vm3, %v4413_v39  ;;  %v3116_v41 = vsel %vm333_vm3, %v4413_v39, 0.0  ;;  %v3177_v49 = vmul.f32 %v4413_v39, %v4413_v39  ;;  %v4236_v2 = vpop.f32.mrb[16].mxu1  ;;  %v3223_v48 = vsel %vm333_vm3, %v3178_v34, 0.0 }
 0x21e   : > { %v3117_v38 = vadd.f32 %v3116_v41, %v3115_v40  ;;  %v1736_v4 = vpop.f32.mrb[17].mxu1  ;;  %v3220_v44 = vadd.f32 %v3219_v47, %v3218_v46  ;;  %v3225_v60 = vsel %vm333_vm3, %v3179_v7, 0.0 }
 0x21f   : > { %v3221_v45 = vsel %vm333_vm3, %v3177_v49, 0.0  ;;  %v4380_v62 = vpop.f32.mrb[16].mxu0  ;;  %v4237_v63 = vpop.f32.mrb[18].mxu1 }
 0x220   : > { %v3119_v15 = vadd.f32 %v3118_v42, %v3117_v38  ;;  %v4414_v19 = vadd.f32 %v4380_v62, %v4236_v2  ;;  %v2961_v20 = vpop.f32.mrb[17].mxu0  ;;  %v1739_v18 = vpop.f32.mrb[19].mxu1  ;;  %v3222_v35 = vadd.f32 %v3221_v45, %v3220_v44 }
 0x221   : > { %v4415_v36 = vadd.f32 %v2961_v20, %v1736_v4  ;;  %v4381_v37 = vpop.f32.mrb[18].mxu0 }
 0x222   : > { %3076 = vst.msk [vmem:[%s5546_s11 + $0x90] sm:$0xff] %vm333_vm3, %v4414_v19  ;;  %v3121_v50 = vadd.f32 %v3120_v30, %v3119_v15  ;;  %v4416_v51 = vadd.f32 %v4381_v37, %v4237_v63  ;;  %v2964_v52 = vpop.f32.mrb[19].mxu0  ;;  %v3224_v59 = vadd.f32 %v3223_v48, %v3222_v35  ;;  %v3182_v23 = vmul.f32 %v4414_v19, %v4414_v19 }
 0x223   : > { %3074 = vst.msk [vmem:[%s5546_s11 + $0x80] sm:$0xff] %vm333_vm3, %v4415_v36  ;;  %v3122_v1 = vsel %vm333_vm3, %v4415_v36, 0.0  ;;  %v3180_v43 = vmul.f32 %v4415_v36, %v4415_v36  ;;  %v4417_v56 = vadd.f32 %v2964_v52, %v1739_v18  ;;  %v3126_v31 = vsel %vm333_vm3, %v4414_v19, 0.0 }
 0x224   : > { %v3123_v5 = vadd.f32 %v3122_v1, %v3121_v50  ;;  %3077 = vst.msk [vmem:[%s5546_s11 + $0x98] sm:$0xff] %vm333_vm3, %v4416_v51  ;;  %v3226_v61 = vadd.f32 %v3225_v60, %v3224_v59  ;;  %v3183_v33 = vmul.f32 %v4416_v51, %v4416_v51  ;;  %v3128_v10 = vsel %vm333_vm3, %v4416_v51, 0.0 }
 0x225   : > { %v3227_v0 = vsel %vm333_vm3, %v3180_v43, 0.0  ;;  %3075 = vst.msk [vmem:[%s5546_s11 + $0x88] sm:$0xff] %vm333_vm3, %v4417_v56  ;;  %v3124_v14 = vsel %vm333_vm3, %v4417_v56, 0.0  ;;  %v3181_v16 = vmul.f32 %v4417_v56, %v4417_v56  ;;  %v4240_v17 = vpop.f32.mrb[20].mxu1  ;;  %v3231_v25 = vsel %vm333_vm3, %v3182_v23, 0.0 }
 0x226   : > { %v3125_v21 = vadd.f32 %v3124_v14, %v3123_v5  ;;  %v1752_v3 = vpop.f32.mrb[21].mxu1  ;;  %v3228_v53 = vadd.f32 %v3227_v0, %v3226_v61  ;;  %v3233_v32 = vsel %vm333_vm3, %v3183_v33, 0.0 }
 0x227   : > { %v3229_v54 = vsel %vm333_vm3, %v3181_v16, 0.0  ;;  %v4384_v55 = vpop.f32.mrb[20].mxu0  ;;  %v4241_v22 = vpop.f32.mrb[22].mxu1 }
 0x228   : > { %v3127_v57 = vadd.f32 %v3126_v31, %v3125_v21  ;;  %v4418_v58 = vadd.f32 %v4384_v55, %v4240_v17  ;;  %v2977_v6 = vpop.f32.mrb[21].mxu0  ;;  %v1755_v9 = vpop.f32.mrb[23].mxu1  ;;  %v3230_v11 = vadd.f32 %v3229_v54, %v3228_v53 }
 0x229   : > { %v4419_v12 = vadd.f32 %v2977_v6, %v1752_v3  ;;  %v4385_v13 = vpop.f32.mrb[22].mxu0 }
 0x22a   : > { %3080 = vst.msk [vmem:[%s5546_s11 + $0xb0] sm:$0xff] %vm333_vm3, %v4418_v58  ;;  %v3129_v26 = vadd.f32 %v3128_v10, %v3127_v57  ;;  %v4420_v27 = vadd.f32 %v4385_v13, %v4241_v22  ;;  %v2980_v28 = vpop.f32.mrb[23].mxu0  ;;  %v3232_v8 = vadd.f32 %v3231_v25, %v3230_v11  ;;  %v3186_v34 = vmul.f32 %v4418_v58, %v4418_v58 }
 0x22b   : > { %3078 = vst.msk [vmem:[%s5546_s11 + $0xa0] sm:$0xff] %vm333_vm3, %v4419_v12  ;;  %v3130_v24 = vsel %vm333_vm3, %v4419_v12, 0.0  ;;  %v3184_v29 = vmul.f32 %v4419_v12, %v4419_v12  ;;  %v4421_v39 = vadd.f32 %v2980_v28, %v1755_v9  ;;  %v3134_v42 = vsel %vm333_vm3, %v4418_v58, 0.0 }
 0x22c   : > { %v3131_v40 = vadd.f32 %v3130_v24, %v3129_v26  ;;  %3081 = vst.msk [vmem:[%s5546_s11 + $0xb8] sm:$0xff] %vm333_vm3, %v4420_v27  ;;  %v3234_v46 = vadd.f32 %v3233_v32, %v3232_v8  ;;  %v3187_v7 = vmul.f32 %v4420_v27, %v4420_v27  ;;  %v3136_v30 = vsel %vm333_vm3, %v4420_v27, 0.0 }
 0x22d   : > { %v3235_v47 = vsel %vm333_vm3, %v3184_v29, 0.0  ;;  %3079 = vst.msk [vmem:[%s5546_s11 + $0xa8] sm:$0xff] %vm333_vm3, %v4421_v39  ;;  %v3132_v41 = vsel %vm333_vm3, %v4421_v39, 0.0  ;;  %v3185_v49 = vmul.f32 %v4421_v39, %v4421_v39  ;;  %v4244_v2 = vpop.f32.mrb[24].mxu1  ;;  %v3239_v48 = vsel %vm333_vm3, %v3186_v34, 0.0 }
 0x22e   : > { %v3133_v38 = vadd.f32 %v3132_v41, %v3131_v40  ;;  %v1768_v4 = vpop.f32.mrb[25].mxu1  ;;  %v3236_v44 = vadd.f32 %v3235_v47, %v3234_v46  ;;  %v3241_v60 = vsel %vm333_vm3, %v3187_v7, 0.0 }
 0x22f   : > { %v3237_v45 = vsel %vm333_vm3, %v3185_v49, 0.0  ;;  %v4388_v62 = vpop.f32.mrb[24].mxu0  ;;  %v4245_v63 = vpop.f32.mrb[26].mxu1 }
 0x230   : > { %v3135_v15 = vadd.f32 %v3134_v42, %v3133_v38  ;;  %v4422_v19 = vadd.f32 %v4388_v62, %v4244_v2  ;;  %v2993_v20 = vpop.f32.mrb[25].mxu0  ;;  %v1771_v18 = vpop.f32.mrb[27].mxu1  ;;  %v3238_v35 = vadd.f32 %v3237_v45, %v3236_v44 }
 0x231   : > { %v4423_v36 = vadd.f32 %v2993_v20, %v1768_v4  ;;  %v4389_v37 = vpop.f32.mrb[26].mxu0 }
 0x232   : > { %3084 = vst.msk [vmem:[%s5546_s11 + $0xd0] sm:$0xff] %vm333_vm3, %v4422_v19  ;;  %v3137_v50 = vadd.f32 %v3136_v30, %v3135_v15  ;;  %v4424_v51 = vadd.f32 %v4389_v37, %v4245_v63  ;;  %v2996_v52 = vpop.f32.mrb[27].mxu0  ;;  %v3240_v59 = vadd.f32 %v3239_v48, %v3238_v35  ;;  %v3190_v23 = vmul.f32 %v4422_v19, %v4422_v19 }
 0x233   : > { %3082 = vst.msk [vmem:[%s5546_s11 + $0xc0] sm:$0xff] %vm333_vm3, %v4423_v36  ;;  %v3138_v1 = vsel %vm333_vm3, %v4423_v36, 0.0  ;;  %v3188_v43 = vmul.f32 %v4423_v36, %v4423_v36  ;;  %v4425_v56 = vadd.f32 %v2996_v52, %v1771_v18  ;;  %v3142_v31 = vsel %vm333_vm3, %v4422_v19, 0.0 }
 0x234   : > { %v3139_v5 = vadd.f32 %v3138_v1, %v3137_v50  ;;  %3085 = vst.msk [vmem:[%s5546_s11 + $0xd8] sm:$0xff] %vm333_vm3, %v4424_v51  ;;  %v3242_v61 = vadd.f32 %v3241_v60, %v3240_v59  ;;  %v3191_v33 = vmul.f32 %v4424_v51, %v4424_v51  ;;  %v3144_v10 = vsel %vm333_vm3, %v4424_v51, 0.0  ;;  %v3090_v59 = vld [vmem:[#allocation4] sm:$0x1] }
 0x235   : > { %v3243_v0 = vsel %vm333_vm3, %v3188_v43, 0.0  ;;  %3083 = vst.msk [vmem:[%s5546_s11 + $0xc8] sm:$0xff] %vm333_vm3, %v4425_v56  ;;  %v3140_v14 = vsel %vm333_vm3, %v4425_v56, 0.0  ;;  %v3189_v16 = vmul.f32 %v4425_v56, %v4425_v56  ;;  %v4248_v17 = vpop.f32.mrb[28].mxu1  ;;  %v3247_v25 = vsel %vm333_vm3, %v3190_v23, 0.0 }
 0x236   : > { %v3141_v21 = vadd.f32 %v3140_v14, %v3139_v5  ;;  %v1784_v3 = vpop.f32.mrb[29].mxu1  ;;  %v3244_v53 = vadd.f32 %v3243_v0, %v3242_v61  ;;  %v3249_v32 = vsel %vm333_vm3, %v3191_v33, 0.0  ;;  %v3163_v5 = vld [vmem:[#allocation5] sm:$0x1] }
 0x237   : > { %v3245_v54 = vsel %vm333_vm3, %v3189_v16, 0.0  ;;  %v4392_v55 = vpop.f32.mrb[28].mxu0  ;;  %v4249_v22 = vpop.f32.mrb[30].mxu1 }
 0x238   : > { %v3143_v57 = vadd.f32 %v3142_v31, %v3141_v21  ;;  %v4426_v58 = vadd.f32 %v4392_v55, %v4248_v17  ;;  %v3009_v6 = vpop.f32.mrb[29].mxu0  ;;  %v1787_v9 = vpop.f32.mrb[31].mxu1  ;;  %v3246_v11 = vadd.f32 %v3245_v54, %v3244_v53 }
 0x239   : > { %v4427_v12 = vadd.f32 %v3009_v6, %v1784_v3  ;;  %v4393_v13 = vpop.f32.mrb[30].mxu0 }
 0x23a   : > { %3088 = vst.msk [vmem:[%s5546_s11 + $0xf0] sm:$0xff] %vm333_vm3, %v4426_v58  ;;  %v3145_v26 = vadd.f32 %v3144_v10, %v3143_v57  ;;  %v4428_v27 = vadd.f32 %v4393_v13, %v4249_v22  ;;  %v3012_v28 = vpop.f32.mrb[31].mxu0  ;;  %v3248_v8 = vadd.f32 %v3247_v25, %v3246_v11  ;;  %v3194_v2 = vmul.f32 %v4426_v58, %v4426_v58 }
 0x23b   : > { %3086 = vst.msk [vmem:[%s5546_s11 + $0xe0] sm:$0xff] %vm333_vm3, %v4427_v12  ;;  %v3146_v24 = vsel %vm333_vm3, %v4427_v12, 0.0  ;;  %v3192_v29 = vmul.f32 %v4427_v12, %v4427_v12  ;;  %v4429_v39 = vadd.f32 %v3012_v28, %v1787_v9  ;;  %v3150_v38 = vsel %vm333_vm3, %v4426_v58, 0.0 }
 0x23c   : > { %v3147_v40 = vadd.f32 %v3146_v24, %v3145_v26  ;;  %3089 = vst.msk [vmem:[%s5546_s11 + $0xf8] sm:$0xff] %vm333_vm3, %v4428_v27  ;;  %v3250_v46 = vadd.f32 %v3249_v32, %v3248_v8  ;;  %v3195_v44 = vmul.f32 %v4428_v27, %v4428_v27  ;;  %v3152_v62 = vsel %vm333_vm3, %v4428_v27, 0.0 }
 0x23d   : > { %v3251_v47 = vsel %vm333_vm3, %v3192_v29, 0.0  ;;  %3087 = vst.msk [vmem:[%s5546_s11 + $0xe8] sm:$0xff] %vm333_vm3, %v4429_v39  ;;  %v3148_v41 = vsel %vm333_vm3, %v4429_v39, 0.0  ;;  %v3193_v49 = vmul.f32 %v4429_v39, %v4429_v39  ;;  %v3255_v7 = vsel %vm333_vm3, %v3194_v2, 0.0 }
 0x23e   : > { %v3149_v34 = vadd.f32 %v3148_v41, %v3147_v40  ;;  %v3252_v4 = vadd.f32 %v3251_v47, %v3250_v46  ;;  %v3257_v20 = vsel %vm333_vm3, %v3195_v44, 0.0 }
 0x23f   : > { %v3253_v42 = vsel %vm333_vm3, %v3193_v49, 0.0 }
 0x240   : > { %v3151_v45 = vadd.f32 %v3150_v38, %v3149_v34  ;;  %v3254_v63 = vadd.f32 %v3253_v42, %v3252_v4 }
 0x242   : > { %v3153_v15 = vadd.f32 %v3152_v62, %v3151_v45  ;;  %v3256_v19 = vadd.f32 %v3255_v7, %v3254_v63 }
 0x244   : > { %v3154_v18 = vrot.slane %v3153_v15, 4  ;;  %v3258_v30 = vadd.f32 %v3257_v20, %v3256_v19 }
 0x246   : > { %v3155_v35 = vadd.f32 %v3154_v18, %v3153_v15  ;;  %v3259_v36 = vrot.slane %v3258_v30, 4 }
 0x248   : > { %v3156_v37 = vrot.slane %v3155_v35, 2  ;;  %v3260_v48 = vadd.f32 %v3259_v36, %v3258_v30 }
 0x24a   : > { %v3157_v50 = vadd.f32 %v3156_v37, %v3155_v35  ;;  %v3261_v51 = vrot.slane %v3260_v48, 2 }
 0x24c   : > { %v3158_v52 = vrot.slane %v3157_v50, 1  ;;  %v3262_v1 = vadd.f32 %v3261_v51, %v3260_v48 }
 0x24e   : > { %v3159_v43 = vadd.f32 %v3158_v52, %v3157_v50  ;;  %v3263_v56 = vrot.slane %v3262_v1, 1 }
 0x250   : > { %v3160_v60 = vadd.f32 %v3159_v43, %v3090_v59  ;;  %v3264_v61 = vadd.f32 %v3263_v56, %v3262_v1 }
 0x252   : > { %3162 = vst.msk [vmem:[#allocation4] sm:$0x1] %vm3161_vm4, %v3160_v60  ;;  %v3265_v0 = vadd.f32 %v3264_v61, %v3163_v5 }
 0x254   : > { %3266 = vst.msk [vmem:[#allocation5] sm:$0x1] %vm3161_vm4, %v3265_v0 }
 0x255 PF: > { %p3868_p1 = scmp.ne.s32.totalorder %s4830_s19, 1 }
 0x256   : > { %v3319_v54 = vlaneseq (!%p3868_p1)  ;;  %s3869_s12 = sshll.u32 (!%p3868_p1), %s4826_s18, 8  ;;  %v3278_v22 = vld [vmem:[%s5896_s2] sm:$0x1] (!%p3868_p1)  ;;  %vm3538_vm5 = vcmask (!%p3868_p1), 261120  }
 0x257   : > { %3270 = sbr.rel (%p3868_p1) target bundleno = 685 (0x2ad), region = 48  ;;  %v3282_v6 = vld [vmem:[%s5897_s3] sm:$0x1] (!%p3868_p1)  ;;  %s5692_s5 = scalar_lea.vmem (!%p3868_p1), [#allocation3], %s3869_s12 }
 0x258   : > { %v3320_v55 = vshrl.u32 (!%p3868_p1), %v3319_v54, 7  ;;  %v3287_v9 = vld [vmem:[%s5692_s5] ss:$2 sm:$0xff] (!%p3868_p1)  ;;  %v3870_v10 = vld [vmem:[%s5692_s5 + $0x10] ss:$2 sm:$0xff] (!%p3868_p1) }
 0x259   : > { %v3271_v14 = vld [vmem:[#allocation4] sm:$0x1] (!%p3868_p1)  ;;  %v3885_v11 = vld [vmem:[%s5692_s5 + $0x1] ss:$2 sm:$0xff] (!%p3868_p1)  ;;  %v3886_v12 = vld [vmem:[%s5692_s5 + $0x11] ss:$2 sm:$0xff] (!%p3868_p1) }
 0x25a   : > { %v3272_v17 = vmul.f32 (!%p3868_p1), 0.001953125, %v3271_v14  ;;  %v3321_v33 = vsub.s32 (!%p3868_p1), 0, %v3320_v55  ;;  %v3871_v13 = vld [vmem:[%s5692_s5 + $0x20] ss:$2 sm:$0xff] (!%p3868_p1)  ;;  %v3872_v27 = vld [vmem:[%s5692_s5 + $0x30] ss:$2 sm:$0xff] (!%p3868_p1) }
 0x25b   : > { %v3273_v16 = vld [vmem:[#allocation5] sm:$0x1] (!%p3868_p1)  ;;  %v3887_v28 = vld [vmem:[%s5692_s5 + $0x21] ss:$2 sm:$0xff] (!%p3868_p1)  ;;  %v3873_v24 = vld [vmem:[%s5692_s5 + $0x40] ss:$2 sm:$0xff] (!%p3868_p1) }
 0x25c   : > { %v3274_v23 = vmul.f32 (!%p3868_p1), 0.001953125, %v3273_v16  ;;  %v3275_v21 = vmul.f32 (!%p3868_p1), %v3272_v17, %v3272_v17  ;;  %v3888_v8 = vld [vmem:[%s5692_s5 + $0x31] ss:$2 sm:$0xff] (!%p3868_p1)  ;;  %v3874_v29 = vld [vmem:[%s5692_s5 + $0x50] ss:$2 sm:$0xff] (!%p3868_p1) }
 0x25d   : > { %v3889_v39 = vld [vmem:[%s5692_s5 + $0x41] ss:$2 sm:$0xff] (!%p3868_p1)  ;;  %v3890_v41 = vld [vmem:[%s5692_s5 + $0x51] ss:$2 sm:$0xff] (!%p3868_p1)  ;;  %v3875_v49 = vld [vmem:[%s5692_s5 + $0x60] ss:$2 sm:$0xff] (!%p3868_p1) }
 0x25e   : > { %v3276_v3 = vsub.f32 %v3274_v23, %v3275_v21  ;;  %v3876_v2 = vld [vmem:[%s5692_s5 + $0x70] ss:$2 sm:$0xff] }
 0x260   : > { %v3277_v31 = vmax.f32 %v3276_v3, 0.0 }
 0x262   : > { %v3279_v53 = vadd.f32 1e-05, %v3277_v31 }
 0x264   : > { %4746 = vrsqrt.f32 %v3279_v53 }
 0x26e   : > { %v4747_v57 = vpop.eup %4746 }
 0x26f   : > { %v3281_v58 = vmul.f32 %v4747_v57, %v3278_v22 }
 0x271   : > { %v3283_v25 = vmul.f32 %v3281_v58, %v3272_v17  ;;  %v5699_v26 = vrot.slane %v3281_v58, %v3321_v33 }
 0x273   : > { %v3284_v32 = vsub.f32 %v3282_v6, %v3283_v25  ;;  %v3324_v40 = vmul.f32 %v5699_v26, %v3287_v9  ;;  %v3325_v46 = vmul.f32 %v3870_v10, %v5699_v26  ;;  %v3442_v47 = vmul.f32 %v3885_v11, %v5699_v26  ;;  %v3891_v11 = vld [vmem:[%s5692_s5 + $0x61] ss:$2 sm:$0xff] }
 0x274   : > { %v3443_v34 = vmul.f32 %v3886_v12, %v5699_v26  ;;  %v3326_v38 = vmul.f32 %v3871_v13, %v5699_v26  ;;  %v3327_v4 = vmul.f32 %v3872_v27, %v5699_v26  ;;  %v3444_v42 = vmul.f32 %v3887_v28, %v5699_v26 }
 0x275   : > { %v5717_v44 = vrot.slane %v3284_v32, %v3321_v33  ;;  %v3445_v45 = vmul.f32 %v3888_v8, %v5699_v26  ;;  %v3328_v62 = vmul.f32 %v3873_v24, %v5699_v26  ;;  %v3329_v63 = vmul.f32 %v3874_v29, %v5699_v26  ;;  %v3892_v29 = vld [vmem:[%s5692_s5 + $0x71] ss:$2 sm:$0xff] }
 0x276   : > { %v3446_v7 = vmul.f32 %v3889_v39, %v5699_v26  ;;  %v3447_v15 = vmul.f32 %v3890_v41, %v5699_v26  ;;  %v3330_v19 = vmul.f32 %v3875_v49, %v5699_v26  ;;  %v5726_v20 = vmul.f32 %v3876_v2, %v5699_v26 }
 0x277   : > { %v3346_v18 = vadd.f32 %v5717_v44, %v3324_v40  ;;  %v3347_v30 = vadd.f32 %v5717_v44, %v3325_v46  ;;  %v3458_v35 = vadd.f32 %v3442_v47, %v5717_v44  ;;  %v3459_v36 = vadd.f32 %v3443_v34, %v5717_v44  ;;  %v3877_v46 = vld [vmem:[%s5692_s5 + $0x80] ss:$2 sm:$0xff] }
 0x278   : > { %v3348_v37 = vadd.f32 %v5717_v44, %v3326_v38  ;;  %v3349_v48 = vadd.f32 %v5717_v44, %v3327_v4  ;;  %v3460_v50 = vadd.f32 %v3444_v42, %v5717_v44  ;;  %v3461_v51 = vadd.f32 %v3445_v45, %v5717_v44  ;;  %v3878_v42 = vld [vmem:[%s5692_s5 + $0x90] ss:$2 sm:$0xff] }
 0x279   : > { %vm3362_vm6 = vcmp.gt.f32.partialorder %v3346_v18, 0.0  ;;  %vm3363_vm7 = vcmp.gt.f32.partialorder %v3347_v30, 0.0  ;;  %v3378_v52 = vmul.f32 0.1, %v3346_v18  ;;  %v3379_v59 = vmul.f32 0.1, %v3347_v30 }
 0x27a   : > { %vm3474_vm8 = vcmp.gt.f32.partialorder %v3458_v35, 0.0  ;;  %vm3475_vm9 = vcmp.gt.f32.partialorder %v3459_v36, 0.0  ;;  %v3490_v1 = vmul.f32 0.1, %v3458_v35  ;;  %v3491_v43 = vmul.f32 0.1, %v3459_v36 }
 0x27b   : > { %v3394_v56 = vsel %vm3362_vm6, %v3346_v18, %v3378_v52  ;;  %v3395_v60 = vsel %vm3363_vm7, %v3347_v30, %v3379_v59  ;;  %vm3364_vm10 = vcmp.gt.f32.partialorder %v3348_v37, 0.0  ;;  %vm3365_vm11 = vcmp.gt.f32.partialorder %v3349_v48, 0.0 }
 0x27c   : > { %v3506_v5 = vsel %vm3474_vm8, %v3458_v35, %v3490_v1  ;;  %v3507_v61 = vsel %vm3475_vm9, %v3459_v36, %v3491_v43  ;;  %v3380_v0 = vmul.f32 0.1, %v3348_v37  ;;  %v3381_v14 = vmul.f32 0.1, %v3349_v48 }
 0x27d   : > { %v3522_v16 = vmax.f32 %v3394_v56, %v3506_v5  ;;  %v3523_v17 = vmax.f32 %v3395_v60, %v3507_v61  ;;  %vm3476_vm12 = vcmp.gt.f32.partialorder %v3460_v50, 0.0  ;;  %vm3477_vm13 = vcmp.gt.f32.partialorder %v3461_v51, 0.0  ;;  %v3879_v56 = vld [vmem:[%s5692_s5 + $0xa0] ss:$2 sm:$0xff] }
 0x27e   : > { %v3396_v23 = vsel %vm3364_vm10, %v3348_v37, %v3380_v0  ;;  %v3397_v21 = vsel %vm3365_vm11, %v3349_v48, %v3381_v14  ;;  %v3492_v3 = vmul.f32 0.1, %v3460_v50  ;;  %v3493_v31 = vmul.f32 0.1, %v3461_v51  ;;  %v3894_v48 = vld [vmem:[%s5692_s5 + $0x91] ss:$2 sm:$0xff] }
 0x27f   : > { %v3539_v53 = vsel %vm3538_vm5, %v3522_v16, -inf  ;;  %v3540_v54 = vsel %vm3538_vm5, %v3523_v17, -inf  ;;  %v3350_v55 = vadd.f32 %v5717_v44, %v3328_v62  ;;  %v3351_v22 = vadd.f32 %v5717_v44, %v3329_v63  ;;  %v3880_v0 = vld [vmem:[%s5692_s5 + $0xb0] ss:$2 sm:$0xff] }
 0x280   : > { %v3541_v33 = vmax.f32 %v3539_v53, %v3540_v54  ;;  %v3508_v57 = vsel %vm3476_vm12, %v3460_v50, %v3492_v3  ;;  %v3509_v58 = vsel %vm3477_vm13, %v3461_v51, %v3493_v31  ;;  %v3462_v6 = vadd.f32 %v3446_v7, %v5717_v44  ;;  %v3893_v7 = vld [vmem:[%s5692_s5 + $0x81] ss:$2 sm:$0xff] }
 0x281   : > { %v3524_v9 = vmax.f32 %v3396_v23, %v3508_v57  ;;  %v3525_v10 = vmax.f32 %v3397_v21, %v3509_v58  ;;  %vm3366_vm14 = vcmp.gt.f32.partialorder %v3350_v55, 0.0  ;;  %vm3367_vm15 = vcmp.gt.f32.partialorder %v3351_v22, 0.0  ;;  %v3895_v53 = vld [vmem:[%s5692_s5 + $0xa1] ss:$2 sm:$0xff]  ;;  %v3896_v57 = vld [vmem:[%s5692_s5 + $0xb1] ss:$2 sm:$0xff] }
 0x282   : > { %3563 = vst.msk [vmem:[%s4955_s27] sm:$0xff] %vm3538_vm5, %v3541_v33  ;;  %v3382_v12 = vmul.f32 0.1, %v3350_v55  ;;  %v3383_v13 = vmul.f32 0.1, %v3351_v22  ;;  %v3463_v25 = vadd.f32 %v3447_v15, %v5717_v44  ;;  %vm3478_vm0 = vcmp.gt.f32.partialorder %v3462_v6, 0.0 }
 0x283   : > { %v3542_v27 = vsel %vm3538_vm5, %v3524_v9, -inf  ;;  %v3543_v28 = vsel %vm3538_vm5, %v3525_v10, -inf  ;;  %v3494_v8 = vmul.f32 0.1, %v3462_v6  ;;  %v3352_v24 = vadd.f32 %v5717_v44, %v3330_v19  ;;  %v3881_v58 = vld [vmem:[%s5692_s5 + $0xc0] ss:$2 sm:$0xff] }
 0x284   : > { %v3544_v39 = vmax.f32 %v3542_v27, %v3543_v28  ;;  %v3398_v32 = vsel %vm3366_vm14, %v3350_v55, %v3382_v12  ;;  %v3399_v40 = vsel %vm3367_vm15, %v3351_v22, %v3383_v13  ;;  %vm3479_vm1 = vcmp.gt.f32.partialorder %v3463_v25, 0.0 }
 0x285   : > { %v3495_v47 = vmul.f32 0.1, %v3463_v25  ;;  %v3510_v41 = vsel %vm3478_vm0, %v3462_v6, %v3494_v8  ;;  %v3353_v49 = vadd.f32 %v5717_v44, %v5726_v20  ;;  %vm3368_vm2 = vcmp.gt.f32.partialorder %v3352_v24, 0.0  ;;  %v3882_v8 = vld [vmem:[%s5692_s5 + $0xd0] ss:$2 sm:$0xff] }
 0x286   : > { %3564 = vst.msk [vmem:[%s4955_s27 + $0x8] sm:$0xff] %vm3538_vm5, %v3544_v39  ;;  %v3526_v2 = vmax.f32 %v3398_v32, %v3510_v41  ;;  %v3384_v34 = vmul.f32 0.1, %v3352_v24  ;;  %v3448_v38 = vmul.f32 %v3891_v11, %v5699_v26  ;;  %v3449_v4 = vmul.f32 %v3892_v29, %v5699_v26 }
 0x287   : > { %v3511_v45 = vsel %vm3479_vm1, %v3463_v25, %v3495_v47  ;;  %vm3369_vm3 = vcmp.gt.f32.partialorder %v3353_v49, 0.0  ;;  %v3385_v62 = vmul.f32 0.1, %v3353_v49  ;;  %v3332_v63 = vmul.f32 %v3877_v46, %v5699_v26 }
 0x288   : > { %v3527_v15 = vmax.f32 %v3399_v40, %v3511_v45  ;;  %v3545_v19 = vsel %vm3538_vm5, %v3526_v2, -inf  ;;  %v3400_v20 = vsel %vm3368_vm2, %v3352_v24, %v3384_v34  ;;  %v3464_v18 = vadd.f32 %v3448_v38, %v5717_v44  ;;  %v3897_v38 = vld [vmem:[%s5692_s5 + $0xc1] ss:$2 sm:$0xff] }
 0x289   : > { %v3401_v30 = vsel %vm3369_vm3, %v3353_v49, %v3385_v62  ;;  %v3465_v35 = vadd.f32 %v3449_v4, %v5717_v44  ;;  %v3333_v36 = vmul.f32 %v3878_v42, %v5699_v26  ;;  %v3354_v37 = vadd.f32 %v5717_v44, %v3332_v63  ;;  %v3898_v62 = vld [vmem:[%s5692_s5 + $0xd1] ss:$2 sm:$0xff]  ;;  %v3883_v63 = vld [vmem:[%s5692_s5 + $0xe0] ss:$2 sm:$0xff] }
 0x28a   : > { %v3546_v50 = vsel %vm3538_vm5, %v3527_v15, -inf  ;;  %vm3480_vm4 = vcmp.gt.f32.partialorder %v3464_v18, 0.0  ;;  %v3496_v51 = vmul.f32 0.1, %v3464_v18  ;;  %v3450_v52 = vmul.f32 %v3893_v7, %v5699_v26 }
 0x28b   : > { %v3547_v59 = vmax.f32 %v3545_v19, %v3546_v50  ;;  %vm3481_vm6 = vcmp.gt.f32.partialorder %v3465_v35, 0.0  ;;  %v3497_v1 = vmul.f32 0.1, %v3465_v35  ;;  %v3355_v43 = vadd.f32 %v5717_v44, %v3333_v36 }
 0x28c   : > { %v3512_v60 = vsel %vm3480_vm4, %v3464_v18, %v3496_v51  ;;  %vm3370_vm7 = vcmp.gt.f32.partialorder %v3354_v37, 0.0  ;;  %v3386_v5 = vmul.f32 0.1, %v3354_v37  ;;  %v3451_v61 = vmul.f32 %v3894_v48, %v5699_v26 }
 0x28d   : > { %3565 = vst.msk [vmem:[%s4955_s27 + $0x10] sm:$0xff] %vm3538_vm5, %v3547_v59  ;;  %v3513_v14 = vsel %vm3481_vm6, %v3465_v35, %v3497_v1  ;;  %v3528_v16 = vmax.f32 %v3400_v20, %v3512_v60  ;;  %vm3371_vm8 = vcmp.gt.f32.partialorder %v3355_v43, 0.0  ;;  %v3387_v17 = vmul.f32 0.1, %v3355_v43  ;;  %v3884_v35 = vld [vmem:[%s5692_s5 + $0xf0] ss:$2 sm:$0xff] }
 0x28e   : > { %v3529_v23 = vmax.f32 %v3401_v30, %v3513_v14  ;;  %v3402_v21 = vsel %vm3370_vm7, %v3354_v37, %v3386_v5  ;;  %v3466_v3 = vadd.f32 %v3450_v52, %v5717_v44  ;;  %v3467_v31 = vadd.f32 %v3451_v61, %v5717_v44  ;;  %v3899_v14 = vld [vmem:[%s5692_s5 + $0xe1] ss:$2 sm:$0xff] }
 0x28f   : > { %v3548_v54 = vsel %vm3538_vm5, %v3528_v16, -inf  ;;  %v3403_v55 = vsel %vm3371_vm8, %v3355_v43, %v3387_v17  ;;  %v3334_v22 = vmul.f32 %v3879_v56, %v5699_v26  ;;  %v3335_v33 = vmul.f32 %v3880_v0, %v5699_v26  ;;  %v3900_v16 = vld [vmem:[%s5692_s5 + $0xf1] ss:$2 sm:$0xff] }
 0x290   : > { %v3549_v6 = vsel %vm3538_vm5, %v3529_v23, -inf  ;;  %vm3482_vm9 = vcmp.gt.f32.partialorder %v3466_v3, 0.0  ;;  %vm3483_vm10 = vcmp.gt.f32.partialorder %v3467_v31, 0.0  ;;  %v3498_v9 = vmul.f32 0.1, %v3466_v3 }
 0x291   : > { %v3550_v10 = vmax.f32 %v3548_v54, %v3549_v6  ;;  %v3499_v11 = vmul.f32 0.1, %v3467_v31  ;;  %v3356_v12 = vadd.f32 %v5717_v44, %v3334_v22  ;;  %v3357_v13 = vadd.f32 %v5717_v44, %v3335_v33 }
 0x292   : > { %v3514_v25 = vsel %vm3482_vm9, %v3466_v3, %v3498_v9  ;;  %v3452_v27 = vmul.f32 %v3895_v53, %v5699_v26  ;;  %v3453_v28 = vmul.f32 %v3896_v57, %v5699_v26  ;;  %v3336_v24 = vmul.f32 %v3881_v58, %v5699_v26 }
 0x293   : > { %3566 = vst.msk [vmem:[%s4955_s27 + $0x18] sm:$0xff] %vm3538_vm5, %v3550_v10  ;;  %v3515_v29 = vsel %vm3483_vm10, %v3467_v31, %v3499_v11  ;;  %v3530_v39 = vmax.f32 %v3402_v21, %v3514_v25  ;;  %vm3372_vm11 = vcmp.gt.f32.partialorder %v3356_v12, 0.0  ;;  %vm3373_vm12 = vcmp.gt.f32.partialorder %v3357_v13, 0.0 }
 0x294   : > { %v3531_v32 = vmax.f32 %v3403_v55, %v3515_v29  ;;  %v3388_v40 = vmul.f32 0.1, %v3356_v12  ;;  %v3389_v46 = vmul.f32 0.1, %v3357_v13  ;;  %v3468_v47 = vadd.f32 %v3452_v27, %v5717_v44 }
 0x295   : > { %v3551_v41 = vsel %vm3538_vm5, %v3530_v39, -inf  ;;  %v3469_v49 = vadd.f32 %v3453_v28, %v5717_v44  ;;  %v3337_v2 = vmul.f32 %v3882_v8, %v5699_v26  ;;  %v3358_v34 = vadd.f32 %v5717_v44, %v3336_v24 }
 0x296   : > { %v3552_v4 = vsel %vm3538_vm5, %v3531_v32, -inf  ;;  %v3404_v42 = vsel %vm3372_vm11, %v3356_v12, %v3388_v40  ;;  %v3405_v45 = vsel %vm3373_vm12, %v3357_v13, %v3389_v46  ;;  %vm3484_vm13 = vcmp.gt.f32.partialorder %v3468_v47, 0.0 }
 0x297   : > { %v3553_v7 = vmax.f32 %v3551_v41, %v3552_v4  ;;  %vm3485_vm14 = vcmp.gt.f32.partialorder %v3469_v49, 0.0  ;;  %v3500_v15 = vmul.f32 0.1, %v3468_v47  ;;  %v3501_v19 = vmul.f32 0.1, %v3469_v49 }
 0x298   : > { %v3359_v20 = vadd.f32 %v5717_v44, %v3337_v2  ;;  %vm3374_vm15 = vcmp.gt.f32.partialorder %v3358_v34, 0.0  ;;  %v3390_v18 = vmul.f32 0.1, %v3358_v34  ;;  %v3454_v30 = vmul.f32 %v3897_v38, %v5699_v26 }
 0x299   : > { %3567 = vst.msk [vmem:[%s4955_s27 + $0x20] sm:$0xff] %vm3538_vm5, %v3553_v7  ;;  %v3516_v36 = vsel %vm3484_vm13, %v3468_v47, %v3500_v15  ;;  %v3517_v37 = vsel %vm3485_vm14, %v3469_v49, %v3501_v19  ;;  %v3455_v48 = vmul.f32 %v3898_v62, %v5699_v26  ;;  %v3338_v50 = vmul.f32 %v3883_v63, %v5699_v26 }
 0x29a   : > { %v3532_v51 = vmax.f32 %v3404_v42, %v3516_v36  ;;  %v3533_v52 = vmax.f32 %v3405_v45, %v3517_v37  ;;  %v3391_v59 = vmul.f32 0.1, %v3359_v20  ;;  %vm3375_vm0 = vcmp.gt.f32.partialorder %v3359_v20, 0.0 }
 0x29b   : > { %v3470_v1 = vadd.f32 %v3454_v30, %v5717_v44  ;;  %v3471_v43 = vadd.f32 %v3455_v48, %v5717_v44  ;;  %v3339_v56 = vmul.f32 %v3884_v35, %v5699_v26  ;;  %v3406_v61 = vsel %vm3374_vm15, %v3358_v34, %v3390_v18 }
 0x29c   : > { %v3554_v60 = vsel %vm3538_vm5, %v3532_v51, -inf  ;;  %v3555_v5 = vsel %vm3538_vm5, %v3533_v52, -inf  ;;  %v3360_v0 = vadd.f32 %v5717_v44, %v3338_v50  ;;  %v3407_v21 = vsel %vm3375_vm0, %v3359_v20, %v3391_v59 }
 0x29d   : > { %v3556_v17 = vmax.f32 %v3554_v60, %v3555_v5  ;;  %vm3486_vm1 = vcmp.gt.f32.partialorder %v3470_v1, 0.0  ;;  %vm3487_vm2 = vcmp.gt.f32.partialorder %v3471_v43, 0.0  ;;  %v3502_v23 = vmul.f32 0.1, %v3470_v1 }
 0x29e   : > { %v3503_v3 = vmul.f32 0.1, %v3471_v43  ;;  %v3361_v31 = vadd.f32 %v5717_v44, %v3339_v56  ;;  %v3392_v53 = vmul.f32 0.1, %v3360_v0  ;;  %vm3376_vm3 = vcmp.gt.f32.partialorder %v3360_v0, 0.0 }
 0x29f   : > { %3568 = vst.msk [vmem:[%s4955_s27 + $0x28] sm:$0xff] %vm3538_vm5, %v3556_v17  ;;  %v3518_v54 = vsel %vm3486_vm1, %v3470_v1, %v3502_v23  ;;  %v3456_v55 = vmul.f32 %v3899_v14, %v5699_v26  ;;  %v3457_v22 = vmul.f32 %v3900_v16, %v5699_v26 }
 0x2a0   : > { %v3519_v33 = vsel %vm3487_vm2, %v3471_v43, %v3503_v3  ;;  %v3534_v57 = vmax.f32 %v3406_v61, %v3518_v54  ;;  %v3393_v58 = vmul.f32 0.1, %v3361_v31  ;;  %vm3377_vm4 = vcmp.gt.f32.partialorder %v3361_v31, 0.0 }
 0x2a1   : > { %v3535_v6 = vmax.f32 %v3407_v21, %v3519_v33  ;;  %v3472_v9 = vadd.f32 %v3456_v55, %v5717_v44  ;;  %v3473_v10 = vadd.f32 %v3457_v22, %v5717_v44  ;;  %v3408_v12 = vsel %vm3376_vm3, %v3360_v0, %v3392_v53 }
 0x2a2   : > { %v3557_v11 = vsel %vm3538_vm5, %v3534_v57, -inf  ;;  %v3409_v27 = vsel %vm3377_vm4, %v3361_v31, %v3393_v58 }
 0x2a3   : > { %v3558_v13 = vsel %vm3538_vm5, %v3535_v6, -inf  ;;  %vm3488_vm6 = vcmp.gt.f32.partialorder %v3472_v9, 0.0  ;;  %vm3489_vm7 = vcmp.gt.f32.partialorder %v3473_v10, 0.0  ;;  %v3504_v25 = vmul.f32 0.1, %v3472_v9 }
 0x2a4   : > { %v3559_v26 = vmax.f32 %v3557_v11, %v3558_v13  ;;  %v3505_v28 = vmul.f32 0.1, %v3473_v10 }
 0x2a5   : > { %v3520_v8 = vsel %vm3488_vm6, %v3472_v9, %v3504_v25 }
 0x2a6   : > { %3569 = vst.msk [vmem:[%s4955_s27 + $0x30] sm:$0xff] %vm3538_vm5, %v3559_v26  ;;  %v3521_v24 = vsel %vm3489_vm7, %v3473_v10, %v3505_v28  ;;  %v3536_v29 = vmax.f32 %v3408_v12, %v3520_v8 }
 0x2a7   : > { %v3537_v39 = vmax.f32 %v3409_v27, %v3521_v24 }
 0x2a8   : > { %v3560_v44 = vsel %vm3538_vm5, %v3536_v29, -inf }
 0x2a9   : > { %v3561_v32 = vsel %vm3538_vm5, %v3537_v39, -inf }
 0x2aa   : > { %v3562_v40 = vmax.f32 %v3560_v44, %v3561_v32 }
 0x2ac   : > { %3570 = vst.msk [vmem:[%s4955_s27 + $0x38] sm:$0xff] %vm3538_vm5, %v3562_v40 }
 0x2ad PF: > { %s3579_s24 = smul.u32 %s4826_s18, %s4830_s19  ;;  %s3586_s6 = sshll.u32 %s4955_s27, 4  ;;  %s5833_s6 = int_to_ptr.vmem [resolvable:$true] %s3586_s6 }
 0x2ae   : > { %s5842_s13 = scalar_lea.sflag [#allocation7], %s217_s8  ;;  %s4748_s14 = scalar_lea.vmem %s5833_s6, 1024 }
 0x2af   : > { %s3907_s9 = sshll.u32 %s3579_s24, 10  ;;  %p4749_p2 = scmp.ne.s32.totalorder %s5833_s6, %s4748_s14 }
 0x2b0   : > { %s5838_s12 = scalar_lea.hbm %s5898_s4, %s3907_s9  ;;  %s4845_s18 = smov [#allocation6]  }
 0x2b1   : > { %p4750_p3 = pnand %p4749_p2, %p4926_p6  ;;  %s4752_s19 = sshll.u32 %s4845_s18, 4  ;;  %s4753_s19 = int_to_ptr.vmem [resolvable:$false] %s4752_s19 }
 0x2b2   : > { %s4754_s27 = scalar_lea.vmem %s4753_s19, 2048  ;;  %p4755_p5 = scmp.lt.s32.totalorder %s5833_s6, %s4753_s19 }
 0x2b3   : > { %p4751_p4 = pneg %p4750_p3  ;;  %p4756_p7 = scmp.lt.s32.totalorder %s4754_s27, %s4748_s14 }
 0x2b5   : > { %p4757_p9 = por %p4756_p7, %p4755_p5 }
 0x2b7   : > { %p4758_p10 = pnand %p4757_p9, %p4751_p4 }
 0x2b9   : > { %4761 = shalt.err (!%p4758_p10)
}
 0x2ba   : > { %s4762_s8 = scalar_lea.hbm %s5838_s12, 1024  ;;  %s4766_s5 = scalar_lea.hbm %s5898_s4, 2048 }
 0x2bb   : > { %p4763_p11 = scmp.ne.s32.totalorder %s5838_s12, %s4762_s8  ;;  %p4767_p0 = scmp.lt.u32.totalorder %s5838_s12, %s5898_s4 }
 0x2bc   : > { %p4768_p1 = scmp.lt.u32.totalorder %s4766_s5, %s4762_s8  ;;  %p4770_p3 = scmp.lt.u32.totalorder %s4762_s8, %s5838_s12 }
 0x2bd   : > { %p4764_p12 = pnand %p4763_p11, %p4926_p6 }
 0x2be   : > { %p4769_p2 = por %p4768_p1, %p4767_p0 }
 0x2bf   : > { %p4765_p13 = pneg %p4764_p12 }
 0x2c0   : > { %p4771_p4 = por %p4770_p3, %p4769_p2 }
 0x2c2   : > { %p4772_p5 = pnand %p4771_p4, %p4765_p13 }
 0x2c4   : > { %4775 = shalt.err (!%p4772_p5)
}
 0x2c5   : > { %s4846_s10 = smov 128   ;;  %s4847_s11 = smov 8  }
 0x2c6   : > { %4654 = dma.vmem_to_hbm [thread:$0]  (%p4926_p6), %s5833_s6, 1024, %s5838_s12, %s5842_s13, %s4846_s10, %s4846_s10, %s4847_s11  }
 0x2c7 PF: > { %p4660_p7 = scmp.ge.s32.totalorder %s4842_s22, 2  ;;  %s3601_s14 = sand.u32 1, %s4814_s15  }
 0x2c8   : > { %s3602_s18 = scalar_lea.sflag [#allocation7], %s3601_s14 }
 0x2c9   : > { %p4657_p9 = pnand %p4660_p7, %p4933_p8 }
 0x2cb   : > { %4809 = dma.done.wait (!%p4657_p9), %s3602_s18, 1024  }
 0x2cc   : > { %4811 = vsyncadd (!%p4657_p9), %s3602_s18, 4294966272  ;;  %s17_s22 = sadd.s32 1, %s4842_s22   ;;  %s5901_s15 = smov %s4818_s16 }
 0x2cd   : > { %p14_p10 = scmp.ge.s32.totalorder %s17_s22, 6   ;;  %s5902_s16 = smov %s4822_s17 }
 0x2ce   : > { %s5903_s17 = smov %s4942_s7  ;;  %s5904_s18 = smov %s4834_s20 }
 0x2cf   : > { %s5905_s19 = smov %s4838_s21  ;;  %s5906_s20 = smov %s5909_s25 }
 0x2d0   : > { %s5907_s21 = smov %s5913_s26  ;;  %16 = sbr.rel (!%p14_p10) target bundleno = 5 (0x5), region = 126 }
 0x2d7   :  { %3607 = vsyncpa [#allocation7], 1 }
 0x2d8   :  { %3609 = vsyncpa [#allocation7 + $0x1], 1 }

</bundles_post_ra>
